<compile_context>
chip_gen: v7x
topology: tpu7x:2x2x1
jax: 0.10.0
libtpu: 0.0.40
codegen_flags: <defaults>
</compile_context>

<pallas_src>
import jax
import jax.numpy as jnp
from jax.experimental import pallas as pl
from jax.experimental.pallas import tpu as pltpu

EPS = 1e-5
_VMEM_LIMIT_BYTES = 48 * 1024 * 1024  # stays inside v7x's 64 MiB physical VMEM


def _round_up(v, m):
    return (v + m - 1) // m * m


# ----------------------------------------------------------------------------
# In-kernel helpers
# ----------------------------------------------------------------------------
def _conv3x3_flat(x_flat, w_ref, H, W, Wpp):
    """3x3 / stride 1 / pad 1 conv on a flattened zero-padded image.

    x_flat: ((H+3)*Wpp, Cp) zero-padded image, row-major with row stride Wpp.
    w_ref:  (9, Cp, Cp) taps, tap t = kh*3 + kw, each (Cin, Cout).
    Returns (H, W, Cp) float32 conv output (valid region only).
    """
    R = H * Wpp
    Cp = x_flat.shape[-1]
    acc = jnp.zeros((R, Cp), jnp.float32)
    for kh in range(3):
        for kw in range(3):
            s = kh * Wpp + kw  # static row offset: tap = shifted view of x_flat
            acc = acc + jnp.dot(x_flat[s:s + R, :], w_ref[kh * 3 + kw],
                                preferred_element_type=jnp.float32)
    return acc.reshape(H, Wpp, Cp)[:, :W, :]


def _channel_stats(y):
    """Per-channel [sum, sum of squares] over the valid pixels of one image."""
    H, W, Cp = y.shape
    yf = y.reshape(H * W, Cp)
    s = jnp.sum(yf, axis=0, keepdims=True)
    sq = jnp.sum(yf * yf, axis=0, keepdims=True)
    return jnp.concatenate([s, sq], axis=0)  # (2, Cp)


# ----------------------------------------------------------------------------
# Kernels (grid = (N,), one image per step)
# ----------------------------------------------------------------------------
def _conv_stats_kernel(x_ref, w_ref, h_ref, st_ref):
    # x_ref : (Hp, Wpp, Cp) zero-padded input image (compute dtype)
    # w_ref : (9, Cp, Cp)   conv1 taps
    # h_ref : (H, W, Cp)    conv1 output (pre-BN)
    # st_ref: (2, Cp)       per-image [sum, sumsq] (f32) for the BN1 statistics
    H, W, _ = h_ref.shape
    Hp, Wpp, Cp = x_ref.shape
    x_flat = x_ref[...].reshape(Hp * Wpp, Cp)
    y = _conv3x3_flat(x_flat, w_ref, H, W, Wpp)
    h_ref[...] = y.astype(h_ref.dtype)
    st_ref[...] = _channel_stats(y)


def _bn_relu_conv_kernel(h1_ref, sc_ref, sh_ref, w_ref, h2_ref, st_ref, pad_ref):
    # h1_ref : (H, W, Cp)  conv1 output (pre-BN)
    # sc/sh  : (1, Cp)     folded BN1 scale / shift (f32)
    # w_ref  : (9, Cp, Cp) conv2 taps
    # h2_ref : (H, W, Cp)  conv2 output (pre-BN)
    # st_ref : (2, Cp)     per-image [sum, sumsq] for the BN2 statistics
    # pad_ref: persistent VMEM scratch (Hp, Wpp, Cp) holding the zero-padded
    #          BN1+ReLU activation (no full-tensor zeros+update materialization).
    H, W, Cp = h1_ref.shape
    Hp, Wpp, _ = pad_ref.shape
    cdt = pad_ref.dtype

    # BN1 (folded scale/shift) + ReLU, fused into the conv2 prologue (f32 math).
    a1 = h1_ref[...].astype(jnp.float32) * sc_ref[...] + sh_ref[...]
    a1 = jnp.maximum(a1, 0.0)

    # Keep the 1-px zero border of the scratch valid (cheap & megacore-safe),
    # then write the activation into the interior.
    pad_ref[0:1, :, :] = jnp.zeros((1, Wpp, Cp), cdt)
    pad_ref[H + 1:Hp, :, :] = jnp.zeros((Hp - H - 1, Wpp, Cp), cdt)
    pad_ref[:, 0:1, :] = jnp.zeros((Hp, 1, Cp), cdt)
    pad_ref[:, W + 1:Wpp, :] = jnp.zeros((Hp, Wpp - W - 1, Cp), cdt)
    pad_ref[1:H + 1, 1:W + 1, :] = a1.astype(cdt)

    x_flat = pad_ref[...].reshape(Hp * Wpp, Cp)
    y = _conv3x3_flat(x_flat, w_ref, H, W, Wpp)
    h2_ref[...] = y.astype(h2_ref.dtype)
    st_ref[...] = _channel_stats(y)


def _bn_residual_kernel(h2_ref, x_ref, sc_ref, sh_ref, o_ref):
    # Fused BN2 (folded scale/shift) + residual add, lane-dense store.
    z = h2_ref[...].astype(jnp.float32) * sc_ref[...] + sh_ref[...]
    o_ref[...] = (z + x_ref[...].astype(jnp.float32)).astype(o_ref.dtype)


# ----------------------------------------------------------------------------
# pallas_call wrapper
# ----------------------------------------------------------------------------
def _pcall(kernel, *, grid, in_specs, out_shape, out_specs, scratch_shapes=()):
    return pl.pallas_call(
        kernel,
        out_shape=out_shape,
        grid_spec=pltpu.PrefetchScalarGridSpec(
            num_scalar_prefetch=0,
            grid=grid,
            in_specs=list(in_specs),
            out_specs=out_specs,
            scratch_shapes=list(scratch_shapes)),
        compiler_params=pltpu.CompilerParams(
            dimension_semantics=("parallel",) * len(grid),
            vmem_limit_bytes=_VMEM_LIMIT_BYTES))


def _fold_bn(st, gamma, beta, npix, C, Cp):
    """Training-mode BN folded into per-channel scale/shift from per-image partials."""
    ssum = jnp.sum(st[:, 0, :], axis=0)
    ssq = jnp.sum(st[:, 1, :], axis=0)
    mean = ssum / npix
    var = jnp.maximum(ssq / npix - mean * mean, 0.0)  # biased variance
    g = jnp.pad(gamma, (0, Cp - C))
    b = jnp.pad(beta, (0, Cp - C))
    scale = g * jax.lax.rsqrt(var + EPS)
    shift = b - mean * scale
    return scale.reshape(1, Cp), shift.reshape(1, Cp)


# ----------------------------------------------------------------------------
# Public entry point
# ----------------------------------------------------------------------------
def residual_block(x_nchw, params, *, compute_dtype=jnp.bfloat16):
    """SRGAN ResidualBlock forward. x_nchw: (N, C, H, W) f32 -> (N, C, H, W) f32."""
    w1, b1, g1, be1, w2, b2, g2, be2 = params
    del b1, b2  # conv bias is exactly cancelled by training-mode BatchNorm.
    N, C, H, W = x_nchw.shape

    Cp = _round_up(C, 128)      # lane-dense channel axis
    Wpp = _round_up(W + 2, 8)   # padded width, sublane aligned
    Hp = H + 3                  # 1 top pad row + 2 bottom rows (pad + tap slack)
    npix = N * H * W

    # NCHW -> NHWC, channel-pad (lane-aligned residual), then spatial zero-pad.
    x_nhwc = jnp.transpose(x_nchw, (0, 2, 3, 1))
    x_res = jnp.pad(x_nhwc, ((0, 0), (0, 0), (0, 0), (0, Cp - C)))
    x_pad = jnp.pad(x_res, ((0, 0), (1, Hp - H - 1), (1, Wpp - W - 1),
                            (0, 0))).astype(compute_dtype)

    def taps(w_oihw):  # (Cout, Cin, 3, 3) -> (9, Cp, Cp), tap = kh*3+kw, (Cin, Cout)
        t = jnp.transpose(w_oihw, (2, 3, 1, 0)).reshape(9, C, C)
        return jnp.pad(t, ((0, 0), (0, Cp - C), (0, Cp - C))).astype(compute_dtype)

    w1t, w2t = taps(w1), taps(w2)

    img4 = lambda n: (n, 0, 0, 0)
    img3 = lambda n: (n, 0, 0)
    spec_xpad = pl.BlockSpec((None, Hp, Wpp, Cp), img4)
    spec_img = pl.BlockSpec((None, H, W, Cp), img4)
    spec_st = pl.BlockSpec((None, 2, Cp), img3)
    spec_w = pl.BlockSpec((9, Cp, Cp), lambda n: (0, 0, 0))
    spec_vec = pl.BlockSpec((1, Cp), lambda n: (0, 0))

    # ---- pass A: conv1 + per-image channel stats -----------------------------
    h1, st1 = _pcall(
        _conv_stats_kernel, grid=(N,),
        in_specs=[spec_xpad, spec_w],
        out_shape=(jax.ShapeDtypeStruct((N, H, W, Cp), compute_dtype),
                   jax.ShapeDtypeStruct((N, 2, Cp), jnp.float32)),
        out_specs=(spec_img, spec_st),
    )(x_pad, w1t)

    sc1, sh1 = _fold_bn(st1, g1, be1, npix, C, Cp)

    # ---- pass B: BN1 + ReLU fused into conv2, + channel stats ----------------
    h2, st2 = _pcall(
        _bn_relu_conv_kernel, grid=(N,),
        in_specs=[spec_img, spec_vec, spec_vec, spec_w],
        out_shape=(jax.ShapeDtypeStruct((N, H, W, Cp), compute_dtype),
                   jax.ShapeDtypeStruct((N, 2, Cp), jnp.float32)),
        out_specs=(spec_img, spec_st),
        scratch_shapes=[pltpu.VMEM((Hp, Wpp, Cp), compute_dtype)],
    )(h1, sc1, sh1, w2t)

    sc2, sh2 = _fold_bn(st2, g2, be2, npix, C, Cp)

    # ---- pass C: BN2 + residual add (fused lane-dense epilogue) --------------
    out_nhwc = _pcall(
        _bn_residual_kernel, grid=(N,),
        in_specs=[spec_img, spec_img, spec_vec, spec_vec],
        out_shape=jax.ShapeDtypeStruct((N, H, W, Cp), jnp.float32),
        out_specs=spec_img,
    )(h2, x_res, sc2, sh2)

    return jnp.transpose(out_nhwc[..., :C], (0, 3, 1, 2))  # back to NCHW


# ----------------------------------------------------------------------------
# Pure-JAX reference (matches PyTorch training-mode forward)
# ----------------------------------------------------------------------------
def residual_block_reference(x, params):
    w1, b1, g1, be1, w2, b2, g2, be2 = params
    dn = ("NCHW", "OIHW", "NCHW")

    def conv(x, w, b):
        y = jax.lax.conv_general_dilated(
            x, w, window_strides=(1, 1), padding=((1, 1), (1, 1)),
            dimension_numbers=dn, precision=jax.lax.Precision.HIGHEST)
        return y + b[None, :, None, None]

    def bn(y, g, be):
        mean = jnp.mean(y, axis=(0, 2, 3), keepdims=True)
        var = jnp.mean((y - mean) ** 2, axis=(0, 2, 3), keepdims=True)
        return (y - mean) / jnp.sqrt(var + EPS) * g[None, :, None, None] \
            + be[None, :, None, None]

    h = jnp.maximum(bn(conv(x, w1, b1), g1, be1), 0.0)
    z = bn(conv(h, w2, b2), g2, be2)
    return z + x


if __name__ == "__main__":
    N, C, H, W = 2, 4, 16, 16
    key = jax.random.PRNGKey(0)
    kx, kw1, kb1, kw2, kb2 = jax.random.split(key, 5)

    x = jax.random.normal(kx, (N, C, H, W), jnp.float32)
    w1 = jax.random.normal(kw1, (C, C, 3, 3), jnp.float32) * 0.1
    b1 = jax.random.normal(kb1, (C,), jnp.float32) * 0.1
    w2 = jax.random.normal(kw2, (C, C, 3, 3), jnp.float32) * 0.1
    b2 = jax.random.normal(kb2, (C,), jnp.float32) * 0.1
    g1 = jnp.ones((C,), jnp.float32)
    be1 = jnp.zeros((C,), jnp.float32)
    g2 = jnp.ones((C,), jnp.float32)
    be2 = jnp.zeros((C,), jnp.float32)
    params = (w1, b1, g1, be1, w2, b2, g2, be2)

    ref = jax.block_until_ready(residual_block_reference(x, params))

    # Structure / numerics check in f32 compute mode (tight tolerance).
    out_f32 = jax.block_until_ready(
        residual_block(x, params, compute_dtype=jnp.float32))
    assert out_f32.shape == (N, C, H, W)
    err_f32 = float(jnp.max(jnp.abs(out_f32 - ref)))
    assert err_f32 < 2e-3, f"f32 path max abs err {err_f32}"

    # Default (performance) path: bf16 MXU inputs, f32 accumulation / BN math.
    out_bf16 = jax.block_until_ready(residual_block(x, params))
    assert out_bf16.shape == (N, C, H, W)
    err_bf16 = float(jnp.max(jnp.abs(out_bf16 - ref)))
    assert err_bf16 < 2e-1, f"bf16 path max abs err {err_bf16}"

    print("KERNEL_OK")
</pallas_src>

<mosaic_0001>
module attributes {stable_mosaic.version = 11 : i64} {
  func.func @_conv_stats_kernel(%arg0: i32, %arg1: memref<1x19x24x128xf32, #tpu.memory_space<vmem>>, %arg2: memref<9x128x128xf32, #tpu.memory_space<vmem>>, %arg3: memref<1x16x16x128xf32, #tpu.memory_space<vmem>>, %arg4: memref<1x2x128xf32, #tpu.memory_space<vmem>>) attributes {dimension_semantics = [#tpu.dimension_semantics<parallel>], iteration_bounds = array<i64: 2>, scalar_prefetch = 0 : i64, scratch_operands = 0 : i64, tpu.core_type = #tpu.core_type<tc>, window_params = [{transform_indices = @transform_0, window_bounds = array<i64: 1, 19, 24, 128>}, {pipeline_mode = #tpu.pipeline_mode<synchronous>, transform_indices = @transform_1, window_bounds = array<i64: 9, 128, 128>}, {transform_indices = @transform_2, window_bounds = array<i64: 1, 16, 16, 128>}, {transform_indices = @transform_3, window_bounds = array<i64: 1, 2, 128>}]} {
    %c0 = arith.constant 0 : index
    %c0_0 = arith.constant 0 : index
    %c0_1 = arith.constant 0 : index
    %c0_2 = arith.constant 0 : index
    %0 = vector.load %arg1[%c0, %c0_0, %c0_1, %c0_2] : memref<1x19x24x128xf32, #tpu.memory_space<vmem>>, vector<1x19x24x128xf32>
    %1 = vector.shape_cast %0 : vector<1x19x24x128xf32> to vector<19x24x128xf32>
    %2 = vector.shape_cast %1 : vector<19x24x128xf32> to vector<456x128xf32>
    %cst = arith.constant 0.000000e+00 : f32
    %3 = vector.broadcast %cst : f32 to vector<384x128xf32>
    %4 = vector.extract_strided_slice %2 {offsets = [0, 0], sizes = [384, 128], strides = [1, 1]} : vector<456x128xf32> to vector<384x128xf32>
    %c0_3 = arith.constant 0 : index
    %c0_4 = arith.constant 0 : index
    %c0_5 = arith.constant 0 : index
    %5 = vector.load %arg2[%c0_3, %c0_4, %c0_5] : memref<9x128x128xf32, #tpu.memory_space<vmem>>, vector<1x128x128xf32>
    %6 = vector.shape_cast %5 : vector<1x128x128xf32> to vector<128x128xf32>
    %cst_6 = arith.constant dense<0.000000e+00> : vector<384x128xf32>
    %7 = tpu.matmul %4, %6, %cst_6 {dimension_numbers = #tpu.dot_dimension_numbers<[1], [0], [0], [1], [0, 0, 1, 1], [], []>} : vector<384x128xf32>, vector<128x128xf32>, vector<384x128xf32> -> vector<384x128xf32>
    %8 = arith.addf %3, %7 : vector<384x128xf32>
    %9 = vector.extract_strided_slice %2 {offsets = [1, 0], sizes = [384, 128], strides = [1, 1]} : vector<456x128xf32> to vector<384x128xf32>
    %c1 = arith.constant 1 : index
    %c0_7 = arith.constant 0 : index
    %c0_8 = arith.constant 0 : index
    %10 = vector.load %arg2[%c1, %c0_7, %c0_8] : memref<9x128x128xf32, #tpu.memory_space<vmem>>, vector<1x128x128xf32>
    %11 = vector.shape_cast %10 : vector<1x128x128xf32> to vector<128x128xf32>
    %cst_9 = arith.constant dense<0.000000e+00> : vector<384x128xf32>
    %12 = tpu.matmul %9, %11, %cst_9 {dimension_numbers = #tpu.dot_dimension_numbers<[1], [0], [0], [1], [0, 0, 1, 1], [], []>} : vector<384x128xf32>, vector<128x128xf32>, vector<384x128xf32> -> vector<384x128xf32>
    %13 = arith.addf %8, %12 : vector<384x128xf32>
    %14 = vector.extract_strided_slice %2 {offsets = [2, 0], sizes = [384, 128], strides = [1, 1]} : vector<456x128xf32> to vector<384x128xf32>
    %c2 = arith.constant 2 : index
    %c0_10 = arith.constant 0 : index
    %c0_11 = arith.constant 0 : index
    %15 = vector.load %arg2[%c2, %c0_10, %c0_11] : memref<9x128x128xf32, #tpu.memory_space<vmem>>, vector<1x128x128xf32>
    %16 = vector.shape_cast %15 : vector<1x128x128xf32> to vector<128x128xf32>
    %cst_12 = arith.constant dense<0.000000e+00> : vector<384x128xf32>
    %17 = tpu.matmul %14, %16, %cst_12 {dimension_numbers = #tpu.dot_dimension_numbers<[1], [0], [0], [1], [0, 0, 1, 1], [], []>} : vector<384x128xf32>, vector<128x128xf32>, vector<384x128xf32> -> vector<384x128xf32>
    %18 = arith.addf %13, %17 : vector<384x128xf32>
    %19 = vector.extract_strided_slice %2 {offsets = [24, 0], sizes = [384, 128], strides = [1, 1]} : vector<456x128xf32> to vector<384x128xf32>
    %c3 = arith.constant 3 : index
    %c0_13 = arith.constant 0 : index
    %c0_14 = arith.constant 0 : index
    %20 = vector.load %arg2[%c3, %c0_13, %c0_14] : memref<9x128x128xf32, #tpu.memory_space<vmem>>, vector<1x128x128xf32>
    %21 = vector.shape_cast %20 : vector<1x128x128xf32> to vector<128x128xf32>
    %cst_15 = arith.constant dense<0.000000e+00> : vector<384x128xf32>
    %22 = tpu.matmul %19, %21, %cst_15 {dimension_numbers = #tpu.dot_dimension_numbers<[1], [0], [0], [1], [0, 0, 1, 1], [], []>} : vector<384x128xf32>, vector<128x128xf32>, vector<384x128xf32> -> vector<384x128xf32>
    %23 = arith.addf %18, %22 : vector<384x128xf32>
    %24 = vector.extract_strided_slice %2 {offsets = [25, 0], sizes = [384, 128], strides = [1, 1]} : vector<456x128xf32> to vector<384x128xf32>
    %c4 = arith.constant 4 : index
    %c0_16 = arith.constant 0 : index
    %c0_17 = arith.constant 0 : index
    %25 = vector.load %arg2[%c4, %c0_16, %c0_17] : memref<9x128x128xf32, #tpu.memory_space<vmem>>, vector<1x128x128xf32>
    %26 = vector.shape_cast %25 : vector<1x128x128xf32> to vector<128x128xf32>
    %cst_18 = arith.constant dense<0.000000e+00> : vector<384x128xf32>
    %27 = tpu.matmul %24, %26, %cst_18 {dimension_numbers = #tpu.dot_dimension_numbers<[1], [0], [0], [1], [0, 0, 1, 1], [], []>} : vector<384x128xf32>, vector<128x128xf32>, vector<384x128xf32> -> vector<384x128xf32>
    %28 = arith.addf %23, %27 : vector<384x128xf32>
    %29 = vector.extract_strided_slice %2 {offsets = [26, 0], sizes = [384, 128], strides = [1, 1]} : vector<456x128xf32> to vector<384x128xf32>
    %c5 = arith.constant 5 : index
    %c0_19 = arith.constant 0 : index
    %c0_20 = arith.constant 0 : index
    %30 = vector.load %arg2[%c5, %c0_19, %c0_20] : memref<9x128x128xf32, #tpu.memory_space<vmem>>, vector<1x128x128xf32>
    %31 = vector.shape_cast %30 : vector<1x128x128xf32> to vector<128x128xf32>
    %cst_21 = arith.constant dense<0.000000e+00> : vector<384x128xf32>
    %32 = tpu.matmul %29, %31, %cst_21 {dimension_numbers = #tpu.dot_dimension_numbers<[1], [0], [0], [1], [0, 0, 1, 1], [], []>} : vector<384x128xf32>, vector<128x128xf32>, vector<384x128xf32> -> vector<384x128xf32>
    %33 = arith.addf %28, %32 : vector<384x128xf32>
    %34 = vector.extract_strided_slice %2 {offsets = [48, 0], sizes = [384, 128], strides = [1, 1]} : vector<456x128xf32> to vector<384x128xf32>
    %c6 = arith.constant 6 : index
    %c0_22 = arith.constant 0 : index
    %c0_23 = arith.constant 0 : index
    %35 = vector.load %arg2[%c6, %c0_22, %c0_23] : memref<9x128x128xf32, #tpu.memory_space<vmem>>, vector<1x128x128xf32>
    %36 = vector.shape_cast %35 : vector<1x128x128xf32> to vector<128x128xf32>
    %cst_24 = arith.constant dense<0.000000e+00> : vector<384x128xf32>
    %37 = tpu.matmul %34, %36, %cst_24 {dimension_numbers = #tpu.dot_dimension_numbers<[1], [0], [0], [1], [0, 0, 1, 1], [], []>} : vector<384x128xf32>, vector<128x128xf32>, vector<384x128xf32> -> vector<384x128xf32>
    %38 = arith.addf %33, %37 : vector<384x128xf32>
    %39 = vector.extract_strided_slice %2 {offsets = [49, 0], sizes = [384, 128], strides = [1, 1]} : vector<456x128xf32> to vector<384x128xf32>
    %c7 = arith.constant 7 : index
    %c0_25 = arith.constant 0 : index
    %c0_26 = arith.constant 0 : index
    %40 = vector.load %arg2[%c7, %c0_25, %c0_26] : memref<9x128x128xf32, #tpu.memory_space<vmem>>, vector<1x128x128xf32>
    %41 = vector.shape_cast %40 : vector<1x128x128xf32> to vector<128x128xf32>
    %cst_27 = arith.constant dense<0.000000e+00> : vector<384x128xf32>
    %42 = tpu.matmul %39, %41, %cst_27 {dimension_numbers = #tpu.dot_dimension_numbers<[1], [0], [0], [1], [0, 0, 1, 1], [], []>} : vector<384x128xf32>, vector<128x128xf32>, vector<384x128xf32> -> vector<384x128xf32>
    %43 = arith.addf %38, %42 : vector<384x128xf32>
    %44 = vector.extract_strided_slice %2 {offsets = [50, 0], sizes = [384, 128], strides = [1, 1]} : vector<456x128xf32> to vector<384x128xf32>
    %c8 = arith.constant 8 : index
    %c0_28 = arith.constant 0 : index
    %c0_29 = arith.constant 0 : index
    %45 = vector.load %arg2[%c8, %c0_28, %c0_29] : memref<9x128x128xf32, #tpu.memory_space<vmem>>, vector<1x128x128xf32>
    %46 = vector.shape_cast %45 : vector<1x128x128xf32> to vector<128x128xf32>
    %cst_30 = arith.constant dense<0.000000e+00> : vector<384x128xf32>
    %47 = tpu.matmul %44, %46, %cst_30 {dimension_numbers = #tpu.dot_dimension_numbers<[1], [0], [0], [1], [0, 0, 1, 1], [], []>} : vector<384x128xf32>, vector<128x128xf32>, vector<384x128xf32> -> vector<384x128xf32>
    %48 = arith.addf %43, %47 : vector<384x128xf32>
    %49 = vector.shape_cast %48 : vector<384x128xf32> to vector<16x24x128xf32>
    %50 = vector.extract_strided_slice %49 {offsets = [0, 0, 0], sizes = [16, 16, 128], strides = [1, 1, 1]} : vector<16x24x128xf32> to vector<16x16x128xf32>
    %c0_31 = arith.constant 0 : index
    %c0_32 = arith.constant 0 : index
    %c0_33 = arith.constant 0 : index
    %c0_34 = arith.constant 0 : index
    %51 = vector.load %arg3[%c0_31, %c0_32, %c0_33, %c0_34] : memref<1x16x16x128xf32, #tpu.memory_space<vmem>>, vector<1x16x16x128xf32>
    %52 = vector.shape_cast %51 : vector<1x16x16x128xf32> to vector<16x16x128xf32>
    %53 = vector.shape_cast %50 : vector<16x16x128xf32> to vector<1x16x16x128xf32>
    tpu.vector_store %arg3[%c0_31, %c0_32, %c0_33, %c0_34], %53 {strides = array<i32>} : memref<1x16x16x128xf32, #tpu.memory_space<vmem>>, vector<1x16x16x128xf32>,
    %54 = vector.shape_cast %50 : vector<16x16x128xf32> to vector<256x128xf32>
    %cst_35 = arith.constant dense<0.000000e+00> : vector<128xf32>
    %55 = vector.multi_reduction <add>, %54, %cst_35 [0] : vector<256x128xf32> to vector<128xf32>
    %56 = vector.shape_cast %55 : vector<128xf32> to vector<1x128xf32>
    %57 = arith.mulf %54, %54 : vector<256x128xf32>
    %cst_36 = arith.constant dense<0.000000e+00> : vector<128xf32>
    %58 = vector.multi_reduction <add>, %57, %cst_36 [0] : vector<256x128xf32> to vector<128xf32>
    %59 = vector.shape_cast %58 : vector<128xf32> to vector<1x128xf32>
    %60 = tpu.concatenate %56, %59 in 0 : vector<1x128xf32>, vector<1x128xf32> -> vector<2x128xf32>
    %c0_37 = arith.constant 0 : index
    %c0_38 = arith.constant 0 : index
    %c0_39 = arith.constant 0 : index
    %61 = vector.load %arg4[%c0_37, %c0_38, %c0_39] : memref<1x2x128xf32, #tpu.memory_space<vmem>>, vector<1x2x128xf32>
    %62 = vector.shape_cast %61 : vector<1x2x128xf32> to vector<2x128xf32>
    %63 = vector.shape_cast %60 : vector<2x128xf32> to vector<1x2x128xf32>
    tpu.vector_store %arg4[%c0_37, %c0_38, %c0_39], %63 {strides = array<i32>} : memref<1x2x128xf32, #tpu.memory_space<vmem>>, vector<1x2x128xf32>,
    return
  }
  func.func @transform_0(%arg0: i32) -> (i32, i32, i32, i32) {
    %c0_i32 = arith.constant 0 : i32
    %c0_i32_0 = arith.constant 0 : i32
    %c0_i32_1 = arith.constant 0 : i32
    %c0_i32_2 = arith.constant 0 : i32
    return %arg0, %c0_i32, %c0_i32_0, %c0_i32_1 : i32, i32, i32, i32
  }
  func.func @transform_1(%arg0: i32) -> (i32, i32, i32) {
    %c0_i32 = arith.constant 0 : i32
    %c0_i32_0 = arith.constant 0 : i32
    %c0_i32_1 = arith.constant 0 : i32
    %c0_i32_2 = arith.constant 0 : i32
    return %c0_i32, %c0_i32_0, %c0_i32_1 : i32, i32, i32
  }
  func.func @transform_2(%arg0: i32) -> (i32, i32, i32, i32) {
    %c0_i32 = arith.constant 0 : i32
    %c0_i32_0 = arith.constant 0 : i32
    %c0_i32_1 = arith.constant 0 : i32
    %c0_i32_2 = arith.constant 0 : i32
    return %arg0, %c0_i32, %c0_i32_0, %c0_i32_1 : i32, i32, i32, i32
  }
  func.func @transform_3(%arg0: i32) -> (i32, i32, i32) {
    %c0_i32 = arith.constant 0 : i32
    %c0_i32_0 = arith.constant 0 : i32
    %c0_i32_1 = arith.constant 0 : i32
    return %arg0, %c0_i32, %c0_i32_0 : i32, i32, i32
  }
}

</mosaic_0001>

<bundles_post_ra>
// kernel: tpu_custom_call.1
= control target key start
LH: loop header
LB: loop body
LE: loop exit
PB: predicated region body
PF: predicated region fallthrough
CT: control target
= control target key end

     0   :  { %9 = vsyncpa [#allocation3], 0  ;;  %s7833_s0 = inlined_call_operand.hbm [shape: f32[2,19,24,128], index: 0, kind: input, shape index: {}]   ;;  %s7834_s1 = inlined_call_operand.hbm [shape: f32[9,128,128], index: 1, kind: input, shape index: {}]   ;;  %s7835_s2 = inlined_call_operand.hbm [shape: f32[2,16,16,128], index: 2, kind: output, shape index: {0}]   ;;  %s7836_s3 = inlined_call_operand.hbm [shape: f32[2,2,128], index: 3, kind: output, shape index: {1}]  }
   0x1   :  { %11 = vsyncpa [#allocation3 + $0x1], 0 }
   0x2   :  { %12 = vsyncpa [#allocation6], 0 }
   0x3   :  { %13 = vsyncpa [#allocation4], 0 }
   0x4   :  { %15 = vsyncpa [#allocation4 + $0x1], 0 }
   0x5   :  { %16 = vsyncpa [#allocation9], 0 }
   0x6   :  { %18 = vsyncpa [#allocation9 + $0x1], 0  ;;  %s6427_s12 = smov 0   ;;  %s6429_s13 = smov 0  }
   0x7   :  { %s6431_s14 = smov 0   ;;  %s6433_s15 = smov 0  }
   0x8 LB: > { %s6448_s16 = sadd.s32 4294967295, %s6397_s15   ;;  %s3918_s17 = sadd.s32 4294967294, %s6397_s15   ;;  %s6397_s15 = sphi %s6433_s15, %s8225_s15   ;;  %s6393_s14 = sphi %s6431_s14, %s8224_s14   ;;  %s6389_s13 = sphi %s6429_s13, %s8223_s13   ;;  %s6385_s12 = sphi %s6427_s12, %s8222_s12  }
   0x9   : > { %p44_p0 = scmp.ne.s32.totalorder %s6389_s13, %s6385_s12  ;;  %p7837_p1 = scmp.eq.s32.totalorder %s6448_s16, 0 }
   0xa   : > { %p95_p3 = scmp.eq.s32.totalorder %s3918_s17, 1  ;;  %p3919_p5 = scmp.ge.s32.totalorder %s6397_s15, 1 }
   0xb   : > { %p6457_p4 = por %p7837_p1, %p44_p0  ;;  %p128_p7 = scmp.lt.s32.totalorder %s6397_s15, 3 }
   0xc   : > { %p6462_p6 = por %p95_p3, %p44_p0  ;;  %s6399_s21 = smov [#allocation5]  }
   0xd   : > { %s7997_s18 = scalar_select %p6457_p4, 1, 0 }
   0xe   : > { %s7998_s19 = scalar_select %p6462_p6, 1, 0 }
   0xf   : > { %p6467_p8 = pnand %p3919_p5, %p128_p7  ;;  %s140_s22 = sshll.u32 %s6399_s21, 4  ;;  %s6471_s22 = int_to_ptr.vmem [resolvable:$true] %s140_s22 }
  0x10   : > { %s6483_s24 = sadd.s32 1, %s6397_s15   ;;  %s31_s25 = sadd.s32 1, %s6393_s14 }
  0x11   : > { %s7999_s20 = scalar_select %p6467_p8, 1, 0 }
  0x12   : > { %p6132_p9 = pneg %p6467_p8  ;;  %s28_s26 = ssub.s32 %s6397_s15, %s6483_s24 }
  0x13   : > { %s6237_s29 = scalar_lea.hbm %s7834_s1, 18432 }
  0x14   : > { %p6478_p11 = pnand %p6132_p9, %p7837_p1  ;;  %p6238_p12 = scmp.ne.s32.totalorder %s7834_s1, %s6237_s29 }
  0x15   : > { %p6244_p5 = scmp.lt.u32.totalorder %s6237_s29, %s7834_s1 }
  0x16   : > { %p6239_p13 = pneg %p6478_p11 }
  0x18   : > { %p6240_p0 = pnand %p6239_p13, %p6238_p12 }
  0x1a   : > { %p6241_p3 = pneg %p6240_p0 }
  0x1c   : > { %p6246_p7 = pnand %p6244_p5, %p6241_p3 }
  0x1e   : > { %6249 = shalt.err (!%p6246_p7)
}
  0x1f   : > { %s6250_s7 = scalar_lea.vmem %s6471_s22, 18432  ;;  %p6258_p2 = scmp.lt.s32.totalorder %s6471_s22, %s6471_s22 }
  0x20   : > { %p6251_p9 = scmp.ne.s32.totalorder %s6471_s22, %s6250_s7  ;;  %p6259_p6 = scmp.lt.s32.totalorder %s6250_s7, %s6250_s7 }
  0x22   : > { %p6253_p10 = pnand %p6251_p9, %p6239_p13  ;;  %p6260_p4 = por %p6259_p6, %p6258_p2 }
  0x24   : > { %p6254_p1 = pneg %p6253_p10 }
  0x26   : > { %p6261_p8 = pnand %p6260_p4, %p6254_p1 }
  0x28   : > { %6264 = shalt.err (!%p6261_p8)
}
  0x29   : > { %s6400_s8 = smov 128   ;;  %s6401_s9 = smov 8  }
  0x2a   : > { %6135 = dma.hbm_to_vmem [thread:$0]  (!%p6478_p11), %s7834_s1, 18432, %s6471_s22, [#allocation6], %s6400_s8, %s6400_s8, %s6401_s9  }
  0x2b   : > { %p29_p1 = scmp.eq.s32.totalorder %s28_s26, 0  ;;  %p38_p2 = scmp.ne.s32.totalorder %s6393_s14, %s6389_s13 }
  0x2c   : > { %p39_p4 = scmp.eq.s32.totalorder %s6397_s15, 0  ;;  %p6148_p6 = scmp.lt.s32.totalorder %s6397_s15, 2 }
  0x2d   : > { %s6517_s17 = scalar_select %p29_p1, %s6393_s14, %s31_s25  }
  0x2e   : > { %p40_p8 = por %p39_p4, %p38_p2  ;;  %p8001_p10 = scmp.eq.s32.totalorder %s6448_s16, 1 }
  0x2f   : > { %s154_s23 = sand.u32 1, %s6393_s14   ;;  %s6120_s27 = smul.u32 7296, %s6397_s15 }
  0x30   : > { %p6521_p12 = por %p8001_p10, %p38_p2  ;;  %s6119_s28 = smul.u32 456, %s154_s23 }
  0x31   : > { %p6527_p13 = pnand %p6148_p6, %p40_p8  ;;  %s6534_s25 = scalar_lea.hbm %s7833_s0, %s6120_s27 }
  0x32   : > { %s158_s30 = scalar_lea.vmem [#allocation2], %s6119_s28  ;;  %s6538_s5 = scalar_lea.sflag [#allocation3], %s154_s23 }
  0x33   : > { %s165_s4 = sshll.u32 %s158_s30, 4  ;;  %s6265_s6 = scalar_lea.hbm %s6534_s25, 7296  ;;  %s6536_s4 = int_to_ptr.vmem [resolvable:$true] %s165_s4 }
  0x34   : > { %p6266_p11 = scmp.ne.s32.totalorder %s6534_s25, %s6265_s6  ;;  %p6267_p0 = pneg %p6527_p13 }
  0x35   : > { %s6270_s11 = scalar_lea.hbm %s7833_s0, 14592  ;;  %p6271_p7 = scmp.lt.u32.totalorder %s6534_s25, %s7833_s0 }
  0x36   : > { %p6268_p3 = pnand %p6267_p0, %p6266_p11  ;;  %p6272_p9 = scmp.lt.u32.totalorder %s6270_s11, %s6265_s6 }
  0x37   : > { %p6274_p2 = scmp.lt.u32.totalorder %s6265_s6, %s6534_s25 }
  0x38   : > { %p6269_p5 = pneg %p6268_p3  ;;  %p6273_p1 = por %p6272_p9, %p6271_p7 }
  0x3a   : > { %p6275_p4 = por %p6274_p2, %p6273_p1 }
  0x3c   : > { %p6276_p6 = pnand %p6275_p4, %p6269_p5 }
  0x3e   : > { %6279 = shalt.err (!%p6276_p6)
}
  0x3f   : > { %s6280_s23 = scalar_lea.vmem %s6536_s4, 7296  ;;  %s6402_s28 = smov [#allocation2]  }
  0x40   : > { %p6281_p8 = scmp.ne.s32.totalorder %s6536_s4, %s6280_s23  ;;  %s6285_s26 = sshll.u32 %s6402_s28, 4  ;;  %s6286_s26 = int_to_ptr.vmem [resolvable:$false] %s6285_s26 }
  0x41   : > { %s6287_s30 = scalar_lea.vmem %s6286_s26, 14592  ;;  %p6288_p3 = scmp.lt.s32.totalorder %s6536_s4, %s6286_s26 }
  0x42   : > { %p6283_p10 = pnand %p6281_p8, %p6267_p0  ;;  %p6289_p7 = scmp.lt.s32.totalorder %s6287_s30, %s6280_s23 }
  0x44   : > { %p6284_p11 = pneg %p6283_p10  ;;  %p6290_p9 = por %p6289_p7, %p6288_p3 }
  0x46   : > { %p6291_p1 = pnand %p6290_p9, %p6284_p11 }
  0x48   : > { %6294 = shalt.err (!%p6291_p1)
}
  0x49   : > { %6139 = dma.hbm_to_vmem [thread:$0]  (!%p6527_p13), %s6534_s25, 7296, %s6536_s4, %s6538_s5, %s6400_s8, %s6400_s8, %s6401_s9  }
  0x4a   : > { %p8004_p0 = scmp.ne.s32.totalorder %s7999_s20, 0 }
  0x4c   : > { %177 = sbr.rel (%p8004_p0) target bundleno = 812 (0x32c), region = 28 }
  0x53   : > { %s6572_s6 = sand.u32 1, %s6389_s13   ;;  %p8005_p5 = scmp.ne.s32.totalorder %s7997_s18, 0 }
  0x54   : > { %s6121_s7 = smul.u32 456, %s6572_s6  ;;  %s180_s10 = scalar_lea.sflag [#allocation3], %s6572_s6 }
  0x56   : > { %s6576_s11 = scalar_lea.vmem [#allocation2], %s6121_s7 }
  0x57   : > { %6368 = dma.done.wait (%p8005_p5), %s180_s10, 7296  }
  0x58   : > { %6370 = vsyncadd (%p8005_p5), %s180_s10, 4294960000  ;;  %p8006_p13 = scmp.eq.s32.totalorder %s6448_s16, 0 }
  0x5a   : > { %6372 = dma.done.wait (%p8006_p13), [#allocation6], 18432   ;;  %p8007_p2 = pmov %p8006_p13 }
  0x5b   : > { %v287_v0 = vld [vmem:[#allocation5 + $0x80] sm:$0xff]  ;;  %v288_v1 = vld [vmem:[#allocation5 + $0x88] sm:$0xff]  ;;  %v289_v5 = vld [vmem:[#allocation5 + $0x90] sm:$0xff]  ;;  %vm352_vm0 = vcmask 1046528   ;;  %vm1093_vm1 = vcmask 1045504   ;;  %s3925_s18 = sshll.u32 %s6572_s6, 8 }
  0x5c   : > { %6374 = vsyncadd (%p8007_p2), [#allocation6], 4294948864  ;;  %v1899_v2 = vld [vmem:[#allocation5 + $0x200] sm:$0xff]  ;;  %v5447_v3 = vpack.c.bf16 %v288_v1, %v287_v0  ;;  %v1900_v4 = vld [vmem:[#allocation5 + $0x208] sm:$0xff]  ;;  %s7709_s20 = scalar_lea.vmem [#allocation7], %s3925_s18  ;;  %s3934_s8 = sshll.u32 %s6448_s16, 12 }
  0x5d   : > { %v290_v6 = vld [vmem:[#allocation5 + $0x98] sm:$0xff]  ;;  %v6586_v7 = vpack.c.bf16 %v1900_v4, %v1899_v2  ;;  %v1901_v9 = vld [vmem:[#allocation5 + $0x210] sm:$0xff]  ;;  %v291_v11 = vld [vmem:[#allocation5 + $0xa0] sm:$0xff]  ;;  %s3790_s9 = sshll.u32 %s7709_s20, 4  ;;  %s7755_s4 = scalar_lea.hbm %s7835_s2, %s3934_s8  ;;  %s7757_s9 = int_to_ptr.vmem [resolvable:$true] %s3790_s9 }
  0x5e   : > { %v5451_v8 = vpack.c.bf16 %v290_v6, %v289_v5  ;;  %v1902_v10 = vld [vmem:[#allocation5 + $0x218] sm:$0xff]  ;;  %5448 = vmatprep.subr.bf16.mxu1 %v5447_v3  ;;  %v292_v13 = vld [vmem:[#allocation5 + $0xa8] sm:$0xff]  ;;  %v1903_v14 = vld [vmem:[#allocation5 + $0x220] sm:$0xff]  ;;  %s3772_s5 = scalar_lea.sflag [#allocation4], %s6572_s6  ;;  %s6295_s27 = scalar_lea.vmem %s7757_s9, 4096 }
  0x5f   : > { %8008 = vst [vmem:[#allocation14_spill] sm:$0xff] %v6586_v7  ;;  %v6588_v12 = vpack.c.bf16 %v1902_v10, %v1901_v9  ;;  %v1904_v15 = vld [vmem:[#allocation5 + $0x228] sm:$0xff]  ;;  %5576 = vmatprep.subr.bf16.mxu0 %v6586_v7  ;;  %5450 = vmatpush3.bf16.msra.mxu1 %v5447_v3  ;;  %v5455_v16 = vpack.c.bf16 %v292_v13, %v291_v11  ;;  %v293_v18 = vld [vmem:[#allocation5 + $0xb0] sm:$0xff]  ;;  %v294_v19 = vld [vmem:[#allocation5 + $0xb8] sm:$0xff]  ;;  %p6296_p4 = scmp.ne.s32.totalorder %s7757_s9, %s6295_s27  ;;  %s6403_s22 = smov [#allocation7]  }
  0x60   : > { %5578 = vmatpush3.bf16.msra.mxu0 %v6586_v7  ;;  %5452 = vmatprep.subr.bf16.mxu1 %v5451_v8  ;;  %v6593_v17 = vpack.c.bf16 %v1904_v15, %v1903_v14  ;;  %v1905_v20 = vld [vmem:[#allocation5 + $0x230] sm:$0xff]  ;;  %v1906_v21 = vld [vmem:[#allocation5 + $0x238] sm:$0xff]  ;;  %v5459_v22 = vpack.c.bf16 %v294_v19, %v293_v18  ;;  %v295_v23 = vld [vmem:[#allocation5 + $0xc0] sm:$0xff]  ;;  %s6299_s23 = sshll.u32 %s6403_s22, 4  ;;  %s6300_s23 = int_to_ptr.vmem [resolvable:$false] %s6299_s23 }
  0x61   : > { %8009 = vst [vmem:[#allocation15_spill] sm:$0xff] %v6588_v12  ;;  %5580 = vmatprep.subr.bf16.mxu0 %v6588_v12  ;;  %v296_v24 = vld [vmem:[#allocation5 + $0xc8] sm:$0xff]  ;;  %v6597_v25 = vpack.c.bf16 %v1906_v21, %v1905_v20  ;;  %v1907_v26 = vld [vmem:[#allocation5 + $0x240] sm:$0xff]  ;;  %v6600_v28 = vld [vmem:[%s6576_s11] sm:$0xff]  ;;  %p6297_p6 = pnand %p6296_p4, %p6521_p12  ;;  %s6301_s28 = scalar_lea.vmem %s6300_s23, 8192 }
  0x62   : > { %8010 = vst [vmem:[#allocation16_spill] sm:$0xff] %v6593_v17  ;;  %v1908_v27 = vld [vmem:[#allocation5 + $0x248] sm:$0xff]  ;;  %v6603_v29 = vld [vmem:[%s6576_s11 + $0x8] sm:$0xff]  ;;  %v353_v30 = vrot.slane %v6600_v28, 1  ;;  %v6610_v32 = vld [vmem:[%s6576_s11 + $0x20] sm:$0xff]  ;;  %v5463_v36 = vpack.c.bf16 %v296_v24, %v295_v23  ;;  %p6302_p10 = scmp.lt.s32.totalorder %s7757_s9, %s6300_s23  ;;  %p6303_p11 = scmp.lt.s32.totalorder %s6301_s28, %s6295_s27 }
  0x63   : > { %5454 = vmatpush3.bf16.msra.mxu1 %v5451_v8  ;;  %8011 = vst [vmem:[#allocation17_spill] sm:$0xff] %v6597_v25  ;;  %v6607_v31 = vld [vmem:[%s6576_s11 + $0x18] sm:$0xff]  ;;  %v354_v33 = vrot.slane %v6603_v29, 1  ;;  %v360_v35 = vrot.slane %v6610_v32, 1  ;;  %v6617_v37 = vpack.c.bf16 %v1908_v27, %v1907_v26  ;;  %v298_v39 = vld [vmem:[#allocation5 + $0xd8] sm:$0xff]  ;;  %v299_v46 = vld [vmem:[#allocation5 + $0xe0] sm:$0xff]  ;;  %p6298_p8 = pneg %p6297_p6 }
  0x64   : > { %5582 = vmatpush3.bf16.msra.mxu0 %v6588_v12  ;;  %5456 = vmatprep.subr.bf16.mxu1 %v5455_v16  ;;  %v358_v34 = vrot.slane %v6607_v31, 1  ;;  %v297_v38 = vld [vmem:[#allocation5 + $0xd0] sm:$0xff]  ;;  %v1910_v43 = vld [vmem:[#allocation5 + $0x258] sm:$0xff]  ;;  %v300_v47 = vld [vmem:[#allocation5 + $0xe8] sm:$0xff]  ;;  %p6304_p3 = por %p6303_p11, %p6302_p10 }
  0x65   : > { %5584 = vmatprep.subr.bf16.mxu0 %v6593_v17  ;;  %8012 = vst [vmem:[#allocation18_spill] sm:$0xff] %v6617_v37  ;;  %v355_v40 = vsel %vm352_vm0, %v353_v30, %v354_v33  ;;  %v1909_v42 = vld [vmem:[#allocation5 + $0x250] sm:$0xff]  ;;  %v5467_v44 = vpack.c.bf16 %v298_v39, %v297_v38  ;;  %v1911_v48 = vld [vmem:[#allocation5 + $0x260] sm:$0xff]  ;;  %v1912_v49 = vld [vmem:[#allocation5 + $0x268] sm:$0xff]  ;;  %v5471_v50 = vpack.c.bf16 %v300_v47, %v299_v46 }
  0x66   : > { %v6627_v41 = vsel %vm352_vm0, %v358_v34, %v360_v35  ;;  %4543 = vmatprep.mubr.f32.mxu1 %v355_v40  ;;  %v6632_v45 = vpack.c.bf16 %v1910_v43, %v1909_v42  ;;  %v6636_v51 = vpack.c.bf16 %v1912_v49, %v1911_v48  ;;  %v301_v52 = vld [vmem:[#allocation5 + $0xf0] sm:$0xff]  ;;  %v302_v53 = vld [vmem:[#allocation5 + $0xf8] sm:$0xff]  ;;  %v6640_v57 = vld [vmem:[%s6576_s11 + $0x10] sm:$0xff]  ;;  %p6305_p7 = pnand %p6304_p3, %p6298_p8 }
  0x67   : > { %5458 = vmatpush3.bf16.msra.mxu1 %v5455_v16  ;;  %4959 = vmatprep.mubr.f32.mxu0 %v6627_v41  ;;  %v1913_v54 = vld [vmem:[#allocation5 + $0x270] sm:$0xff]  ;;  %v1914_v55 = vld [vmem:[#allocation5 + $0x278] sm:$0xff]  ;;  %v5475_v56 = vpack.c.bf16 %v302_v53, %v301_v52  ;;  %v270_v59 = vld [vmem:[#allocation5] sm:$0xff]  ;;  %v356_v0 = vrot.slane %v6640_v57, 1 }
  0x68   : > { %5586 = vmatpush3.bf16.msra.mxu0 %v6593_v17  ;;  %5460 = vmatprep.subr.bf16.mxu1 %v5459_v22  ;;  %8013 = vst [vmem:[#allocation19_spill] sm:$0xff] %v6632_v45  ;;  %8014 = vst [vmem:[#allocation20_spill] sm:$0xff] %v6636_v51  ;;  %v6643_v58 = vpack.c.bf16 %v1914_v55, %v1913_v54  ;;  %v271_v60 = vld [vmem:[#allocation5 + $0x8] sm:$0xff]  ;;  %v6646_v61 = vld [vmem:[%s6576_s11 + $0x28] sm:$0xff] }
  0x69   : > { %5588 = vmatprep.subr.bf16.mxu0 %v6597_v25  ;;  %v2249_v62 = vld [vmem:[#allocation5 + $0x280] sm:$0xff]  ;;  %v2250_v63 = vld [vmem:[#allocation5 + $0x288] sm:$0xff]  ;;  %v5479_v2 = vpack.c.bf16 %v271_v60, %v270_v59  ;;  %v362_v3 = vrot.slane %v6646_v61, 1  ;;  %v2251_v8 = vld [vmem:[#allocation5 + $0x290] sm:$0xff]  ;;  %v357_v11 = vsel %vm352_vm0, %v354_v33, %v356_v0  ;;  %v359_v18 = vsel %vm352_vm0, %v356_v0, %v358_v34 }
  0x6a   : > { %8015 = vst [vmem:[#allocation21_spill] sm:$0xff] %v6643_v58  ;;  %v6650_v1 = vld [vmem:[%s6576_s11 + $0x30] sm:$0xff]  ;;  %v5607_v4 = vpack.c.bf16 %v2250_v63, %v2249_v62  ;;  %v6656_v5 = vld [vmem:[%s6576_s11 + $0x38] sm:$0xff]  ;;  %v2252_v9 = vld [vmem:[#allocation5 + $0x298] sm:$0xff] }
  0x6b   : > { %5462 = vmatpush3.bf16.msra.mxu1 %v5459_v22  ;;  %v364_v6 = vrot.slane %v6650_v1, 1  ;;  %v6660_v10 = vld [vmem:[%s6576_s11 + $0x40] sm:$0xff]  ;;  %v363_v15 = vsel %vm352_vm0, %v360_v35, %v362_v3  ;;  %v366_v16 = vrot.slane %v6656_v5, 1  ;;  %v5611_v19 = vpack.c.bf16 %v2252_v9, %v2251_v8  ;;  %v6675_v21 = vld [vmem:[%s6576_s11 + $0x48] sm:$0xff]  ;;  %v6679_v23 = vld [vmem:[%s6576_s11 + $0x50] sm:$0xff] }
  0x6c   : > { %5590 = vmatpush3.bf16.msra.mxu0 %v6597_v25  ;;  %5464 = vmatprep.subr.bf16.mxu1 %v5463_v36  ;;  %v272_v13 = vld [vmem:[#allocation5 + $0x10] sm:$0xff]  ;;  %v273_v14 = vld [vmem:[#allocation5 + $0x18] sm:$0xff]  ;;  %v368_v20 = vrot.slane %v6660_v10, 1  ;;  %v2253_v26 = vld [vmem:[#allocation5 + $0x2a0] sm:$0xff]  ;;  %v370_v35 = vrot.slane %v6675_v21, 1  ;;  %v372_v38 = vrot.slane %v6679_v23, 1 }
  0x6d   : > { %5592 = vmatprep.subr.bf16.mxu0 %v6617_v37  ;;  %v365_v22 = vsel %vm352_vm0, %v362_v3, %v364_v6  ;;  %v5483_v24 = vpack.c.bf16 %v273_v14, %v272_v13  ;;  %v2254_v27 = vld [vmem:[#allocation5 + $0x2a8] sm:$0xff]  ;;  %v274_v30 = vld [vmem:[#allocation5 + $0x20] sm:$0xff]  ;;  %v6682_v34 = vsel %vm352_vm0, %v364_v6, %v366_v16  ;;  %v6694_v42 = vld [vmem:[%s6576_s11 + $0x60] sm:$0xff]  ;;  %v1107_v12 = vrot.slane %v6656_v5, 2 }
  0x6e   : > { %v275_v33 = vld [vmem:[#allocation5 + $0x28] sm:$0xff]  ;;  %8016 = vst [vmem:[#allocation22_spill] sm:$0xff] %v6682_v34  ;;  %v5615_v40 = vpack.c.bf16 %v2254_v27, %v2253_v26  ;;  %v2255_v43 = vld [vmem:[#allocation5 + $0x2b0] sm:$0xff]  ;;  %v277_v48 = vld [vmem:[#allocation5 + $0x38] sm:$0xff]  ;;  %v6699_v49 = vsel %vm352_vm0, %v368_v20, %v370_v35  ;;  %v376_v52 = vrot.slane %v6694_v42, 1 }
  0x6f   : > { %5466 = vmatpush3.bf16.msra.mxu1 %v5463_v36  ;;  %v6686_v36 = vsel %vm352_vm0, %v366_v16, %v368_v20  ;;  %v6690_v39 = vld [vmem:[%s6576_s11 + $0x58] sm:$0xff]  ;;  %v5487_v46 = vpack.c.bf16 %v275_v33, %v274_v30  ;;  %8018 = vst [vmem:[#allocation24_spill] sm:$0xff] %v6699_v49  ;;  %v6707_v53 = vld [vmem:[%s6576_s11 + $0x68] sm:$0xff]  ;;  %v6710_v55 = vld [vmem:[%s6576_s11 + $0x70] sm:$0xff] }
  0x70   : > { %5594 = vmatpush3.bf16.msra.mxu0 %v6617_v37  ;;  %5468 = vmatprep.subr.bf16.mxu1 %v5467_v44  ;;  %8017 = vst [vmem:[#allocation23_spill] sm:$0xff] %v6686_v36  ;;  %v276_v47 = vld [vmem:[#allocation5 + $0x30] sm:$0xff]  ;;  %v2258_v59 = vld [vmem:[#allocation5 + $0x2c8] sm:$0xff]  ;;  %v278_v62 = vld [vmem:[#allocation5 + $0x40] sm:$0xff] }
  0x71   : > { %5596 = vmatprep.subr.bf16.mxu0 %v6632_v45  ;;  %v5491_v60 = vpack.c.bf16 %v277_v48, %v276_v47  ;;  %v279_v63 = vld [vmem:[#allocation5 + $0x48] sm:$0xff]  ;;  %v6728_v9 = vld [vmem:[%s6576_s11 + $0x80] sm:$0xff]  ;;  %v2261_v30 = vld [vmem:[#allocation5 + $0x2e0] sm:$0xff] }
  0x72   : > { %v6724_v6 = vld [vmem:[%s6576_s11 + $0x78] sm:$0xff]  ;;  %v2260_v13 = vld [vmem:[#allocation5 + $0x2d8] sm:$0xff]  ;;  %v5495_v14 = vpack.c.bf16 %v279_v63, %v278_v62  ;;  %v6746_v27 = vld [vmem:[%s6576_s11 + $0x90] sm:$0xff] }
  0x73   : > { %5470 = vmatpush3.bf16.msra.mxu1 %v5467_v44  ;;  %v2256_v44 = vld [vmem:[#allocation5 + $0x2b8] sm:$0xff]  ;;  %v2262_v33 = vld [vmem:[#allocation5 + $0x2e8] sm:$0xff]  ;;  %v388_v47 = vrot.slane %v6746_v27, 1  ;;  %v2598_v25 = vld [vmem:[#allocation5 + $0x310] sm:$0xff] }
  0x74   : > { %5598 = vmatpush3.bf16.msra.mxu0 %v6632_v45  ;;  %5472 = vmatprep.subr.bf16.mxu1 %v5471_v50  ;;  %v5619_v54 = vpack.c.bf16 %v2256_v44, %v2255_v43  ;;  %v281_v16 = vld [vmem:[#allocation5 + $0x58] sm:$0xff]  ;;  %v6760_v48 = vld [vmem:[%s6576_s11 + $0x98] sm:$0xff]  ;;  %v1105_v45 = vrot.slane %v6650_v1, 2 }
  0x75   : > { %5600 = vmatprep.subr.bf16.mxu0 %v6636_v51  ;;  %v285_v62 = vld [vmem:[#allocation5 + $0x78] sm:$0xff] }
  0x76   : > { %v6871_v37 = vld [vmem:[%s6576_s11 + $0xe8] sm:$0xff] }
  0x77   : > { %5474 = vmatpush3.bf16.msra.mxu1 %v5471_v50  ;;  %v6703_v50 = vsel %vm352_vm0, %v370_v35, %v372_v38  ;;  %v2607_v7 = vld [vmem:[#allocation5 + $0x358] sm:$0xff] }
  0x78   : > { %5602 = vmatpush3.bf16.msra.mxu0 %v6636_v51  ;;  %5476 = vmatprep.subr.bf16.mxu1 %v5475_v56  ;;  %8019 = vst [vmem:[#allocation25_spill] sm:$0xff] %v6703_v50 }
  0x79   : > { %5604 = vmatprep.subr.bf16.mxu0 %v6643_v58 }
  0x7b   : > { %5478 = vmatpush3.bf16.msra.mxu1 %v5475_v56  ;;  %v2257_v56 = vld [vmem:[#allocation5 + $0x2c0] sm:$0xff] }
  0x7c   : > { %5606 = vmatpush3.bf16.msra.mxu0 %v6643_v58  ;;  %5480 = vmatprep.subr.bf16.mxu1 %v5479_v2  ;;  %v5623_v8 = vpack.c.bf16 %v2258_v59, %v2257_v56  ;;  %v2264_v56 = vld [vmem:[#allocation5 + $0x2f8] sm:$0xff] }
  0x7d   : > { %5608 = vmatprep.subr.bf16.mxu0 %v5607_v4  ;;  %v6862_v58 = vld [vmem:[%s6576_s11 + $0xe0] sm:$0xff] }
  0x7e   : > { %4544 = vmatmul.mubr.f32.vlgmr.msra.gmra.mrb[0].mxu1 %v357_v11  ;;  %v2259_v11 = vld [vmem:[#allocation5 + $0x2d0] sm:$0xff]  ;;  %v408_v17 = vrot.slane %v6862_v58, 1 }
  0x7f   : > { %4960 = vmatmul.mubr.f32.vlgmr.msra.gmra.mrb[0].mxu0 %v363_v15  ;;  %5482 = vmatpush3.bf16.msra.mxu1 %v5479_v2  ;;  %v378_v2 = vrot.slane %v6707_v53, 1  ;;  %v5627_v26 = vpack.c.bf16 %v2260_v13, %v2259_v11  ;;  %v6778_v11 = vld [vmem:[%s6576_s11 + $0xa8] sm:$0xff] }
  0x80   : > { %5610 = vmatpush3.bf16.msra.mxu0 %v5607_v4  ;;  %4546 = vmatprep.mubr.f32.mxu1 %v359_v18  ;;  %v380_v4 = vrot.slane %v6710_v55, 1 }
  0x81   : > { %4962 = vmatprep.mubr.f32.mxu0 %v365_v22  ;;  %5612 = vmatprep.subr.bf16.mxu0 %v5611_v19  ;;  %v6734_v18 = vsel %vm352_vm0, %v376_v52, %v378_v2 }
  0x82   : > { %4547 = vmatmul.mubr.f32.gmra.mrb[2].mxu1 %v6627_v41  ;;  %5484 = vmatprep.subr.bf16.mxu1 %v5483_v24  ;;  %v374_v41 = vrot.slane %v6690_v39, 1  ;;  %8022 = vst [vmem:[#allocation28_spill] sm:$0xff] %v6734_v18  ;;  %v6738_v20 = vsel %vm352_vm0, %v378_v2, %v380_v4  ;;  %v390_v2 = vrot.slane %v6760_v48, 1 }
  0x83   : > { %4963 = vmatmul.mubr.f32.gmra.mrb[2].mxu0 %v6682_v34  ;;  %4549 = vmatprep.mubr.f32.mxu1 %v363_v15  ;;  %v280_v15 = vld [vmem:[#allocation5 + $0x50] sm:$0xff]  ;;  %8023 = vst [vmem:[#allocation29_spill] sm:$0xff] %v6738_v20 }
  0x84   : > { %4965 = vmatprep.mubr.f32.mxu0 %v6686_v36  ;;  %5614 = vmatpush3.bf16.msra.mxu0 %v5611_v19  ;;  %v6716_v0 = vsel %vm352_vm0, %v372_v38, %v374_v41  ;;  %v6720_v3 = vsel %vm352_vm0, %v374_v41, %v376_v52  ;;  %v382_v19 = vrot.slane %v6724_v6, 1  ;;  %v5499_v35 = vpack.c.bf16 %v281_v16, %v280_v15  ;;  %v282_v38 = vld [vmem:[#allocation5 + $0x60] sm:$0xff]  ;;  %v6764_v52 = vld [vmem:[%s6576_s11 + $0xa0] sm:$0xff]  ;;  %v2597_v16 = vld [vmem:[#allocation5 + $0x308] sm:$0xff] }
  0x85   : > { %5616 = vmatprep.subr.bf16.mxu0 %v5615_v40  ;;  %5486 = vmatpush3.bf16.msra.mxu1 %v5483_v24  ;;  %8020 = vst [vmem:[#allocation26_spill] sm:$0xff] %v6716_v0  ;;  %8021 = vst [vmem:[#allocation27_spill] sm:$0xff] %v6720_v3  ;;  %v6742_v24 = vld [vmem:[%s6576_s11 + $0x88] sm:$0xff]  ;;  %v5631_v41 = vpack.c.bf16 %v2262_v33, %v2261_v30  ;;  %v6788_v30 = vsel %vm352_vm0, %v388_v47, %v390_v2  ;;  %v394_v33 = vrot.slane %v6778_v11, 1 }
  0x86   : > { %4550 = vmatmul.mubr.f32.gmra.mrb[4].mxu1 %v365_v22  ;;  %5488 = vmatprep.subr.bf16.mxu1 %v5487_v46  ;;  %v384_v22 = vrot.slane %v6728_v9, 1  ;;  %v6752_v43 = vsel %vm352_vm0, %v380_v4, %v382_v19  ;;  %v386_v44 = vrot.slane %v6742_v24, 1  ;;  %v2596_v15 = vld [vmem:[#allocation5 + $0x300] sm:$0xff]  ;;  %8029 = vst [vmem:[#allocation35_spill] sm:$0xff] %v6788_v30 }
  0x87   : > { %4966 = vmatmul.mubr.f32.gmra.mrb[4].mxu0 %v6699_v49  ;;  %4552 = vmatprep.mubr.f32.mxu1 %v6682_v34  ;;  %8024 = vst [vmem:[#allocation30_spill] sm:$0xff] %v6752_v43  ;;  %v6970_v34 = vld [vmem:[%s6576_s11 + $0x128] sm:$0xff] }
  0x88   : > { %4968 = vmatprep.mubr.f32.mxu0 %v6703_v50  ;;  %5618 = vmatpush3.bf16.msra.mxu0 %v5615_v40  ;;  %v283_v40 = vld [vmem:[#allocation5 + $0x68] sm:$0xff]  ;;  %v6770_v63 = vsel %vm352_vm0, %v384_v22, %v386_v44  ;;  %v6774_v4 = vsel %vm352_vm0, %v386_v44, %v388_v47  ;;  %v6798_v44 = vpack.c.bf16 %v2597_v16, %v2596_v15  ;;  %v6802_v47 = vld [vmem:[%s6576_s11 + $0xc0] sm:$0xff] }
  0x89   : > { %5620 = vmatprep.subr.bf16.mxu0 %v5619_v54  ;;  %5490 = vmatpush3.bf16.msra.mxu1 %v5487_v46  ;;  %v6756_v46 = vsel %vm352_vm0, %v382_v19, %v384_v22  ;;  %v5503_v59 = vpack.c.bf16 %v283_v40, %v282_v38  ;;  %8026 = vst [vmem:[#allocation32_spill] sm:$0xff] %v6770_v63  ;;  %8027 = vst [vmem:[#allocation33_spill] sm:$0xff] %v6774_v4  ;;  %v1077_v22 = vld [vmem:[#allocation5 + $0x100] sm:$0xff]  ;;  %v6796_v40 = vld [vmem:[%s6576_s11 + $0xb8] sm:$0xff] }
  0x8a   : > { %4553 = vmatmul.mubr.f32.gmra.mrb[6].mxu1 %v6686_v36  ;;  %5492 = vmatprep.subr.bf16.mxu1 %v5491_v60  ;;  %8025 = vst [vmem:[#allocation31_spill] sm:$0xff] %v6756_v46  ;;  %v6963_v36 = vld [vmem:[%s6576_s11 + $0x120] sm:$0xff] }
  0x8b   : > { %4969 = vmatmul.mubr.f32.gmra.mrb[6].mxu0 %v6716_v0  ;;  %4555 = vmatprep.mubr.f32.mxu1 %v6699_v49 }
  0x8c   : > { %4971 = vmatprep.mubr.f32.mxu0 %v6720_v3  ;;  %5622 = vmatpush3.bf16.msra.mxu0 %v5619_v54  ;;  %v2263_v54 = vld [vmem:[#allocation5 + $0x2f0] sm:$0xff] }
  0x8d   : > { %5624 = vmatprep.subr.bf16.mxu0 %v5623_v8  ;;  %5494 = vmatpush3.bf16.msra.mxu1 %v5491_v60  ;;  %v284_v60 = vld [vmem:[#allocation5 + $0x70] sm:$0xff]  ;;  %v5635_v13 = vpack.c.bf16 %v2264_v56, %v2263_v54  ;;  %v398_v56 = vrot.slane %v6796_v40, 1 }
  0x8e   : > { %4556 = vmatmul.mubr.f32.gmra.mrb[8].mxu1 %v6703_v50  ;;  %5496 = vmatprep.subr.bf16.mxu1 %v5495_v14  ;;  %v5507_v19 = vpack.c.bf16 %v285_v62, %v284_v60  ;;  %v400_v60 = vrot.slane %v6802_v47, 1  ;;  %v6818_v62 = vld [vmem:[%s6576_s11 + $0xc8] sm:$0xff]  ;;  %v2605_v50 = vld [vmem:[#allocation5 + $0x348] sm:$0xff] }
  0x8f   : > { %4972 = vmatmul.mubr.f32.gmra.mrb[8].mxu0 %v6734_v18  ;;  %4558 = vmatprep.mubr.f32.mxu1 %v6716_v0  ;;  %v6944_v0 = vld [vmem:[%s6576_s11 + $0x118] sm:$0xff] }
  0x90   : > { %4974 = vmatprep.mubr.f32.mxu0 %v6738_v20  ;;  %5626 = vmatpush3.bf16.msra.mxu0 %v5623_v8  ;;  %v392_v8 = vrot.slane %v6764_v52, 1  ;;  %v6834_v15 = vsel %vm352_vm0, %v398_v56, %v400_v60 }
  0x91   : > { %5628 = vmatprep.subr.bf16.mxu0 %v5627_v26  ;;  %5498 = vmatpush3.bf16.msra.mxu1 %v5495_v14  ;;  %v6782_v14 = vld [vmem:[%s6576_s11 + $0xb0] sm:$0xff]  ;;  %8034 = vst [vmem:[#allocation40_spill] sm:$0xff] %v6834_v15 }
  0x92   : > { %4559 = vmatmul.mubr.f32.gmra.mrb[10].mxu1 %v6720_v3  ;;  %5500 = vmatprep.subr.bf16.mxu1 %v5499_v35  ;;  %8028 = vst [vmem:[#allocation34_spill] sm:$0xff] %v6782_v14  ;;  %v396_v38 = vrot.slane %v6782_v14, 1  ;;  %v6937_v3 = vld [vmem:[%s6576_s11 + $0x110] sm:$0xff] }
  0x93   : > { %4975 = vmatmul.mubr.f32.gmra.mrb[10].mxu0 %v6752_v43  ;;  %4561 = vmatprep.mubr.f32.mxu1 %v6734_v18 }
  0x94   : > { %4977 = vmatprep.mubr.f32.mxu0 %v6756_v46  ;;  %5630 = vmatpush3.bf16.msra.mxu0 %v5627_v26  ;;  %v1078_v26 = vld [vmem:[#allocation5 + $0x108] sm:$0xff] }
  0x95   : > { %5632 = vmatprep.subr.bf16.mxu0 %v5631_v41  ;;  %5502 = vmatpush3.bf16.msra.mxu1 %v5499_v35  ;;  %v6792_v35 = vsel %vm352_vm0, %v390_v2, %v392_v8  ;;  %v6804_v54 = vpack.c.bf16 %v1078_v26, %v1077_v22  ;;  %v6823_v2 = vld [vmem:[%s6576_s11 + $0xd0] sm:$0xff] }
  0x96   : > { %4562 = vmatmul.mubr.f32.gmra.mrb[12].mxu1 %v6738_v20  ;;  %5504 = vmatprep.subr.bf16.mxu1 %v5503_v59  ;;  %8030 = vst [vmem:[#allocation36_spill] sm:$0xff] %v6792_v35  ;;  %v404_v16 = vrot.slane %v6823_v2, 1 }
  0x97   : > { %4978 = vmatmul.mubr.f32.gmra.mrb[12].mxu0 %v6770_v63  ;;  %4564 = vmatprep.mubr.f32.mxu1 %v6752_v43  ;;  %v2603_v43 = vld [vmem:[#allocation5 + $0x338] sm:$0xff] }
  0x98   : > { %4980 = vmatprep.mubr.f32.mxu0 %v6774_v4  ;;  %5634 = vmatpush3.bf16.msra.mxu0 %v5631_v41  ;;  %v6810_v41 = vsel %vm352_vm0, %v392_v8, %v394_v33  ;;  %v6830_v8 = vsel %vm352_vm0, %v396_v38, %v398_v56  ;;  %v1101_v56 = vrot.slane %v6610_v32, 2 }
  0x99   : > { %5636 = vmatprep.subr.bf16.mxu0 %v5635_v13  ;;  %5506 = vmatpush3.bf16.msra.mxu1 %v5503_v59  ;;  %8031 = vst [vmem:[#allocation37_spill] sm:$0xff] %v6810_v41  ;;  %v6814_v59 = vsel %vm352_vm0, %v394_v33, %v396_v38  ;;  %8033 = vst [vmem:[#allocation39_spill] sm:$0xff] %v6830_v8  ;;  %v7852_v38 = vrot.slane %v6607_v31, 2 }
  0x9a   : > { %4565 = vmatmul.mubr.f32.gmra.mrb[14].mxu1 %v6756_v46  ;;  %5508 = vmatprep.subr.bf16.mxu1 %v5507_v19  ;;  %8032 = vst [vmem:[#allocation38_spill] sm:$0xff] %v6814_v59  ;;  %v1113_v46 = vrot.slane %v6679_v23, 2 }
  0x9b   : > { %4981 = vmatmul.mubr.f32.gmra.mrb[14].mxu0 %v6788_v30  ;;  %4567 = vmatprep.mubr.f32.mxu1 %v6770_v63  ;;  %v6867_v51 = vsel %vm1093_vm1, %v7852_v38, %v1101_v56 }
  0x9c   : > { %4983 = vmatprep.mubr.f32.mxu0 %v6792_v35  ;;  %5638 = vmatpush3.bf16.msra.mxu0 %v5635_v13  ;;  %v402_v13 = vrot.slane %v6818_v62, 1  ;;  %8038 = vst [vmem:[#allocation44_spill] sm:$0xff] %v6867_v51 }
  0x9d   : > { %5640 = vmatprep.subr.bf16.mxu0 %v6798_v44  ;;  %5510 = vmatpush3.bf16.msra.mxu1 %v5507_v19  ;;  %v6838_v19 = vld [vmem:[%s6576_s11 + $0xd8] sm:$0xff] }
  0x9e   : > { %4568 = vmatmul.mubr.f32.gmra.mrb[16].mxu1 %v6774_v4  ;;  %5512 = vmatprep.subr.bf16.mxu1 %v6804_v54  ;;  %v6845_v22 = vsel %vm352_vm0, %v400_v60, %v402_v13  ;;  %v406_v26 = vrot.slane %v6838_v19, 1  ;;  %v6849_v33 = vsel %vm352_vm0, %v402_v13, %v404_v16  ;;  %v1103_v13 = vrot.slane %v6646_v61, 2 }
  0x9f   : > { %4984 = vmatmul.mubr.f32.gmra.mrb[16].mxu0 %v6810_v41  ;;  %4570 = vmatprep.mubr.f32.mxu1 %v6788_v30  ;;  %8035 = vst [vmem:[#allocation41_spill] sm:$0xff] %v6845_v22  ;;  %8036 = vst [vmem:[#allocation42_spill] sm:$0xff] %v6849_v33  ;;  %v2600_v30 = vld [vmem:[#allocation5 + $0x320] sm:$0xff] }
  0xa0   : > { %4986 = vmatprep.mubr.f32.mxu0 %v6814_v59  ;;  %v6858_v60 = vsel %vm352_vm0, %v404_v16, %v406_v26  ;;  %v2599_v16 = vld [vmem:[#allocation5 + $0x318] sm:$0xff]  ;;  %v6879_v38 = vsel %vm1093_vm1, %v1101_v56, %v1103_v13  ;;  %v2601_v56 = vld [vmem:[#allocation5 + $0x328] sm:$0xff]  ;;  %v6897_v4 = vsel %vm352_vm0, %v406_v26, %v408_v17 }
  0xa1   : > { %8037 = vst [vmem:[#allocation43_spill] sm:$0xff] %v6858_v60  ;;  %8039 = vst [vmem:[#allocation45_spill] sm:$0xff] %v6879_v38 }
  0xa2   : > { %4571 = vmatmul.mubr.f32.gmra.mrb[18].mxu1 %v6792_v35  ;;  %v5643_v35 = vpack.c.bf16 %v2599_v16, %v2598_v25  ;;  %8041 = vst [vmem:[#allocation47_spill] sm:$0xff] %v6897_v4  ;;  %v6903_v25 = vsel %vm1093_vm1, %v1105_v45, %v1107_v12 }
  0xa3   : > { %4987 = vmatmul.mubr.f32.gmra.mrb[18].mxu0 %v6830_v8  ;;  %4573 = vmatprep.mubr.f32.mxu1 %v6810_v41  ;;  %v1109_v41 = vrot.slane %v6660_v10, 2  ;;  %8042 = vst [vmem:[#allocation48_spill] sm:$0xff] %v6903_v25 }
  0xa4   : > { %4989 = vmatprep.mubr.f32.mxu0 %v6834_v15 }
  0xa5   : > { %v6914_v26 = vsel %vm1093_vm1, %v1107_v12, %v1109_v41 }
  0xa6   : > { %4574 = vmatmul.mubr.f32.gmra.mrb[20].mxu1 %v6814_v59  ;;  %v6884_v59 = vld [vmem:[%s6576_s11 + $0xf0] sm:$0xff]  ;;  %8044 = vst [vmem:[#allocation50_spill] sm:$0xff] %v6914_v26 }
  0xa7   : > { %4990 = vmatmul.mubr.f32.gmra.mrb[20].mxu0 %v6845_v22  ;;  %4576 = vmatprep.mubr.f32.mxu1 %v6830_v8  ;;  %v410_v8 = vrot.slane %v6871_v37, 1 }
  0xa8   : > { %4992 = vmatprep.mubr.f32.mxu0 %v6849_v33 }
  0xa9   : > { %v6906_v16 = vsel %vm352_vm0, %v408_v17, %v410_v8  ;;  %v2602_v17 = vld [vmem:[#allocation5 + $0x330] sm:$0xff] }
  0xaa   : > { %4577 = vmatmul.mubr.f32.gmra.mrb[22].mxu1 %v6834_v15  ;;  %v6887_v15 = vsel %vm1093_vm1, %v1103_v13, %v1105_v45  ;;  %v412_v13 = vrot.slane %v6884_v59, 1  ;;  %8043 = vst [vmem:[#allocation49_spill] sm:$0xff] %v6906_v16  ;;  %v5647_v45 = vpack.c.bf16 %v2601_v56, %v2600_v30  ;;  %v1115_v56 = vrot.slane %v6690_v39, 2 }
  0xab   : > { %4993 = vmatmul.mubr.f32.gmra.mrb[22].mxu0 %v6858_v60  ;;  %4579 = vmatprep.mubr.f32.mxu1 %v6845_v22  ;;  %8040 = vst [vmem:[#allocation46_spill] sm:$0xff] %v6887_v15  ;;  %v6891_v22 = vld [vmem:[%s6576_s11 + $0xf8] sm:$0xff] }
  0xac   : > { %5063 = vmatprep.mubr.f32.mxu0 %v6867_v51  ;;  %v414_v63 = vrot.slane %v6891_v22, 1  ;;  %v6924_v20 = vsel %vm352_vm0, %v410_v8, %v412_v13  ;;  %v6955_v49 = vsel %vm1093_vm1, %v1113_v46, %v1115_v56 }
  0xad   : > { %8045 = vst [vmem:[#allocation51_spill] sm:$0xff] %v6924_v20  ;;  %8050 = vst [vmem:[#allocation56_spill] sm:$0xff] %v6955_v49 }
  0xae   : > { %4580 = vmatmul.mubr.f32.gmra.mrb[24].mxu1 %v6849_v33  ;;  %v1111_v33 = vrot.slane %v6675_v21, 2  ;;  %v6932_v30 = vsel %vm352_vm0, %v412_v13, %v414_v63  ;;  %v2604_v13 = vld [vmem:[#allocation5 + $0x340] sm:$0xff] }
  0xaf   : > { %5064 = vmatmul.mubr.f32.vlgmr.msra.gmra.mrb[0].mxu0 %v6879_v38  ;;  %4582 = vmatprep.mubr.f32.mxu1 %v6858_v60  ;;  %v6911_v60 = vld [vmem:[%s6576_s11 + $0x100] sm:$0xff]  ;;  %8047 = vst [vmem:[#allocation53_spill] sm:$0xff] %v6932_v30  ;;  %v2935_v38 = vld [vmem:[#allocation5 + $0x388] sm:$0xff] }
  0xb0   : > { %5642 = vmatpush3.bf16.msra.mxu0 %v6798_v44  ;;  %5066 = vmatprep.mubr.f32.mxu0 %v6887_v15  ;;  %v6918_v44 = vld [vmem:[%s6576_s11 + $0x108] sm:$0xff]  ;;  %v416_v12 = vrot.slane %v6911_v60, 1  ;;  %v6929_v18 = vsel %vm1093_vm1, %v1109_v41, %v1111_v33  ;;  %v6940_v8 = vsel %vm1093_vm1, %v1111_v33, %v1113_v46  ;;  %v5651_v41 = vpack.c.bf16 %v2603_v43, %v2602_v17 }
  0xb1   : > { %5644 = vmatprep.subr.bf16.mxu0 %v5643_v35  ;;  %8046 = vst [vmem:[#allocation52_spill] sm:$0xff] %v6929_v18  ;;  %8048 = vst [vmem:[#allocation54_spill] sm:$0xff] %v6940_v8  ;;  %v420_v33 = vrot.slane %v6937_v3, 1  ;;  %v1119_v17 = vrot.slane %v6707_v53, 2  ;;  %v5655_v46 = vpack.c.bf16 %v2605_v50, %v2604_v13  ;;  %v1123_v13 = vrot.slane %v6724_v6, 2 }
  0xb2   : > { %4583 = vmatmul.mubr.f32.gmra.mrb[26].mxu1 %v6897_v4  ;;  %v418_v4 = vrot.slane %v6918_v44, 1 }
  0xb3   : > { %5067 = vmatmul.mubr.f32.gmra.mrb[2].mxu0 %v6903_v25  ;;  %4585 = vmatprep.mubr.f32.mxu1 %v6906_v16  ;;  %v1117_v16 = vrot.slane %v6694_v42, 2  ;;  %v2611_v25 = vld [vmem:[#allocation5 + $0x378] sm:$0xff] }
  0xb4   : > { %5069 = vmatprep.mubr.f32.mxu0 %v6914_v26  ;;  %5646 = vmatpush3.bf16.msra.mxu0 %v5643_v35  ;;  %v6950_v35 = vsel %vm352_vm0, %v414_v63, %v416_v12  ;;  %v6958_v43 = vsel %vm352_vm0, %v416_v12, %v418_v4  ;;  %v2606_v12 = vld [vmem:[#allocation5 + $0x350] sm:$0xff] }
  0xb5   : > { %5648 = vmatprep.subr.bf16.mxu0 %v5647_v45  ;;  %8049 = vst [vmem:[#allocation55_spill] sm:$0xff] %v6950_v35  ;;  %8051 = vst [vmem:[#allocation57_spill] sm:$0xff] %v6958_v43  ;;  %v6966_v63 = vsel %vm1093_vm1, %v1115_v56, %v1117_v16  ;;  %v424_v56 = vrot.slane %v6963_v36, 1 }
  0xb6   : > { %4586 = vmatmul.mubr.f32.gmra.mrb[28].mxu1 %v6924_v20  ;;  %v422_v20 = vrot.slane %v6944_v0, 1  ;;  %8052 = vst [vmem:[#allocation58_spill] sm:$0xff] %v6966_v63 }
  0xb7   : > { %5070 = vmatmul.mubr.f32.gmra.mrb[4].mxu0 %v6929_v18  ;;  %4588 = vmatprep.mubr.f32.mxu1 %v6932_v30  ;;  %v1121_v30 = vrot.slane %v6710_v55, 2  ;;  %v2609_v18 = vld [vmem:[#allocation5 + $0x368] sm:$0xff] }
  0xb8   : > { %5072 = vmatprep.mubr.f32.mxu0 %v6940_v8  ;;  %5650 = vmatpush3.bf16.msra.mxu0 %v5647_v45  ;;  %v6976_v45 = vsel %vm352_vm0, %v418_v4, %v420_v33  ;;  %v6981_v8 = vsel %vm1093_vm1, %v1117_v16, %v1119_v17  ;;  %v6984_v50 = vsel %vm352_vm0, %v420_v33, %v422_v20  ;;  %v2608_v33 = vld [vmem:[#allocation5 + $0x360] sm:$0xff] }
  0xb9   : > { %5652 = vmatprep.subr.bf16.mxu0 %v5651_v41  ;;  %8053 = vst [vmem:[#allocation59_spill] sm:$0xff] %v6976_v45  ;;  %8054 = vst [vmem:[#allocation60_spill] sm:$0xff] %v6981_v8  ;;  %v6992_v4 = vsel %vm1093_vm1, %v1119_v17, %v1121_v30  ;;  %v5659_v16 = vpack.c.bf16 %v2607_v7, %v2606_v12  ;;  %v7007_v26 = vsel %vm1093_vm1, %v1121_v30, %v1123_v13 }
  0xba   : > { %4589 = vmatmul.mubr.f32.gmra.mrb[30].mxu1 %v6950_v35  ;;  %8055 = vst [vmem:[#allocation61_spill] sm:$0xff] %v6984_v50  ;;  %v426_v35 = vrot.slane %v6970_v34, 1  ;;  %8056 = vst [vmem:[#allocation62_spill] sm:$0xff] %v6992_v4  ;;  %v1127_v12 = vrot.slane %v6742_v24, 2  ;;  %v5663_v30 = vpack.c.bf16 %v2609_v18, %v2608_v33  ;;  %v1131_v33 = vrot.slane %v6760_v48, 2 }
  0xbb   : > { %5073 = vmatmul.mubr.f32.gmra.mrb[6].mxu0 %v6955_v49  ;;  %4591 = vmatprep.mubr.f32.mxu1 %v6958_v43  ;;  %v6989_v49 = vld [vmem:[%s6576_s11 + $0x130] sm:$0xff]  ;;  %v1125_v43 = vrot.slane %v6728_v9, 2  ;;  %8058 = vst [vmem:[#allocation64_spill] sm:$0xff] %v7007_v26 }
  0xbc   : > { %5075 = vmatprep.mubr.f32.mxu0 %v6966_v63  ;;  %5654 = vmatpush3.bf16.msra.mxu0 %v5651_v41  ;;  %v6996_v63 = vld [vmem:[%s6576_s11 + $0x138] sm:$0xff]  ;;  %v7002_v41 = vsel %vm352_vm0, %v422_v20, %v424_v56  ;;  %v428_v17 = vrot.slane %v6989_v49, 1  ;;  %v7010_v7 = vsel %vm352_vm0, %v424_v56, %v426_v35 }
  0xbd   : > { %5656 = vmatprep.subr.bf16.mxu0 %v5655_v46  ;;  %8057 = vst [vmem:[#allocation63_spill] sm:$0xff] %v7002_v41  ;;  %8059 = vst [vmem:[#allocation65_spill] sm:$0xff] %v7010_v7  ;;  %v7018_v20 = vsel %vm1093_vm1, %v1123_v13, %v1125_v43  ;;  %v2610_v56 = vld [vmem:[#allocation5 + $0x370] sm:$0xff]  ;;  %v7033_v15 = vsel %vm1093_vm1, %v1125_v43, %v1127_v12 }
  0xbe   : > { %4592 = vmatmul.mubr.f32.gmra.mrb[32].mxu1 %v6976_v45  ;;  %v430_v45 = vrot.slane %v6996_v63, 1  ;;  %8060 = vst [vmem:[#allocation66_spill] sm:$0xff] %v7018_v20  ;;  %8062 = vst [vmem:[#allocation68_spill] sm:$0xff] %v7033_v15  ;;  %v5667_v43 = vpack.c.bf16 %v2611_v25, %v2610_v56  ;;  %v1135_v56 = vrot.slane %v6778_v11, 2 }
  0xbf   : > { %5076 = vmatmul.mubr.f32.gmra.mrb[8].mxu0 %v6981_v8  ;;  %4594 = vmatprep.mubr.f32.mxu1 %v6984_v50  ;;  %v7015_v8 = vld [vmem:[%s6576_s11 + $0x140] sm:$0xff]  ;;  %v1129_v50 = vrot.slane %v6746_v27, 2 }
  0xc0   : > { %5078 = vmatprep.mubr.f32.mxu0 %v6992_v4  ;;  %5658 = vmatpush3.bf16.msra.mxu0 %v5655_v46  ;;  %v7022_v4 = vld [vmem:[%s6576_s11 + $0x148] sm:$0xff]  ;;  %v7028_v46 = vsel %vm352_vm0, %v426_v35, %v428_v17  ;;  %v432_v13 = vrot.slane %v7015_v8, 1  ;;  %v7036_v18 = vsel %vm352_vm0, %v428_v17, %v430_v45 }
  0xc1   : > { %5660 = vmatprep.subr.bf16.mxu0 %v5659_v16  ;;  %8061 = vst [vmem:[#allocation67_spill] sm:$0xff] %v7028_v46  ;;  %8063 = vst [vmem:[#allocation69_spill] sm:$0xff] %v7036_v18  ;;  %v7044_v35 = vsel %vm1093_vm1, %v1127_v12, %v1129_v50  ;;  %v2934_v17 = vld [vmem:[#allocation5 + $0x380] sm:$0xff]  ;;  %v7059_v51 = vsel %vm1093_vm1, %v1129_v50, %v1131_v33 }
  0xc2   : > { %4595 = vmatmul.mubr.f32.gmra.mrb[34].mxu1 %v7002_v41  ;;  %v434_v41 = vrot.slane %v7022_v4, 1  ;;  %8064 = vst [vmem:[#allocation70_spill] sm:$0xff] %v7044_v35  ;;  %8066 = vst [vmem:[#allocation72_spill] sm:$0xff] %v7059_v51  ;;  %v7076_v50 = vpack.c.bf16 %v2935_v38, %v2934_v17  ;;  %v1139_v38 = vrot.slane %v6796_v40, 2 }
  0xc3   : > { %5079 = vmatmul.mubr.f32.gmra.mrb[10].mxu0 %v7007_v26  ;;  %4597 = vmatprep.mubr.f32.mxu1 %v7010_v7  ;;  %v7041_v26 = vld [vmem:[%s6576_s11 + $0x150] sm:$0xff]  ;;  %v1133_v7 = vrot.slane %v6764_v52, 2 }
  0xc4   : > { %5081 = vmatprep.mubr.f32.mxu0 %v7018_v20  ;;  %5662 = vmatpush3.bf16.msra.mxu0 %v5659_v16  ;;  %v7048_v20 = vld [vmem:[%s6576_s11 + $0x158] sm:$0xff]  ;;  %v7054_v16 = vsel %vm352_vm0, %v430_v45, %v432_v13  ;;  %v436_v12 = vrot.slane %v7041_v26, 1  ;;  %v7062_v25 = vsel %vm352_vm0, %v432_v13, %v434_v41  ;;  %8069 = vst [vmem:[#allocation75_spill] sm:$0xff] %v7076_v50 }
  0xc5   : > { %5664 = vmatprep.subr.bf16.mxu0 %v5663_v30  ;;  %8065 = vst [vmem:[#allocation71_spill] sm:$0xff] %v7054_v16  ;;  %8067 = vst [vmem:[#allocation73_spill] sm:$0xff] %v7062_v25  ;;  %v7070_v45 = vsel %vm1093_vm1, %v1131_v33, %v1133_v7  ;;  %v7087_v33 = vsel %vm1093_vm1, %v1133_v7, %v1135_v56 }
  0xc6   : > { %4598 = vmatmul.mubr.f32.gmra.mrb[36].mxu1 %v7028_v46  ;;  %v438_v46 = vrot.slane %v7048_v20, 1  ;;  %8068 = vst [vmem:[#allocation74_spill] sm:$0xff] %v7070_v45  ;;  %8071 = vst [vmem:[#allocation77_spill] sm:$0xff] %v7087_v33 }
  0xc7   : > { %5082 = vmatmul.mubr.f32.gmra.mrb[12].mxu0 %v7033_v15  ;;  %4600 = vmatprep.mubr.f32.mxu1 %v7036_v18  ;;  %v7067_v15 = vld [vmem:[%s6576_s11 + $0x160] sm:$0xff]  ;;  %v1137_v18 = vrot.slane %v6782_v14, 2 }
  0xc8   : > { %5084 = vmatprep.mubr.f32.mxu0 %v7044_v35  ;;  %5666 = vmatpush3.bf16.msra.mxu0 %v5663_v30  ;;  %v7074_v35 = vld [vmem:[%s6576_s11 + $0x168] sm:$0xff]  ;;  %v7082_v30 = vsel %vm352_vm0, %v434_v41, %v436_v12  ;;  %v440_v13 = vrot.slane %v7067_v15, 1  ;;  %v7090_v14 = vsel %vm352_vm0, %v436_v12, %v438_v46 }
  0xc9   : > { %5668 = vmatprep.subr.bf16.mxu0 %v5667_v43  ;;  %8070 = vst [vmem:[#allocation76_spill] sm:$0xff] %v7082_v30  ;;  %8072 = vst [vmem:[#allocation78_spill] sm:$0xff] %v7090_v14  ;;  %v442_v17 = vrot.slane %v7074_v35, 1  ;;  %v7098_v41 = vsel %vm1093_vm1, %v1135_v56, %v1137_v18  ;;  %v7114_v12 = vsel %vm1093_vm1, %v1137_v18, %v1139_v38 }
  0xca   : > { %4601 = vmatmul.mubr.f32.gmra.mrb[38].mxu1 %v7054_v16  ;;  %v7095_v16 = vld [vmem:[%s6576_s11 + $0x170] sm:$0xff]  ;;  %8073 = vst [vmem:[#allocation79_spill] sm:$0xff] %v7098_v41  ;;  %v7109_v7 = vsel %vm352_vm0, %v438_v46, %v440_v13  ;;  %v1145_v46 = vrot.slane %v6823_v2, 2 }
  0xcb   : > { %5085 = vmatmul.mubr.f32.gmra.mrb[14].mxu0 %v7059_v51  ;;  %4603 = vmatprep.mubr.f32.mxu1 %v7062_v25  ;;  %v1141_v25 = vrot.slane %v6802_v47, 2  ;;  %8074 = vst [vmem:[#allocation80_spill] sm:$0xff] %v7109_v7  ;;  %v7117_v56 = vsel %vm352_vm0, %v440_v13, %v442_v17  ;;  %v1143_v51 = vrot.slane %v6818_v62, 2 }
  0xcc   : > { %5087 = vmatprep.mubr.f32.mxu0 %v7070_v45  ;;  %5670 = vmatpush3.bf16.msra.mxu0 %v5667_v43  ;;  %v7102_v45 = vld [vmem:[%s6576_s11 + $0x178] sm:$0xff]  ;;  %v444_v43 = vrot.slane %v7095_v16, 1  ;;  %8075 = vst [vmem:[#allocation81_spill] sm:$0xff] %v7117_v56 }
  0xcd   : > { %5672 = vmatprep.subr.bf16.mxu0 %v7076_v50  ;;  %v1147_v50 = vrot.slane %v6838_v19, 2 }
  0xce   : > { %4604 = vmatmul.mubr.f32.gmra.mrb[40].mxu1 %v7082_v30  ;;  %v446_v30 = vrot.slane %v7102_v45, 1  ;;  %v7132_v18 = vsel %vm352_vm0, %v442_v17, %v444_v43 }
  0xcf   : > { %5088 = vmatmul.mubr.f32.gmra.mrb[16].mxu0 %v7087_v33  ;;  %4606 = vmatprep.mubr.f32.mxu1 %v7090_v14  ;;  %v7122_v33 = vld [vmem:[%s6576_s11 + $0x180] sm:$0xff]  ;;  %v7125_v14 = vsel %vm1093_vm1, %v1139_v38, %v1141_v25  ;;  %8077 = vst [vmem:[#allocation83_spill] sm:$0xff] %v7132_v18  ;;  %v7157_v17 = vsel %vm1093_vm1, %v1145_v46, %v1147_v50 }
  0xd0   : > { %5090 = vmatprep.mubr.f32.mxu0 %v7098_v41  ;;  %8076 = vst [vmem:[#allocation82_spill] sm:$0xff] %v7125_v14  ;;  %v7958_v13 = vrot.slane %v7122_v33, 1  ;;  %v7137_v41 = vsel %vm1093_vm1, %v1141_v25, %v1143_v51  ;;  %v7140_v38 = vsel %vm352_vm0, %v444_v43, %v446_v30 }
  0xd1   : > { %8078 = vst [vmem:[#allocation84_spill] sm:$0xff] %v7137_v41  ;;  %8079 = vst [vmem:[#allocation85_spill] sm:$0xff] %v7140_v38 }
  0xd2   : > { %4607 = vmatmul.mubr.f32.gmra.mrb[42].mxu1 %v7109_v7  ;;  %v7144_v7 = vsel %vm1093_vm1, %v1143_v51, %v1145_v46  ;;  %v7153_v25 = vsel %vm352_vm0, %v446_v30, %v7958_v13  ;;  %v1151_v51 = vrot.slane %v6871_v37, 2  ;;  %v1155_v46 = vrot.slane %v6891_v22, 2 }
  0xd3   : > { %5091 = vmatmul.mubr.f32.gmra.mrb[18].mxu0 %v7114_v12  ;;  %4609 = vmatprep.mubr.f32.mxu1 %v7117_v56  ;;  %8080 = vst [vmem:[#allocation86_spill] sm:$0xff] %v7144_v7  ;;  %v1149_v56 = vrot.slane %v6862_v58, 2  ;;  %8081 = vst [vmem:[#allocation87_spill] sm:$0xff] %v7153_v25  ;;  %v1157_v13 = vrot.slane %v6911_v60, 2 }
  0xd4   : > { %5093 = vmatprep.mubr.f32.mxu0 %v7125_v14  ;;  %v1082_v14 = vld [vmem:[#allocation5 + $0x128] sm:$0xff] }
  0xd5   : > { %v7161_v43 = vsel %vm1093_vm1, %v1147_v50, %v1149_v56  ;;  %v7169_v30 = vsel %vm1093_vm1, %v1149_v56, %v1151_v51  ;;  %v1159_v56 = vrot.slane %v6918_v44, 2 }
  0xd6   : > { %4610 = vmatmul.mubr.f32.gmra.mrb[44].mxu1 %v7132_v18  ;;  %v1153_v18 = vrot.slane %v6884_v59, 2 }
  0xd7   : > { %5094 = vmatmul.mubr.f32.gmra.mrb[20].mxu0 %v7137_v41  ;;  %4612 = vmatprep.mubr.f32.mxu1 %v7140_v38  ;;  %v1079_v38 = vld [vmem:[#allocation5 + $0x110] sm:$0xff]  ;;  %v1080_v41 = vld [vmem:[#allocation5 + $0x118] sm:$0xff] }
  0xd8   : > { %5096 = vmatprep.mubr.f32.mxu0 %v7144_v7  ;;  %v7173_v50 = vsel %vm1093_vm1, %v1151_v51, %v1153_v18  ;;  %v5515_v7 = vpack.c.bf16 %v1080_v41, %v1079_v38  ;;  %v7186_v51 = vsel %vm1093_vm1, %v1155_v46, %v1157_v13  ;;  %v1083_v38 = vld [vmem:[#allocation5 + $0x130] sm:$0xff] }
  0xd9   : > { %8082 = vst [vmem:[#allocation88_spill] sm:$0xff] %v7173_v50 }
  0xda   : > { %4613 = vmatmul.mubr.f32.gmra.mrb[46].mxu1 %v7153_v25  ;;  %v1081_v25 = vld [vmem:[#allocation5 + $0x120] sm:$0xff] }
  0xdb   : > { %5097 = vmatmul.mubr.f32.gmra.mrb[22].mxu0 %v7157_v17  ;;  %4647 = vmatprep.mubr.f32.mxu1 %v6600_v28  ;;  %v7182_v28 = vsel %vm1093_vm1, %v1153_v18, %v1155_v46  ;;  %v5519_v41 = vpack.c.bf16 %v1082_v14, %v1081_v25  ;;  %v1163_v18 = vrot.slane %v6944_v0, 2  ;;  %v1165_v14 = vrot.slane %v6963_v36, 2 }
  0xdc   : > { %5099 = vmatprep.mubr.f32.mxu0 %v7161_v43  ;;  %8083 = vst [vmem:[#allocation89_spill] sm:$0xff] %v7182_v28 }
  0xde   : > { %4648 = vmatmul.mubr.f32.vlgmr.msra.gmra.mrb[0].mxu1 %v6603_v29  ;;  %v1161_v29 = vrot.slane %v6937_v3, 2 }
  0xdf   : > { %5100 = vmatmul.mubr.f32.gmra.mrb[24].mxu0 %v7169_v30  ;;  %5514 = vmatpush3.bf16.msra.mxu1 %v6804_v54  ;;  %v1084_v54 = vld [vmem:[#allocation5 + $0x138] sm:$0xff] }
  0xe0   : > { %4650 = vmatprep.mubr.f32.mxu1 %v6640_v57  ;;  %5102 = vmatprep.mubr.f32.mxu0 %v7173_v50  ;;  %v7194_v57 = vsel %vm1093_vm1, %v1157_v13, %v1159_v56  ;;  %v7198_v46 = vsel %vm1093_vm1, %v1159_v56, %v1161_v29  ;;  %v5523_v25 = vpack.c.bf16 %v1084_v54, %v1083_v38  ;;  %v1086_v50 = vld [vmem:[#allocation5 + $0x148] sm:$0xff]  ;;  %v1169_v56 = vrot.slane %v6989_v49, 2  ;;  %v1087_v38 = vld [vmem:[#allocation5 + $0x150] sm:$0xff]  ;;  %v1088_v54 = vld [vmem:[#allocation5 + $0x158] sm:$0xff] }
  0xe1   : > { %5516 = vmatprep.subr.bf16.mxu1 %v5515_v7  ;;  %v7210_v13 = vsel %vm1093_vm1, %v1163_v18, %v1165_v14 }
  0xe2   : > { %4651 = vmatmul.mubr.f32.gmra.mrb[2].mxu1 %v6607_v31 }
  0xe3   : > { %5103 = vmatmul.mubr.f32.gmra.mrb[26].mxu0 %v7182_v28  ;;  %4653 = vmatprep.mubr.f32.mxu1 %v6610_v32  ;;  %v1085_v28 = vld [vmem:[#allocation5 + $0x140] sm:$0xff]  ;;  %v7206_v32 = vsel %vm1093_vm1, %v1161_v29, %v1163_v18  ;;  %v1171_v29 = vrot.slane %v6996_v63, 2  ;;  %v1090_v18 = vld [vmem:[#allocation5 + $0x168] sm:$0xff] }
  0xe4   : > { %5105 = vmatprep.mubr.f32.mxu0 %v7186_v51  ;;  %5518 = vmatpush3.bf16.msra.mxu1 %v5515_v7  ;;  %v1167_v7 = vrot.slane %v6970_v34, 2 }
  0xe5   : > { %5520 = vmatprep.subr.bf16.mxu1 %v5519_v41 }
  0xe6   : > { %4654 = vmatmul.mubr.f32.gmra.mrb[4].mxu1 %v6646_v61  ;;  %v5527_v61 = vpack.c.bf16 %v1086_v50, %v1085_v28  ;;  %v1173_v50 = vrot.slane %v7015_v8, 2  ;;  %v1089_v28 = vld [vmem:[#allocation5 + $0x160] sm:$0xff] }
  0xe7   : > { %5106 = vmatmul.mubr.f32.gmra.mrb[28].mxu0 %v7194_v57  ;;  %4656 = vmatprep.mubr.f32.mxu1 %v6650_v1  ;;  %v7218_v1 = vsel %vm1093_vm1, %v1165_v14, %v1167_v7  ;;  %v1175_v14 = vrot.slane %v7022_v4, 2 }
  0xe8   : > { %5108 = vmatprep.mubr.f32.mxu0 %v7198_v46  ;;  %5522 = vmatpush3.bf16.msra.mxu1 %v5519_v41  ;;  %v7222_v41 = vsel %vm1093_vm1, %v1167_v7, %v1169_v56  ;;  %v1177_v7 = vrot.slane %v7041_v26, 2 }
  0xe9   : > { %5524 = vmatprep.subr.bf16.mxu1 %v5523_v25 }
  0xea   : > { %4657 = vmatmul.mubr.f32.gmra.mrb[6].mxu1 %v6656_v5  ;;  %v5531_v5 = vpack.c.bf16 %v1088_v54, %v1087_v38  ;;  %v1091_v38 = vld [vmem:[#allocation5 + $0x170] sm:$0xff]  ;;  %v1092_v54 = vld [vmem:[#allocation5 + $0x178] sm:$0xff] }
  0xeb   : > { %5109 = vmatmul.mubr.f32.gmra.mrb[30].mxu0 %v7206_v32  ;;  %4659 = vmatprep.mubr.f32.mxu1 %v6660_v10  ;;  %v7230_v10 = vsel %vm1093_vm1, %v1169_v56, %v1171_v29  ;;  %v1179_v56 = vrot.slane %v7048_v20, 2 }
  0xec   : > { %5111 = vmatprep.mubr.f32.mxu0 %v7210_v13  ;;  %5526 = vmatpush3.bf16.msra.mxu1 %v5523_v25  ;;  %v7234_v25 = vsel %vm1093_vm1, %v1171_v29, %v1173_v50  ;;  %v1181_v29 = vrot.slane %v7067_v15, 2 }
  0xed   : > { %5528 = vmatprep.subr.bf16.mxu1 %v5527_v61 }
  0xee   : > { %4660 = vmatmul.mubr.f32.gmra.mrb[8].mxu1 %v6675_v21  ;;  %v5535_v21 = vpack.c.bf16 %v1090_v18, %v1089_v28  ;;  %v1561_v28 = vld [vmem:[#allocation5 + $0x180] sm:$0xff]  ;;  %v1562_v18 = vld [vmem:[#allocation5 + $0x188] sm:$0xff] }
  0xef   : > { %5112 = vmatmul.mubr.f32.gmra.mrb[32].mxu0 %v7218_v1  ;;  %4662 = vmatprep.mubr.f32.mxu1 %v6679_v23  ;;  %v7242_v23 = vsel %vm1093_vm1, %v1173_v50, %v1175_v14  ;;  %v1183_v50 = vrot.slane %v7074_v35, 2 }
  0xf0   : > { %5114 = vmatprep.mubr.f32.mxu0 %v7222_v41  ;;  %5530 = vmatpush3.bf16.msra.mxu1 %v5527_v61  ;;  %v7246_v61 = vsel %vm1093_vm1, %v1175_v14, %v1177_v7  ;;  %v7261_v14 = vpack.c.bf16 %v1562_v18, %v1561_v28 }
  0xf1   : > { %5532 = vmatprep.subr.bf16.mxu1 %v5531_v5 }
  0xf2   : > { %4663 = vmatmul.mubr.f32.gmra.mrb[10].mxu1 %v6690_v39  ;;  %v5539_v39 = vpack.c.bf16 %v1092_v54, %v1091_v38  ;;  %v1189_v38 = vrot.slane %v7122_v33, 2  ;;  %v7276_v54 = vld [vmem:[%s6576_s11 + $0x188] sm:$0xff] }
  0xf3   : > { %5115 = vmatmul.mubr.f32.gmra.mrb[34].mxu0 %v7230_v10  ;;  %4665 = vmatprep.mubr.f32.mxu1 %v6694_v42  ;;  %v7254_v42 = vsel %vm1093_vm1, %v1177_v7, %v1179_v56  ;;  %v1187_v7 = vrot.slane %v7102_v45, 2 }
  0xf4   : > { %5117 = vmatprep.mubr.f32.mxu0 %v7234_v25  ;;  %5534 = vmatpush3.bf16.msra.mxu1 %v5531_v5  ;;  %8084 = vst [vmem:[#allocation90_spill] sm:$0xff] %v7254_v42  ;;  %v7258_v5 = vsel %vm1093_vm1, %v1179_v56, %v1181_v29  ;;  %v7281_v56 = vld [vmem:[%s6576_s11 + $0x190] sm:$0xff] }
  0xf5   : > { %5536 = vmatprep.subr.bf16.mxu1 %v5535_v21  ;;  %8085 = vst [vmem:[#allocation91_spill] sm:$0xff] %v7258_v5  ;;  %v7291_v28 = vsel %vm1093_vm1, %v1187_v7, %v1189_v38  ;;  %v2267_v18 = vrot.slane %v7281_v56, 2 }
  0xf6   : > { %4666 = vmatmul.mubr.f32.gmra.mrb[12].mxu1 %v6707_v53  ;;  %v1185_v53 = vrot.slane %v7095_v16, 2  ;;  %8089 = vst [vmem:[#allocation95_spill] sm:$0xff] %v7291_v28 }
  0xf7   : > { %5118 = vmatmul.mubr.f32.gmra.mrb[36].mxu0 %v7242_v23  ;;  %4668 = vmatprep.mubr.f32.mxu1 %v6710_v55  ;;  %v7268_v55 = vsel %vm1093_vm1, %v1181_v29, %v1183_v50 }
  0xf8   : > { %5120 = vmatprep.mubr.f32.mxu0 %v7246_v61  ;;  %5538 = vmatpush3.bf16.msra.mxu1 %v5535_v21  ;;  %8086 = vst [vmem:[#allocation92_spill] sm:$0xff] %v7268_v55  ;;  %v7272_v21 = vsel %vm1093_vm1, %v1183_v50, %v1185_v53  ;;  %v7287_v29 = vsel %vm1093_vm1, %v1185_v53, %v1187_v7  ;;  %v7295_v50 = vld [vmem:[%s6576_s11 + $0x198] sm:$0xff] }
  0xf9   : > { %5540 = vmatprep.subr.bf16.mxu1 %v5539_v39  ;;  %8087 = vst [vmem:[#allocation93_spill] sm:$0xff] %v7272_v21  ;;  %8088 = vst [vmem:[#allocation94_spill] sm:$0xff] %v7287_v29 }
  0xfa   : > { %4669 = vmatmul.mubr.f32.gmra.mrb[14].mxu1 %v6724_v6  ;;  %8090 = vst [vmem:[#allocation96_spill] sm:$0xff] %v7295_v50 }
  0xfb   : > { %5121 = vmatmul.mubr.f32.gmra.mrb[38].mxu0 %v7254_v42  ;;  %4671 = vmatprep.mubr.f32.mxu1 %v6728_v9  ;;  %v7337_v42 = vld [vmem:[%s6576_s11 + $0x48] sm:$0xff] }
  0xfc   : > { %5123 = vmatprep.mubr.f32.mxu0 %v7258_v5  ;;  %5542 = vmatpush3.bf16.msra.mxu1 %v5539_v39  ;;  %v2265_v39 = vrot.slane %v7276_v54, 2  ;;  %v7332_v5 = vld [vmem:[%s6576_s11 + $0x40] sm:$0xff]  ;;  %8099 = vst [vmem:[#allocation101_spill] sm:$0xff] %v7337_v42 }
  0xfd   : > { %5544 = vmatprep.subr.bf16.mxu1 %v7261_v14 }
  0xfe   : > { %4672 = vmatmul.mubr.f32.gmra.mrb[16].mxu1 %v6742_v24  ;;  %v7302_v53 = vsel %vm1093_vm1, %v1189_v38, %v2265_v39  ;;  %v7306_v7 = vsel %vm1093_vm1, %v2265_v39, %v2267_v18  ;;  %v2936_v38 = vld [vmem:[#allocation5 + $0x390] sm:$0xff]  ;;  %v2937_v39 = vld [vmem:[#allocation5 + $0x398] sm:$0xff] }
  0xff   : > { %5124 = vmatmul.mubr.f32.gmra.mrb[40].mxu0 %v7268_v55  ;;  %4674 = vmatprep.mubr.f32.mxu1 %v6746_v27  ;;  %8091 = vst [vmem:[#allocation97_spill] sm:$0xff] %v7302_v53  ;;  %8092 = vst [vmem:[#allocation98_spill] sm:$0xff] %v7306_v7  ;;  %v8093_v55 = vld [vmem:[#allocation34_spill] sm:$0xff] }
 0x100   : > { %5126 = vmatprep.mubr.f32.mxu0 %v7272_v21  ;;  %v7979_v21 = vrot.slane %v7295_v50, 2 }
 0x102   : > { %4675 = vmatmul.mubr.f32.gmra.mrb[18].mxu1 %v6760_v48 }
 0x103   : > { %5127 = vmatmul.mubr.f32.gmra.mrb[42].mxu0 %v7287_v29  ;;  %4677 = vmatprep.mubr.f32.mxu1 %v6764_v52  ;;  %v7321_v29 = vld [vmem:[%s6576_s11 + $0x30] sm:$0xff] }
 0x104   : > { %5129 = vmatprep.mubr.f32.mxu0 %v7291_v28  ;;  %v7315_v28 = vsel %vm1093_vm1, %v2267_v18, %v7979_v21  ;;  %8095 = vst [vmem:[#allocation99_spill] sm:$0xff] %v7321_v29  ;;  %v2939_v18 = vld [vmem:[#allocation5 + $0x3a8] sm:$0xff] }
 0x105   : > { %8094 = vst [vmem:[#allocation34_spill] sm:$0xff] %v7315_v28  ;;  %v7326_v21 = vld [vmem:[%s6576_s11 + $0x38] sm:$0xff] }
 0x106   : > { %4678 = vmatmul.mubr.f32.gmra.mrb[20].mxu1 %v6778_v11  ;;  %8096 = vst [vmem:[#allocation100_spill] sm:$0xff] %v7326_v21 }
 0x107   : > { %5130 = vmatmul.mubr.f32.gmra.mrb[44].mxu0 %v7302_v53  ;;  %4680 = vmatprep.mubr.f32.mxu1 %v8093_v55  ;;  %v2938_v53 = vld [vmem:[#allocation5 + $0x3a0] sm:$0xff] }
 0x108   : > { %5132 = vmatprep.mubr.f32.mxu0 %v7306_v7  ;;  %v5675_v7 = vpack.c.bf16 %v2937_v39, %v2936_v38  ;;  %v5679_v38 = vpack.c.bf16 %v2939_v18, %v2938_v53  ;;  %v2940_v39 = vld [vmem:[#allocation5 + $0x3b0] sm:$0xff]  ;;  %v2942_v53 = vld [vmem:[#allocation5 + $0x3c0] sm:$0xff]  ;;  %v2943_v18 = vld [vmem:[#allocation5 + $0x3c8] sm:$0xff] }
 0x10a   : > { %4681 = vmatmul.mubr.f32.gmra.mrb[22].mxu1 %v6796_v40 }
 0x10b   : > { %5133 = vmatmul.mubr.f32.gmra.mrb[46].mxu0 %v7315_v28  ;;  %4683 = vmatprep.mubr.f32.mxu1 %v6802_v47  ;;  %v8097_v28 = vld [vmem:[#allocation75_spill] sm:$0xff] }
 0x10c   : > { %5167 = vmatprep.mubr.f32.mxu0 %v7321_v29  ;;  %8098 = vst [vmem:[#allocation75_spill] sm:$0xff] %v7332_v5  ;;  %v2941_v29 = vld [vmem:[#allocation5 + $0x3b8] sm:$0xff] }
 0x10e   : > { %4684 = vmatmul.mubr.f32.gmra.mrb[24].mxu1 %v6818_v62 }
 0x10f   : > { %5168 = vmatmul.mubr.f32.vlgmr.msra.gmra.mrb[0].mxu0 %v7326_v21  ;;  %4686 = vmatprep.mubr.f32.mxu1 %v6823_v2  ;;  %v7342_v21 = vld [vmem:[%s6576_s11 + $0x50] sm:$0xff] }
 0x110   : > { %5674 = vmatpush3.bf16.msra.mxu0 %v8097_v28  ;;  %5170 = vmatprep.mubr.f32.mxu0 %v7332_v5  ;;  %8100 = vst [vmem:[#allocation102_spill] sm:$0xff] %v7342_v21  ;;  %v5683_v28 = vpack.c.bf16 %v2941_v29, %v2940_v39  ;;  %v7347_v5 = vld [vmem:[%s6576_s11 + $0x58] sm:$0xff]  ;;  %v2945_v39 = vld [vmem:[#allocation5 + $0x3d8] sm:$0xff] }
 0x111   : > { %5676 = vmatprep.subr.bf16.mxu0 %v5675_v7  ;;  %8101 = vst [vmem:[#allocation103_spill] sm:$0xff] %v7347_v5  ;;  %v2944_v29 = vld [vmem:[#allocation5 + $0x3d0] sm:$0xff] }
 0x112   : > { %4687 = vmatmul.mubr.f32.gmra.mrb[26].mxu1 %v6838_v19 }
 0x113   : > { %5171 = vmatmul.mubr.f32.gmra.mrb[2].mxu0 %v7337_v42  ;;  %4689 = vmatprep.mubr.f32.mxu1 %v6862_v58  ;;  %v7352_v42 = vld [vmem:[%s6576_s11 + $0x60] sm:$0xff] }
 0x114   : > { %5173 = vmatprep.mubr.f32.mxu0 %v7342_v21  ;;  %5678 = vmatpush3.bf16.msra.mxu0 %v5675_v7  ;;  %8102 = vst [vmem:[#allocation104_spill] sm:$0xff] %v7352_v42  ;;  %v5687_v7 = vpack.c.bf16 %v2943_v18, %v2942_v53  ;;  %v7357_v21 = vld [vmem:[%s6576_s11 + $0x68] sm:$0xff]  ;;  %v2947_v53 = vld [vmem:[#allocation5 + $0x3e8] sm:$0xff] }
 0x115   : > { %5680 = vmatprep.subr.bf16.mxu0 %v5679_v38  ;;  %8103 = vst [vmem:[#allocation105_spill] sm:$0xff] %v7357_v21 }
 0x116   : > { %4690 = vmatmul.mubr.f32.gmra.mrb[28].mxu1 %v6871_v37 }
 0x117   : > { %5174 = vmatmul.mubr.f32.gmra.mrb[4].mxu0 %v7347_v5  ;;  %4692 = vmatprep.mubr.f32.mxu1 %v6884_v59  ;;  %v7362_v5 = vld [vmem:[%s6576_s11 + $0x70] sm:$0xff] }
 0x118   : > { %5176 = vmatprep.mubr.f32.mxu0 %v7352_v42  ;;  %5682 = vmatpush3.bf16.msra.mxu0 %v5679_v38  ;;  %8104 = vst [vmem:[#allocation106_spill] sm:$0xff] %v7362_v5  ;;  %v5691_v42 = vpack.c.bf16 %v2945_v39, %v2944_v29  ;;  %v2946_v38 = vld [vmem:[#allocation5 + $0x3e0] sm:$0xff]  ;;  %v8106_v29 = vld [vmem:[#allocation44_spill] sm:$0xff] }
 0x119   : > { %5684 = vmatprep.subr.bf16.mxu0 %v5683_v28  ;;  %v5695_v18 = vpack.c.bf16 %v2947_v53, %v2946_v38  ;;  %v1568_v39 = vld [vmem:[#allocation5 + $0x1b8] sm:$0xff]  ;;  %v8108_v38 = vld [vmem:[#allocation46_spill] sm:$0xff] }
 0x11a   : > { %4693 = vmatmul.mubr.f32.gmra.mrb[30].mxu1 %v6891_v22  ;;  %v1570_v53 = vld [vmem:[#allocation5 + $0x1c8] sm:$0xff] }
 0x11b   : > { %5177 = vmatmul.mubr.f32.gmra.mrb[6].mxu0 %v7357_v21  ;;  %4695 = vmatprep.mubr.f32.mxu1 %v6911_v60  ;;  %v2948_v21 = vld [vmem:[#allocation5 + $0x3f0] sm:$0xff] }
 0x11c   : > { %5179 = vmatprep.mubr.f32.mxu0 %v7362_v5  ;;  %5686 = vmatpush3.bf16.msra.mxu0 %v5683_v28  ;;  %v2949_v5 = vld [vmem:[#allocation5 + $0x3f8] sm:$0xff]  ;;  %v3284_v28 = vld [vmem:[#allocation5 + $0x400] sm:$0xff] }
 0x11d   : > { %5688 = vmatprep.subr.bf16.mxu0 %v5687_v7 }
 0x11e   : > { %4696 = vmatmul.mubr.f32.gmra.mrb[32].mxu1 %v6918_v44 }
 0x11f   : > { %5180 = vmatmul.mubr.f32.gmra.mrb[8].mxu0 %v6724_v6  ;;  %4698 = vmatprep.mubr.f32.mxu1 %v6937_v3  ;;  %v5699_v6 = vpack.c.bf16 %v2949_v5, %v2948_v21 }
 0x120   : > { %5182 = vmatprep.mubr.f32.mxu0 %v6728_v9  ;;  %5690 = vmatpush3.bf16.msra.mxu0 %v5687_v7  ;;  %v3285_v9 = vld [vmem:[#allocation5 + $0x408] sm:$0xff] }
 0x121   : > { %5692 = vmatprep.subr.bf16.mxu0 %v5691_v42  ;;  %v1566_v7 = vld [vmem:[#allocation5 + $0x1a8] sm:$0xff] }
 0x122   : > { %4699 = vmatmul.mubr.f32.gmra.mrb[34].mxu1 %v6944_v0 }
 0x123   : > { %5183 = vmatmul.mubr.f32.gmra.mrb[10].mxu0 %v6742_v24  ;;  %4701 = vmatprep.mubr.f32.mxu1 %v6963_v36  ;;  %v7377_v24 = vpack.c.bf16 %v3285_v9, %v3284_v28  ;;  %v8111_v28 = vld [vmem:[#allocation52_spill] sm:$0xff]  ;;  %v8112_v9 = vld [vmem:[#allocation54_spill] sm:$0xff] }
 0x124   : > { %5185 = vmatprep.mubr.f32.mxu0 %v6746_v27  ;;  %5694 = vmatpush3.bf16.msra.mxu0 %v5691_v42  ;;  %v6197_v27 = vld [vmem:[%s6576_s11] sm:$0xff] }
 0x125   : > { %5696 = vmatprep.subr.bf16.mxu0 %v5695_v18  ;;  %v1563_v42 = vld [vmem:[#allocation5 + $0x190] sm:$0xff] }
 0x126   : > { %4702 = vmatmul.mubr.f32.gmra.mrb[36].mxu1 %v6970_v34 }
 0x127   : > { %5186 = vmatmul.mubr.f32.gmra.mrb[12].mxu0 %v6760_v48  ;;  %4704 = vmatprep.mubr.f32.mxu1 %v6989_v49  ;;  %v1094_v48 = vrot.slane %v6197_v27, 2  ;;  %v1573_v27 = vld [vmem:[#allocation5 + $0x1e0] sm:$0xff] }
 0x128   : > { %5188 = vmatprep.mubr.f32.mxu0 %v6764_v52  ;;  %5698 = vmatpush3.bf16.msra.mxu0 %v5695_v18  ;;  %v6198_v52 = vld [vmem:[%s6576_s11 + $0x8] sm:$0xff] }
 0x129   : > { %5700 = vmatprep.subr.bf16.mxu0 %v5699_v6  ;;  %v8110_v18 = vld [vmem:[#allocation50_spill] sm:$0xff] }
 0x12a   : > { %4705 = vmatmul.mubr.f32.gmra.mrb[38].mxu1 %v6996_v63 }
 0x12b   : > { %5189 = vmatmul.mubr.f32.gmra.mrb[14].mxu0 %v6778_v11  ;;  %4707 = vmatprep.mubr.f32.mxu1 %v7015_v8  ;;  %v1095_v11 = vrot.slane %v6198_v52, 2  ;;  %v8114_v52 = vld [vmem:[#allocation58_spill] sm:$0xff] }
 0x12c   : > { %5191 = vmatprep.mubr.f32.mxu0 %v8093_v55  ;;  %5702 = vmatpush3.bf16.msra.mxu0 %v5699_v6  ;;  %v1571_v6 = vld [vmem:[#allocation5 + $0x1d0] sm:$0xff] }
 0x12d   : > { %5704 = vmatprep.subr.bf16.mxu0 %v7377_v24 }
 0x12e   : > { %4708 = vmatmul.mubr.f32.gmra.mrb[40].mxu1 %v7022_v4 }
 0x12f   : > { %5192 = vmatmul.mubr.f32.gmra.mrb[16].mxu0 %v6796_v40  ;;  %4710 = vmatprep.mubr.f32.mxu1 %v7041_v26  ;;  %v6199_v40 = vld [vmem:[%s6576_s11 + $0x10] sm:$0xff] }
 0x130   : > { %5194 = vmatprep.mubr.f32.mxu0 %v6802_v47  ;;  %v1097_v47 = vrot.slane %v6199_v40, 2  ;;  %v8115_v40 = vld [vmem:[#allocation60_spill] sm:$0xff] }
 0x132   : > { %4711 = vmatmul.mubr.f32.gmra.mrb[42].mxu1 %v7048_v20  ;;  %v1098_v5 = vsel %vm1093_vm1, %v1095_v11, %v1097_v47 }
 0x133   : > { %5195 = vmatmul.mubr.f32.gmra.mrb[18].mxu0 %v6818_v62  ;;  %4713 = vmatprep.mubr.f32.mxu1 %v7067_v15  ;;  %v1096_v62 = vsel %vm1093_vm1, %v1094_v48, %v1095_v11  ;;  %v8113_v48 = vld [vmem:[#allocation56_spill] sm:$0xff] }
 0x134   : > { %5197 = vmatprep.mubr.f32.mxu0 %v6823_v2  ;;  %v1564_v2 = vld [vmem:[#allocation5 + $0x198] sm:$0xff]  ;;  %v1575_v11 = vld [vmem:[#allocation5 + $0x1f0] sm:$0xff] }
 0x135   : > { %v5547_v21 = vpack.c.bf16 %v1564_v2, %v1563_v42  ;;  %v8123_v42 = vld [vmem:[#allocation74_spill] sm:$0xff]  ;;  %v8125_v2 = vld [vmem:[#allocation79_spill] sm:$0xff] }
 0x136   : > { %4714 = vmatmul.mubr.f32.gmra.mrb[44].mxu1 %v7074_v35 }
 0x137   : > { %5198 = vmatmul.mubr.f32.gmra.mrb[20].mxu0 %v6838_v19  ;;  %4716 = vmatprep.mubr.f32.mxu1 %v7095_v16  ;;  %v8105_v19 = vrot.slane %v6607_v31, 2  ;;  %v8107_v31 = vld [vmem:[#allocation45_spill] sm:$0xff] }
 0x138   : > { %5200 = vmatprep.mubr.f32.mxu0 %v6862_v58  ;;  %v1565_v58 = vld [vmem:[#allocation5 + $0x1a0] sm:$0xff] }
 0x139   : > { %v1100_v55 = vsel %vm1093_vm1, %v1097_v47, %v8105_v19  ;;  %v8116_v47 = vld [vmem:[#allocation62_spill] sm:$0xff]  ;;  %v3286_v19 = vld [vmem:[#allocation5 + $0x410] sm:$0xff] }
 0x13a   : > { %4717 = vmatmul.mubr.f32.gmra.mrb[46].mxu1 %v7102_v45 }
 0x13b   : > { %5201 = vmatmul.mubr.f32.gmra.mrb[22].mxu0 %v6871_v37  ;;  %4751 = vmatprep.mubr.f32.mxu1 %v1096_v62  ;;  %v5551_v37 = vpack.c.bf16 %v1566_v7, %v1565_v58  ;;  %v8118_v62 = vld [vmem:[#allocation66_spill] sm:$0xff] }
 0x13c   : > { %5203 = vmatprep.mubr.f32.mxu0 %v6884_v59  ;;  %v1567_v59 = vld [vmem:[#allocation5 + $0x1b0] sm:$0xff]  ;;  %v8129_v58 = vld [vmem:[#allocation22_spill] sm:$0xff] }
 0x13e   : > { %4752 = vmatmul.mubr.f32.vlgmr.msra.gmra.mrb[0].mxu1 %v1098_v5  ;;  %v8127_v5 = vld [vmem:[#allocation82_spill] sm:$0xff] }
 0x13f   : > { %5204 = vmatmul.mubr.f32.gmra.mrb[24].mxu0 %v6891_v22  ;;  %5546 = vmatpush3.bf16.msra.mxu1 %v7261_v14  ;;  %v5555_v22 = vpack.c.bf16 %v1568_v39, %v1567_v59  ;;  %v1569_v14 = vld [vmem:[#allocation5 + $0x1c0] sm:$0xff]  ;;  %v3289_v59 = vld [vmem:[#allocation5 + $0x428] sm:$0xff] }
 0x140   : > { %4754 = vmatprep.mubr.f32.mxu1 %v1100_v55  ;;  %5206 = vmatprep.mubr.f32.mxu0 %v6911_v60  ;;  %v8109_v60 = vld [vmem:[#allocation48_spill] sm:$0xff]  ;;  %v8131_v39 = vld [vmem:[#allocation23_spill] sm:$0xff] }
 0x141   : > { %5548 = vmatprep.subr.bf16.mxu1 %v5547_v21  ;;  %v3287_v55 = vld [vmem:[#allocation5 + $0x418] sm:$0xff] }
 0x142   : > { %4755 = vmatmul.mubr.f32.gmra.mrb[2].mxu1 %v8106_v29  ;;  %v5707_v7 = vpack.c.bf16 %v3287_v55, %v3286_v19  ;;  %v3288_v29 = vld [vmem:[#allocation5 + $0x420] sm:$0xff] }
 0x143   : > { %5207 = vmatmul.mubr.f32.gmra.mrb[26].mxu0 %v6918_v44  ;;  %4757 = vmatprep.mubr.f32.mxu1 %v8107_v31  ;;  %v5559_v44 = vpack.c.bf16 %v1570_v53, %v1569_v14  ;;  %v8132_v31 = vld [vmem:[#allocation24_spill] sm:$0xff]  ;;  %v8133_v53 = vld [vmem:[#allocation25_spill] sm:$0xff]  ;;  %v8140_v55 = vld [vmem:[#allocation30_spill] sm:$0xff] }
 0x144   : > { %5209 = vmatprep.mubr.f32.mxu0 %v6937_v3  ;;  %5550 = vmatpush3.bf16.msra.mxu1 %v5547_v21  ;;  %v1572_v3 = vld [vmem:[#allocation5 + $0x1d8] sm:$0xff] }
 0x145   : > { %5552 = vmatprep.subr.bf16.mxu1 %v5551_v37  ;;  %v8128_v21 = vld [vmem:[#allocation84_spill] sm:$0xff]  ;;  %v8139_v19 = vld [vmem:[#allocation29_spill] sm:$0xff] }
 0x146   : > { %4758 = vmatmul.mubr.f32.gmra.mrb[4].mxu1 %v8108_v38  ;;  %v3290_v38 = vld [vmem:[#allocation5 + $0x430] sm:$0xff]  ;;  %v3291_v14 = vld [vmem:[#allocation5 + $0x438] sm:$0xff] }
 0x147   : > { %5210 = vmatmul.mubr.f32.gmra.mrb[28].mxu0 %v6944_v0  ;;  %4760 = vmatprep.mubr.f32.mxu1 %v8109_v60  ;;  %v5563_v0 = vpack.c.bf16 %v1572_v3, %v1571_v6  ;;  %v5715_v6 = vpack.c.bf16 %v3291_v14, %v3290_v38  ;;  %v8135_v3 = vld [vmem:[#allocation88_spill] sm:$0xff]  ;;  %v8143_v14 = vld [vmem:[#allocation33_spill] sm:$0xff] }
 0x148   : > { %5212 = vmatprep.mubr.f32.mxu0 %v6963_v36  ;;  %5554 = vmatpush3.bf16.msra.mxu1 %v5551_v37  ;;  %v1574_v36 = vld [vmem:[#allocation5 + $0x1e8] sm:$0xff]  ;;  %v3299_v38 = vld [vmem:[#allocation5 + $0x478] sm:$0xff] }
 0x149   : > { %5556 = vmatprep.subr.bf16.mxu1 %v5555_v22  ;;  %v8130_v37 = vld [vmem:[#allocation86_spill] sm:$0xff] }
 0x14a   : > { %4761 = vmatmul.mubr.f32.gmra.mrb[6].mxu1 %v8110_v18 }
 0x14b   : > { %5213 = vmatmul.mubr.f32.gmra.mrb[30].mxu0 %v6970_v34  ;;  %4763 = vmatprep.mubr.f32.mxu1 %v8111_v28  ;;  %v5567_v34 = vpack.c.bf16 %v1574_v36, %v1573_v27  ;;  %v8136_v27 = vld [vmem:[#allocation27_spill] sm:$0xff]  ;;  %v8137_v36 = vld [vmem:[#allocation89_spill] sm:$0xff] }
 0x14c   : > { %5215 = vmatprep.mubr.f32.mxu0 %v6989_v49  ;;  %5558 = vmatpush3.bf16.msra.mxu1 %v5555_v22  ;;  %v1576_v49 = vld [vmem:[#allocation5 + $0x1f8] sm:$0xff]  ;;  %v5711_v22 = vpack.c.bf16 %v3289_v59, %v3288_v29  ;;  %v3297_v29 = vld [vmem:[#allocation5 + $0x468] sm:$0xff] }
 0x14d   : > { %5560 = vmatprep.subr.bf16.mxu1 %v5559_v44  ;;  %v8141_v59 = vld [vmem:[#allocation31_spill] sm:$0xff] }
 0x14e   : > { %4764 = vmatmul.mubr.f32.gmra.mrb[8].mxu1 %v8112_v9 }
 0x14f   : > { %5216 = vmatmul.mubr.f32.gmra.mrb[32].mxu0 %v6996_v63  ;;  %4766 = vmatprep.mubr.f32.mxu1 %v8113_v48  ;;  %v5571_v63 = vpack.c.bf16 %v1576_v49, %v1575_v11  ;;  %v3294_v49 = vld [vmem:[#allocation5 + $0x450] sm:$0xff] }
 0x150   : > { %5218 = vmatprep.mubr.f32.mxu0 %v7015_v8  ;;  %5562 = vmatpush3.bf16.msra.mxu1 %v5559_v44  ;;  %v8117_v8 = vld [vmem:[#allocation64_spill] sm:$0xff]  ;;  %v8134_v44 = vld [vmem:[#allocation26_spill] sm:$0xff] }
 0x151   : > { %5564 = vmatprep.subr.bf16.mxu1 %v5563_v0 }
 0x152   : > { %4767 = vmatmul.mubr.f32.gmra.mrb[10].mxu1 %v8114_v52 }
 0x153   : > { %5219 = vmatmul.mubr.f32.gmra.mrb[34].mxu0 %v7022_v4  ;;  %4769 = vmatprep.mubr.f32.mxu1 %v8115_v40  ;;  %v8119_v4 = vld [vmem:[#allocation68_spill] sm:$0xff] }
 0x154   : > { %5221 = vmatprep.mubr.f32.mxu0 %v7041_v26  ;;  %5566 = vmatpush3.bf16.msra.mxu1 %v5563_v0  ;;  %v8120_v26 = vld [vmem:[#allocation14_spill] sm:$0xff] }
 0x155   : > { %5568 = vmatprep.subr.bf16.mxu1 %v5567_v34  ;;  %v3293_v0 = vld [vmem:[#allocation5 + $0x448] sm:$0xff] }
 0x156   : > { %4770 = vmatmul.mubr.f32.gmra.mrb[12].mxu1 %v8116_v47 }
 0x157   : > { %5222 = vmatmul.mubr.f32.gmra.mrb[36].mxu0 %v7048_v20  ;;  %4772 = vmatprep.mubr.f32.mxu1 %v8117_v8  ;;  %v8121_v20 = vld [vmem:[#allocation70_spill] sm:$0xff] }
 0x158   : > { %5224 = vmatprep.mubr.f32.mxu0 %v7067_v15  ;;  %5570 = vmatpush3.bf16.msra.mxu1 %v5567_v34  ;;  %v8122_v15 = vld [vmem:[#allocation72_spill] sm:$0xff] }
 0x159   : > { %5572 = vmatprep.subr.bf16.mxu1 %v5571_v63  ;;  %v8138_v34 = vld [vmem:[#allocation28_spill] sm:$0xff] }
 0x15a   : > { %4773 = vmatmul.mubr.f32.gmra.mrb[14].mxu1 %v8118_v62 }
 0x15b   : > { %5225 = vmatmul.mubr.f32.gmra.mrb[38].mxu0 %v7074_v35  ;;  %4775 = vmatprep.mubr.f32.mxu1 %v8119_v4  ;;  %v8124_v35 = vld [vmem:[#allocation77_spill] sm:$0xff] }
 0x15c   : > { %5227 = vmatprep.mubr.f32.mxu0 %v7095_v16  ;;  %5574 = vmatpush3.bf16.msra.mxu1 %v5571_v63  ;;  %v7448_v16 = vld [vmem:[%s6576_s11 + $0x1a0] sm:$0xff] }
 0x15d   : > { %5735 = vmatprep.subr.bf16.mxu1 %v8120_v26  ;;  %v3295_v63 = vld [vmem:[#allocation5 + $0x458] sm:$0xff] }
 0x15e   : > { %4776 = vmatmul.mubr.f32.gmra.mrb[16].mxu1 %v8121_v20 }
 0x15f   : > { %5228 = vmatmul.mubr.f32.gmra.mrb[40].mxu0 %v7102_v45  ;;  %4778 = vmatprep.mubr.f32.mxu1 %v8122_v15  ;;  %v7455_v45 = vld [vmem:[%s6576_s11 + $0x1a8] sm:$0xff] }
 0x160   : > { %5230 = vmatprep.mubr.f32.mxu0 %v7122_v33  ;;  %8126 = vst [vmem:[#allocation44_spill] sm:$0xff] %v7455_v45 }
 0x162   : > { %4779 = vmatmul.mubr.f32.gmra.mrb[18].mxu1 %v8123_v42 }
 0x163   : > { %5231 = vmatmul.mubr.f32.gmra.mrb[42].mxu0 %v7276_v54  ;;  %4781 = vmatprep.mubr.f32.mxu1 %v8124_v35 }
 0x164   : > { %5233 = vmatprep.mubr.f32.mxu0 %v7281_v56 }
 0x166   : > { %4782 = vmatmul.mubr.f32.gmra.mrb[20].mxu1 %v8125_v2 }
 0x167   : > { %5234 = vmatmul.mubr.f32.gmra.mrb[44].mxu0 %v7295_v50  ;;  %4784 = vmatprep.mubr.f32.mxu1 %v7114_v12 }
 0x168   : > { %5236 = vmatprep.mubr.f32.mxu0 %v7448_v16 }
 0x16a   : > { %4785 = vmatmul.mubr.f32.gmra.mrb[22].mxu1 %v8127_v5 }
 0x16b   : > { %5237 = vmatmul.mubr.f32.gmra.mrb[46].mxu0 %v7455_v45  ;;  %4787 = vmatprep.mubr.f32.mxu1 %v8128_v21 }
 0x16c   : > { %5271 = vmatprep.mubr.f32.mxu0 %v8129_v58  ;;  %v5723_v58 = vpack.c.bf16 %v3295_v63, %v3294_v49  ;;  %v8151_v49 = vld [vmem:[#allocation41_spill] sm:$0xff]  ;;  %v8152_v63 = vld [vmem:[#allocation91_spill] sm:$0xff] }
 0x16e   : > { %4788 = vmatmul.mubr.f32.gmra.mrb[24].mxu1 %v8130_v37 }
 0x16f   : > { %5272 = vmatmul.mubr.f32.vlgmr.msra.gmra.mrb[0].mxu0 %v8131_v39  ;;  %4790 = vmatprep.mubr.f32.mxu1 %v7157_v17  ;;  %v8142_v39 = vld [vmem:[#allocation32_spill] sm:$0xff] }
 0x170   : > { %5706 = vmatpush3.bf16.msra.mxu0 %v7377_v24  ;;  %5274 = vmatprep.mubr.f32.mxu0 %v8132_v31  ;;  %v3292_v24 = vld [vmem:[#allocation5 + $0x440] sm:$0xff] }
 0x171   : > { %5708 = vmatprep.subr.bf16.mxu0 %v5707_v7  ;;  %v5719_v11 = vpack.c.bf16 %v3293_v0, %v3292_v24  ;;  %v8146_v24 = vld [vmem:[#allocation37_spill] sm:$0xff]  ;;  %v8147_v0 = vld [vmem:[#allocation38_spill] sm:$0xff] }
 0x172   : > { %4791 = vmatmul.mubr.f32.gmra.mrb[26].mxu1 %v7161_v43 }
 0x173   : > { %5275 = vmatmul.mubr.f32.gmra.mrb[2].mxu0 %v8133_v53  ;;  %4793 = vmatprep.mubr.f32.mxu1 %v7169_v30  ;;  %v8144_v53 = vld [vmem:[#allocation35_spill] sm:$0xff] }
 0x174   : > { %5277 = vmatprep.mubr.f32.mxu0 %v8134_v44  ;;  %5710 = vmatpush3.bf16.msra.mxu0 %v5707_v7  ;;  %v3296_v7 = vld [vmem:[#allocation5 + $0x460] sm:$0xff] }
 0x175   : > { %5712 = vmatprep.subr.bf16.mxu0 %v5711_v22  ;;  %v5727_v31 = vpack.c.bf16 %v3297_v29, %v3296_v7  ;;  %v8156_v7 = vld [vmem:[#allocation93_spill] sm:$0xff]  ;;  %v8157_v29 = vld [vmem:[#allocation47_spill] sm:$0xff] }
 0x176   : > { %4794 = vmatmul.mubr.f32.gmra.mrb[28].mxu1 %v8135_v3 }
 0x177   : > { %5278 = vmatmul.mubr.f32.gmra.mrb[4].mxu0 %v8136_v27  ;;  %4796 = vmatprep.mubr.f32.mxu1 %v8137_v36  ;;  %v8148_v27 = vld [vmem:[#allocation39_spill] sm:$0xff] }
 0x178   : > { %5280 = vmatprep.mubr.f32.mxu0 %v8138_v34  ;;  %5714 = vmatpush3.bf16.msra.mxu0 %v5711_v22  ;;  %v3298_v22 = vld [vmem:[#allocation5 + $0x470] sm:$0xff] }
 0x179   : > { %5716 = vmatprep.subr.bf16.mxu0 %v5715_v6  ;;  %v5731_v44 = vpack.c.bf16 %v3299_v38, %v3298_v22  ;;  %v8149_v34 = vld [vmem:[#allocation40_spill] sm:$0xff]  ;;  %v8161_v22 = vld [vmem:[#allocation51_spill] sm:$0xff] }
 0x17a   : > { %4797 = vmatmul.mubr.f32.gmra.mrb[30].mxu1 %v7186_v51  ;;  %v6200_v38 = vld [vmem:[%s6576_s11 + $0x18] sm:$0xff] }
 0x17b   : > { %5281 = vmatmul.mubr.f32.gmra.mrb[6].mxu0 %v8139_v19  ;;  %4799 = vmatprep.mubr.f32.mxu1 %v7194_v57  ;;  %v8153_v19 = vld [vmem:[#allocation42_spill] sm:$0xff] }
 0x17c   : > { %5283 = vmatprep.mubr.f32.mxu0 %v8140_v55  ;;  %5718 = vmatpush3.bf16.msra.mxu0 %v5715_v6  ;;  %v8145_v6 = vld [vmem:[#allocation36_spill] sm:$0xff] }
 0x17d   : > { %5720 = vmatprep.subr.bf16.mxu0 %v5719_v11  ;;  %v8154_v55 = vld [vmem:[#allocation92_spill] sm:$0xff] }
 0x17e   : > { %4800 = vmatmul.mubr.f32.gmra.mrb[32].mxu1 %v7198_v46 }
 0x17f   : > { %5284 = vmatmul.mubr.f32.gmra.mrb[8].mxu0 %v8141_v59  ;;  %4802 = vmatprep.mubr.f32.mxu1 %v7206_v32  ;;  %v8158_v59 = vld [vmem:[#allocation94_spill] sm:$0xff] }
 0x180   : > { %5286 = vmatprep.mubr.f32.mxu0 %v8142_v39  ;;  %5722 = vmatpush3.bf16.msra.mxu0 %v5719_v11  ;;  %v8150_v11 = vld [vmem:[#allocation90_spill] sm:$0xff]  ;;  %v8159_v39 = vld [vmem:[#allocation49_spill] sm:$0xff] }
 0x181   : > { %5724 = vmatprep.subr.bf16.mxu0 %v5723_v58 }
 0x182   : > { %4803 = vmatmul.mubr.f32.gmra.mrb[34].mxu1 %v7210_v13 }
 0x183   : > { %5287 = vmatmul.mubr.f32.gmra.mrb[10].mxu0 %v8143_v14  ;;  %4805 = vmatprep.mubr.f32.mxu1 %v7218_v1  ;;  %v8162_v14 = vld [vmem:[#allocation53_spill] sm:$0xff] }
 0x184   : > { %5289 = vmatprep.mubr.f32.mxu0 %v8144_v53  ;;  %5726 = vmatpush3.bf16.msra.mxu0 %v5723_v58  ;;  %v8155_v58 = vld [vmem:[#allocation43_spill] sm:$0xff] }
 0x185   : > { %5728 = vmatprep.subr.bf16.mxu0 %v5727_v31  ;;  %v6201_v53 = vld [vmem:[%s6576_s11 + $0x20] sm:$0xff] }
 0x186   : > { %4806 = vmatmul.mubr.f32.gmra.mrb[36].mxu1 %v7222_v41 }
 0x187   : > { %5290 = vmatmul.mubr.f32.gmra.mrb[12].mxu0 %v8145_v6  ;;  %4808 = vmatprep.mubr.f32.mxu1 %v7230_v10  ;;  %v6202_v6 = vld [vmem:[%s6576_s11 + $0x28] sm:$0xff] }
 0x188   : > { %5292 = vmatprep.mubr.f32.mxu0 %v8146_v24  ;;  %5730 = vmatpush3.bf16.msra.mxu0 %v5727_v31  ;;  %v8160_v31 = vld [vmem:[#allocation95_spill] sm:$0xff]  ;;  %v8164_v24 = vld [vmem:[#allocation57_spill] sm:$0xff] }
 0x189   : > { %5732 = vmatprep.subr.bf16.mxu0 %v5731_v44 }
 0x18a   : > { %4809 = vmatmul.mubr.f32.gmra.mrb[38].mxu1 %v7234_v25 }
 0x18b   : > { %5293 = vmatmul.mubr.f32.gmra.mrb[14].mxu0 %v8147_v0  ;;  %4811 = vmatprep.mubr.f32.mxu1 %v7242_v23  ;;  %v8165_v0 = vld [vmem:[#allocation15_spill] sm:$0xff] }
 0x18c   : > { %5295 = vmatprep.mubr.f32.mxu0 %v8148_v27  ;;  %5734 = vmatpush3.bf16.msra.mxu0 %v5731_v44  ;;  %v8163_v44 = vld [vmem:[#allocation55_spill] sm:$0xff] }
 0x18d   : > { %v8166_v27 = vld [vmem:[#allocation99_spill] sm:$0xff] }
 0x18e   : > { %4812 = vmatmul.mubr.f32.gmra.mrb[40].mxu1 %v7246_v61 }
 0x18f   : > { %5296 = vmatmul.mubr.f32.gmra.mrb[16].mxu0 %v8149_v34  ;;  %4814 = vmatprep.mubr.f32.mxu1 %v8150_v11  ;;  %v8167_v34 = vld [vmem:[#allocation59_spill] sm:$0xff]  ;;  %v8188_v11 = vld [vmem:[#allocation78_spill] sm:$0xff] }
 0x190   : > { %5298 = vmatprep.mubr.f32.mxu0 %v8151_v49  ;;  %v8168_v49 = vld [vmem:[#allocation100_spill] sm:$0xff] }
 0x192   : > { %4815 = vmatmul.mubr.f32.gmra.mrb[42].mxu1 %v8152_v63  ;;  %v8187_v63 = vld [vmem:[#allocation76_spill] sm:$0xff] }
 0x193   : > { %5299 = vmatmul.mubr.f32.gmra.mrb[18].mxu0 %v8153_v19  ;;  %4817 = vmatprep.mubr.f32.mxu1 %v8154_v55  ;;  %v8169_v19 = vld [vmem:[#allocation61_spill] sm:$0xff] }
 0x194   : > { %5301 = vmatprep.mubr.f32.mxu0 %v8155_v58  ;;  %v8170_v58 = vld [vmem:[#allocation16_spill] sm:$0xff]  ;;  %v8184_v55 = vld [vmem:[#allocation73_spill] sm:$0xff] }
 0x196   : > { %4818 = vmatmul.mubr.f32.gmra.mrb[44].mxu1 %v8156_v7  ;;  %v8182_v7 = vld [vmem:[#allocation71_spill] sm:$0xff] }
 0x197   : > { %5302 = vmatmul.mubr.f32.gmra.mrb[20].mxu0 %v8157_v29  ;;  %4820 = vmatprep.mubr.f32.mxu1 %v8158_v59  ;;  %v8179_v59 = vld [vmem:[#allocation69_spill] sm:$0xff] }
 0x198   : > { %5304 = vmatprep.mubr.f32.mxu0 %v8159_v39 }
 0x19a   : > { %4821 = vmatmul.mubr.f32.gmra.mrb[46].mxu1 %v8160_v31  ;;  %v8177_v31 = vld [vmem:[#allocation67_spill] sm:$0xff] }
 0x19b   : > { %5305 = vmatmul.mubr.f32.gmra.mrb[22].mxu0 %v8161_v22  ;;  %4855 = vmatprep.mubr.f32.mxu1 %v6200_v38  ;;  %v8171_v38 = vld [vmem:[#allocation75_spill] sm:$0xff] }
 0x19c   : > { %5307 = vmatprep.mubr.f32.mxu0 %v8162_v14 }
 0x19e   : > { %4856 = vmatmul.mubr.f32.vlgmr.msra.gmra.mrb[0].mxu1 %v6201_v53  ;;  %v8173_v53 = vld [vmem:[#allocation101_spill] sm:$0xff] }
 0x19f   : > { %5308 = vmatmul.mubr.f32.gmra.mrb[24].mxu0 %v8163_v44  ;;  %5743 = vmatpush3.bf16.msra.mxu1 %v8120_v26  ;;  %v8172_v26 = vld [vmem:[#allocation63_spill] sm:$0xff] }
 0x1a0   : > { %4858 = vmatprep.mubr.f32.mxu1 %v6202_v6  ;;  %5310 = vmatprep.mubr.f32.mxu0 %v8164_v24  ;;  %v8174_v6 = vld [vmem:[#allocation65_spill] sm:$0xff] }
 0x1a1   : > { %5736 = vmatprep.subr.bf16.mxu1 %v8165_v0 }
 0x1a2   : > { %4859 = vmatmul.mubr.f32.gmra.mrb[2].mxu1 %v8166_v27  ;;  %v8175_v27 = vld [vmem:[#allocation17_spill] sm:$0xff] }
 0x1a3   : > { %5311 = vmatmul.mubr.f32.gmra.mrb[26].mxu0 %v8167_v34  ;;  %4861 = vmatprep.mubr.f32.mxu1 %v8168_v49  ;;  %v8176_v49 = vld [vmem:[#allocation102_spill] sm:$0xff] }
 0x1a4   : > { %5313 = vmatprep.mubr.f32.mxu0 %v8169_v19  ;;  %5744 = vmatpush3.bf16.msra.mxu1 %v8165_v0  ;;  %v8178_v0 = vld [vmem:[#allocation103_spill] sm:$0xff] }
 0x1a5   : > { %5737 = vmatprep.subr.bf16.mxu1 %v8170_v58 }
 0x1a6   : > { %4862 = vmatmul.mubr.f32.gmra.mrb[4].mxu1 %v8171_v38  ;;  %v8180_v38 = vld [vmem:[#allocation18_spill] sm:$0xff] }
 0x1a7   : > { %5314 = vmatmul.mubr.f32.gmra.mrb[28].mxu0 %v8172_v26  ;;  %4864 = vmatprep.mubr.f32.mxu1 %v8173_v53  ;;  %v8181_v53 = vld [vmem:[#allocation104_spill] sm:$0xff] }
 0x1a8   : > { %5316 = vmatprep.mubr.f32.mxu0 %v8174_v6  ;;  %5745 = vmatpush3.bf16.msra.mxu1 %v8170_v58  ;;  %v8183_v58 = vld [vmem:[#allocation105_spill] sm:$0xff] }
 0x1a9   : > { %5738 = vmatprep.subr.bf16.mxu1 %v8175_v27 }
 0x1aa   : > { %4865 = vmatmul.mubr.f32.gmra.mrb[6].mxu1 %v8176_v49  ;;  %v8185_v49 = vld [vmem:[#allocation19_spill] sm:$0xff] }
 0x1ab   : > { %5317 = vmatmul.mubr.f32.gmra.mrb[30].mxu0 %v8177_v31  ;;  %4867 = vmatprep.mubr.f32.mxu1 %v8178_v0  ;;  %v8186_v0 = vld [vmem:[#allocation106_spill] sm:$0xff] }
 0x1ac   : > { %5319 = vmatprep.mubr.f32.mxu0 %v8179_v59  ;;  %5746 = vmatpush3.bf16.msra.mxu1 %v8175_v27  ;;  %v6203_v27 = vld [vmem:[%s6576_s11 + $0x78] sm:$0xff] }
 0x1ad   : > { %5739 = vmatprep.subr.bf16.mxu1 %v8180_v38 }
 0x1ae   : > { %4868 = vmatmul.mubr.f32.gmra.mrb[8].mxu1 %v8181_v53  ;;  %v8189_v53 = vld [vmem:[#allocation20_spill] sm:$0xff] }
 0x1af   : > { %5320 = vmatmul.mubr.f32.gmra.mrb[32].mxu0 %v8182_v7  ;;  %4870 = vmatprep.mubr.f32.mxu1 %v8183_v58  ;;  %v6204_v58 = vld [vmem:[%s6576_s11 + $0x80] sm:$0xff]  ;;  %v6207_v7 = vld [vmem:[%s6576_s11 + $0x98] sm:$0xff] }
 0x1b0   : > { %5322 = vmatprep.mubr.f32.mxu0 %v8184_v55  ;;  %5747 = vmatpush3.bf16.msra.mxu1 %v8180_v38  ;;  %v8190_v55 = vld [vmem:[#allocation80_spill] sm:$0xff] }
 0x1b1   : > { %5740 = vmatprep.subr.bf16.mxu1 %v8185_v49  ;;  %v6205_v38 = vld [vmem:[%s6576_s11 + $0x88] sm:$0xff] }
 0x1b2   : > { %4871 = vmatmul.mubr.f32.gmra.mrb[10].mxu1 %v8186_v0  ;;  %v8191_v0 = vld [vmem:[#allocation81_spill] sm:$0xff] }
 0x1b3   : > { %5323 = vmatmul.mubr.f32.gmra.mrb[34].mxu0 %v8187_v63  ;;  %4873 = vmatprep.mubr.f32.mxu1 %v6203_v27  ;;  %v1918_v27 = vrot.slane %v7276_v54, 1  ;;  %v8192_v63 = vld [vmem:[#allocation21_spill] sm:$0xff] }
 0x1b4   : > { %5325 = vmatprep.mubr.f32.mxu0 %v8188_v11  ;;  %5748 = vmatpush3.bf16.msra.mxu1 %v8185_v49  ;;  %v6206_v11 = vld [vmem:[%s6576_s11 + $0x90] sm:$0xff] }
 0x1b5   : > { %5741 = vmatprep.subr.bf16.mxu1 %v8189_v53  ;;  %v8193_v49 = vld [vmem:[#allocation83_spill] sm:$0xff] }
 0x1b6   : > { %4874 = vmatmul.mubr.f32.gmra.mrb[12].mxu1 %v6204_v58  ;;  %v8194_v58 = vld [vmem:[#allocation85_spill] sm:$0xff] }
 0x1b7   : > { %5326 = vmatmul.mubr.f32.gmra.mrb[36].mxu0 %v8190_v55  ;;  %4876 = vmatprep.mubr.f32.mxu1 %v6205_v38  ;;  %v1920_v38 = vrot.slane %v7281_v56, 1  ;;  %v6208_v55 = vld [vmem:[%s6576_s11 + $0xa0] sm:$0xff] }
 0x1b8   : > { %5328 = vmatprep.mubr.f32.mxu0 %v8191_v0  ;;  %5749 = vmatpush3.bf16.msra.mxu1 %v8189_v53  ;;  %v8195_v53 = vrot.slane %v7122_v33, 1  ;;  %v2955_v33 = vrot.slane %v7455_v45, 1  ;;  %v6213_v45 = vld [vmem:[%s6576_s11 + $0xc8] sm:$0xff] }
 0x1b9   : > { %5742 = vmatprep.subr.bf16.mxu1 %v8192_v63 }
 0x1ba   : > { %4877 = vmatmul.mubr.f32.gmra.mrb[14].mxu1 %v6206_v11  ;;  %v7562_v0 = vsel %vm352_vm0, %v8195_v53, %v1918_v27  ;;  %v1922_v11 = vrot.slane %v7295_v50, 1  ;;  %v7578_v50 = vld [vmem:[%s6576_s11 + $0x1b0] sm:$0xff] }
 0x1bb   : > { %5329 = vmatmul.mubr.f32.gmra.mrb[38].mxu0 %v8193_v49  ;;  %4879 = vmatprep.mubr.f32.mxu1 %v6207_v7  ;;  %8196 = vst [vmem:[#allocation45_spill] sm:$0xff] %v7562_v0  ;;  %v8197_v49 = vld [vmem:[#allocation87_spill] sm:$0xff]  ;;  %v6209_v7 = vld [vmem:[%s6576_s11 + $0xa8] sm:$0xff] }
 0x1bc   : > { %5331 = vmatprep.mubr.f32.mxu0 %v8194_v58  ;;  %5750 = vmatpush3.bf16.msra.mxu1 %v8192_v63  ;;  %v2953_v58 = vrot.slane %v7448_v16, 1  ;;  %v7571_v63 = vsel %vm352_vm0, %v1918_v27, %v1920_v38  ;;  %v7575_v53 = vsel %vm352_vm0, %v1920_v38, %v1922_v11 }
 0x1be   : > { %4880 = vmatmul.mubr.f32.gmra.mrb[16].mxu1 %v6208_v55  ;;  %v6210_v55 = vld [vmem:[%s6576_s11 + $0xb0] sm:$0xff]  ;;  %v2954_v27 = vsel %vm352_vm0, %v1922_v11, %v2953_v58  ;;  %v2956_v38 = vsel %vm352_vm0, %v2953_v58, %v2955_v33  ;;  %v6215_v11 = vld [vmem:[%s6576_s11 + $0xd8] sm:$0xff]  ;;  %v6216_v58 = vld [vmem:[%s6576_s11 + $0xe0] sm:$0xff] }
 0x1bf   : > { %5332 = vmatmul.mubr.f32.gmra.mrb[40].mxu0 %v8197_v49  ;;  %4882 = vmatprep.mubr.f32.mxu1 %v6209_v7  ;;  %v6211_v7 = vld [vmem:[%s6576_s11 + $0xb8] sm:$0xff]  ;;  %v6212_v49 = vld [vmem:[%s6576_s11 + $0xc0] sm:$0xff] }
 0x1c0   : > { %5334 = vmatprep.mubr.f32.mxu0 %v7562_v0  ;;  %v2957_v0 = vrot.slane %v7578_v50, 1 }
 0x1c2   : > { %4883 = vmatmul.mubr.f32.gmra.mrb[18].mxu1 %v6210_v55  ;;  %v2958_v55 = vsel %vm352_vm0, %v2955_v33, %v2957_v0  ;;  %v6219_v0 = vld [vmem:[%s6576_s11 + $0xf8] sm:$0xff]  ;;  %v6234_v33 = vld [vmem:[%s6576_s11 + $0x170] sm:$0xff] }
 0x1c3   : > { %5335 = vmatmul.mubr.f32.gmra.mrb[42].mxu0 %v7571_v63  ;;  %4885 = vmatprep.mubr.f32.mxu1 %v6211_v7  ;;  %v6214_v7 = vld [vmem:[%s6576_s11 + $0xd0] sm:$0xff] }
 0x1c4   : > { %5337 = vmatprep.mubr.f32.mxu0 %v7575_v53 }
 0x1c6   : > { %4886 = vmatmul.mubr.f32.gmra.mrb[20].mxu1 %v6212_v49  ;;  %v6217_v49 = vld [vmem:[%s6576_s11 + $0xe8] sm:$0xff] }
 0x1c7   : > { %5338 = vmatmul.mubr.f32.gmra.mrb[44].mxu0 %v2954_v27  ;;  %4888 = vmatprep.mubr.f32.mxu1 %v6213_v45  ;;  %v6218_v45 = vld [vmem:[%s6576_s11 + $0xf0] sm:$0xff] }
 0x1c8   : > { %5340 = vmatprep.mubr.f32.mxu0 %v2956_v38 }
 0x1ca   : > { %4889 = vmatmul.mubr.f32.gmra.mrb[22].mxu1 %v6214_v7 }
 0x1cb   : > { %5341 = vmatmul.mubr.f32.gmra.mrb[46].mxu0 %v2958_v55  ;;  %4891 = vmatprep.mubr.f32.mxu1 %v6215_v11 }
 0x1cc   : > { %5375 = vmatprep.mubr.f32.mxu0 %v8109_v60  ;;  %v6220_v60 = vld [vmem:[%s6576_s11 + $0x100] sm:$0xff] }
 0x1ce   : > { %4892 = vmatmul.mubr.f32.gmra.mrb[24].mxu1 %v6216_v58 }
 0x1cf   : > { %5376 = vmatmul.mubr.f32.vlgmr.msra.gmra.mrb[0].mxu0 %v8110_v18  ;;  %4894 = vmatprep.mubr.f32.mxu1 %v6217_v49  ;;  %v6221_v18 = vld [vmem:[%s6576_s11 + $0x108] sm:$0xff] }
 0x1d0   : > { %5378 = vmatprep.mubr.f32.mxu0 %v8111_v28  ;;  %v6222_v28 = vld [vmem:[%s6576_s11 + $0x110] sm:$0xff] }
 0x1d2   : > { %4895 = vmatmul.mubr.f32.gmra.mrb[26].mxu1 %v6218_v45 }
 0x1d3   : > { %5379 = vmatmul.mubr.f32.gmra.mrb[2].mxu0 %v8112_v9  ;;  %4897 = vmatprep.mubr.f32.mxu1 %v6219_v0  ;;  %v6223_v9 = vld [vmem:[%s6576_s11 + $0x118] sm:$0xff] }
 0x1d4   : > { %5381 = vmatprep.mubr.f32.mxu0 %v8113_v48  ;;  %v6224_v48 = vld [vmem:[%s6576_s11 + $0x120] sm:$0xff] }
 0x1d6   : > { %4898 = vmatmul.mubr.f32.gmra.mrb[28].mxu1 %v6220_v60 }
 0x1d7   : > { %5382 = vmatmul.mubr.f32.gmra.mrb[4].mxu0 %v8114_v52  ;;  %4900 = vmatprep.mubr.f32.mxu1 %v6221_v18  ;;  %v6225_v52 = vld [vmem:[%s6576_s11 + $0x128] sm:$0xff] }
 0x1d8   : > { %5384 = vmatprep.mubr.f32.mxu0 %v8115_v40  ;;  %v6226_v40 = vld [vmem:[%s6576_s11 + $0x130] sm:$0xff] }
 0x1da   : > { %4901 = vmatmul.mubr.f32.gmra.mrb[30].mxu1 %v6222_v28 }
 0x1db   : > { %5385 = vmatmul.mubr.f32.gmra.mrb[6].mxu0 %v8116_v47  ;;  %4903 = vmatprep.mubr.f32.mxu1 %v6223_v9  ;;  %v6227_v47 = vld [vmem:[%s6576_s11 + $0x138] sm:$0xff] }
 0x1dc   : > { %5387 = vmatprep.mubr.f32.mxu0 %v8117_v8  ;;  %v6228_v8 = vld [vmem:[%s6576_s11 + $0x140] sm:$0xff] }
 0x1de   : > { %4904 = vmatmul.mubr.f32.gmra.mrb[32].mxu1 %v6224_v48 }
 0x1df   : > { %5388 = vmatmul.mubr.f32.gmra.mrb[8].mxu0 %v8118_v62  ;;  %4906 = vmatprep.mubr.f32.mxu1 %v6225_v52  ;;  %v6229_v62 = vld [vmem:[%s6576_s11 + $0x148] sm:$0xff] }
 0x1e0   : > { %5390 = vmatprep.mubr.f32.mxu0 %v8119_v4  ;;  %v6230_v4 = vld [vmem:[%s6576_s11 + $0x150] sm:$0xff] }
 0x1e2   : > { %4907 = vmatmul.mubr.f32.gmra.mrb[34].mxu1 %v6226_v40 }
 0x1e3   : > { %5391 = vmatmul.mubr.f32.gmra.mrb[10].mxu0 %v8121_v20  ;;  %4909 = vmatprep.mubr.f32.mxu1 %v6227_v47  ;;  %v6231_v20 = vld [vmem:[%s6576_s11 + $0x158] sm:$0xff] }
 0x1e4   : > { %5393 = vmatprep.mubr.f32.mxu0 %v8122_v15  ;;  %v6232_v15 = vld [vmem:[%s6576_s11 + $0x160] sm:$0xff] }
 0x1e6   : > { %4910 = vmatmul.mubr.f32.gmra.mrb[36].mxu1 %v6228_v8 }
 0x1e7   : > { %5394 = vmatmul.mubr.f32.gmra.mrb[12].mxu0 %v8123_v42  ;;  %4912 = vmatprep.mubr.f32.mxu1 %v6229_v62  ;;  %v6233_v42 = vld [vmem:[%s6576_s11 + $0x168] sm:$0xff] }
 0x1e8   : > { %5396 = vmatprep.mubr.f32.mxu0 %v8124_v35  ;;  %v6235_v35 = vld [vmem:[%s6576_s11 + $0x178] sm:$0xff] }
 0x1ea   : > { %4913 = vmatmul.mubr.f32.gmra.mrb[38].mxu1 %v6230_v4 }
 0x1eb   : > { %5397 = vmatmul.mubr.f32.gmra.mrb[14].mxu0 %v8125_v2  ;;  %4915 = vmatprep.mubr.f32.mxu1 %v6231_v20  ;;  %v6236_v2 = vld [vmem:[%s6576_s11 + $0x180] sm:$0xff] }
 0x1ec   : > { %5399 = vmatprep.mubr.f32.mxu0 %v7114_v12  ;;  %v8198_v12 = vld [vmem:[#allocation71_spill] sm:$0xff] }
 0x1ee   : > { %4916 = vmatmul.mubr.f32.gmra.mrb[40].mxu1 %v6232_v15 }
 0x1ef   : > { %5400 = vmatmul.mubr.f32.gmra.mrb[16].mxu0 %v8127_v5  ;;  %4918 = vmatprep.mubr.f32.mxu1 %v6233_v42  ;;  %v8213_v5 = vld [vmem:[#allocation85_spill] sm:$0xff] }
 0x1f0   : > { %5402 = vmatprep.mubr.f32.mxu0 %v8128_v21  ;;  %v8214_v21 = vld [vmem:[#allocation98_spill] sm:$0xff] }
 0x1f2   : > { %4919 = vmatmul.mubr.f32.gmra.mrb[42].mxu1 %v6234_v33 }
 0x1f3   : > { %5403 = vmatmul.mubr.f32.gmra.mrb[18].mxu0 %v8130_v37  ;;  %4921 = vmatprep.mubr.f32.mxu1 %v6235_v35  ;;  %v8215_v37 = vld [vmem:[#allocation87_spill] sm:$0xff] }
 0x1f4   : > { %5405 = vmatprep.mubr.f32.mxu0 %v7157_v17  ;;  %v8199_v17 = vld [vmem:[#allocation90_spill] sm:$0xff] }
 0x1f6   : > { %4922 = vmatmul.mubr.f32.gmra.mrb[44].mxu1 %v6236_v2 }
 0x1f7   : > { %5406 = vmatmul.mubr.f32.gmra.mrb[20].mxu0 %v7161_v43  ;;  %4924 = vmatprep.mubr.f32.mxu1 %v7276_v54  ;;  %v8200_v43 = vld [vmem:[#allocation73_spill] sm:$0xff]  ;;  %v8212_v54 = vld [vmem:[#allocation44_spill] sm:$0xff] }
 0x1f8   : > { %5408 = vmatprep.mubr.f32.mxu0 %v7169_v30  ;;  %v8201_v30 = vld [vmem:[#allocation91_spill] sm:$0xff] }
 0x1fa   : > { %4925 = vmatmul.mubr.f32.gmra.mrb[46].mxu1 %v7281_v56  ;;  %v3302_v56 = vrot.slane %v8212_v54, 2 }
 0x1fb   : > { %5409 = vmatmul.mubr.f32.gmra.mrb[22].mxu0 %v8135_v3  ;;  %4995 = vmatprep.mubr.f32.mxu1 %v8157_v29  ;;  %v8216_v3 = vld [vmem:[#allocation34_spill] sm:$0xff] }
 0x1fc   : > { %5411 = vmatprep.mubr.f32.mxu0 %v8137_v36  ;;  %v8217_v36 = vld [vmem:[#allocation96_spill] sm:$0xff] }
 0x1fd   : > { %v8218_v29 = vrot.slane %v8217_v36, 2 }
 0x1fe   : > { %4996 = vmatmul.mubr.f32.vlgmr.msra.gmra.mrb[24].mxu1 %v8159_v39  ;;  %v3304_v39 = vrot.slane %v7578_v50, 2 }
 0x1ff   : > { %5412 = vmatmul.mubr.f32.gmra.mrb[24].mxu0 %v7186_v51  ;;  %4998 = vmatprep.mubr.f32.mxu1 %v8161_v22  ;;  %v8202_v51 = vld [vmem:[#allocation76_spill] sm:$0xff] }
 0x200   : > { %5414 = vmatprep.mubr.f32.mxu0 %v7194_v57  ;;  %v8203_v57 = vld [vmem:[#allocation92_spill] sm:$0xff]  ;;  %v3305_v22 = vsel %vm1093_vm1, %v3302_v56, %v3304_v39 }
 0x202   : > { %4999 = vmatmul.mubr.f32.gmra.mrb[26].mxu1 %v8162_v14 }
 0x203   : > { %5415 = vmatmul.mubr.f32.gmra.mrb[26].mxu0 %v7198_v46  ;;  %5001 = vmatprep.mubr.f32.mxu1 %v8163_v44  ;;  %v8204_v46 = vld [vmem:[#allocation78_spill] sm:$0xff] }
 0x204   : > { %5417 = vmatprep.mubr.f32.mxu0 %v7206_v32  ;;  %v8205_v32 = vld [vmem:[#allocation93_spill] sm:$0xff] }
 0x206   : > { %5002 = vmatmul.mubr.f32.gmra.mrb[28].mxu1 %v8164_v24 }
 0x207   : > { %5418 = vmatmul.mubr.f32.gmra.mrb[28].mxu0 %v7210_v13  ;;  %5004 = vmatprep.mubr.f32.mxu1 %v8167_v34  ;;  %v8206_v13 = vld [vmem:[#allocation80_spill] sm:$0xff] }
 0x208   : > { %5420 = vmatprep.mubr.f32.mxu0 %v7218_v1  ;;  %v8207_v1 = vld [vmem:[#allocation94_spill] sm:$0xff] }
 0x20a   : > { %5005 = vmatmul.mubr.f32.gmra.mrb[30].mxu1 %v8169_v19 }
 0x20b   : > { %5421 = vmatmul.mubr.f32.gmra.mrb[30].mxu0 %v7222_v41  ;;  %5007 = vmatprep.mubr.f32.mxu1 %v8172_v26  ;;  %v8208_v41 = vld [vmem:[#allocation81_spill] sm:$0xff] }
 0x20c   : > { %5423 = vmatprep.mubr.f32.mxu0 %v7230_v10  ;;  %v8209_v10 = vld [vmem:[#allocation95_spill] sm:$0xff] }
 0x20e   : > { %5008 = vmatmul.mubr.f32.gmra.mrb[32].mxu1 %v8174_v6 }
 0x20f   : > { %5424 = vmatmul.mubr.f32.gmra.mrb[32].mxu0 %v7234_v25  ;;  %5010 = vmatprep.mubr.f32.mxu1 %v8177_v31  ;;  %v8210_v25 = vld [vmem:[#allocation83_spill] sm:$0xff]  ;;  %v8219_v31 = vld [vmem:[#allocation45_spill] sm:$0xff] }
 0x210   : > { %5426 = vmatprep.mubr.f32.mxu0 %v7242_v23  ;;  %v3300_v23 = vrot.slane %v7448_v16, 2 }
 0x212   : > { %5011 = vmatmul.mubr.f32.gmra.mrb[34].mxu1 %v8179_v59  ;;  %v3301_v59 = vsel %vm1093_vm1, %v8218_v29, %v3300_v23  ;;  %v3303_v16 = vsel %vm1093_vm1, %v3300_v23, %v3302_v56 }
 0x213   : > { %5427 = vmatmul.mubr.f32.gmra.mrb[34].mxu0 %v7246_v61  ;;  %5013 = vmatprep.mubr.f32.mxu1 %v8198_v12  ;;  %v8211_v61 = vld [vmem:[#allocation97_spill] sm:$0xff] }
 0x214   : > { %5429 = vmatprep.mubr.f32.mxu0 %v8199_v17 }
 0x216   : > { %5014 = vmatmul.mubr.f32.gmra.mrb[36].mxu1 %v8200_v43 }
 0x217   : > { %5430 = vmatmul.mubr.f32.gmra.mrb[36].mxu0 %v8201_v30  ;;  %5016 = vmatprep.mubr.f32.mxu1 %v8202_v51 }
 0x218   : > { %5432 = vmatprep.mubr.f32.mxu0 %v8203_v57 }
 0x21a   : > { %5017 = vmatmul.mubr.f32.gmra.mrb[38].mxu1 %v8204_v46 }
 0x21b   : > { %5433 = vmatmul.mubr.f32.gmra.mrb[38].mxu0 %v8205_v32  ;;  %5019 = vmatprep.mubr.f32.mxu1 %v8206_v13 }
 0x21c   : > { %5435 = vmatprep.mubr.f32.mxu0 %v8207_v1 }
 0x21e   : > { %5020 = vmatmul.mubr.f32.gmra.mrb[40].mxu1 %v8208_v41 }
 0x21f   : > { %5436 = vmatmul.mubr.f32.gmra.mrb[40].mxu0 %v8209_v10  ;;  %5022 = vmatprep.mubr.f32.mxu1 %v8210_v25 }
 0x220   : > { %5438 = vmatprep.mubr.f32.mxu0 %v8211_v61 }
 0x222   : > { %5023 = vmatmul.mubr.f32.gmra.mrb[42].mxu1 %v8213_v5 }
 0x223   : > { %5439 = vmatmul.mubr.f32.gmra.mrb[42].mxu0 %v8214_v21  ;;  %5025 = vmatprep.mubr.f32.mxu1 %v8215_v37 }
 0x224   : > { %5441 = vmatprep.mubr.f32.mxu0 %v8216_v3 }
 0x226   : > { %5026 = vmatmul.mubr.f32.gmra.mrb[44].mxu1 %v8219_v31 }
 0x227   : > { %5442 = vmatmul.mubr.f32.gmra.mrb[44].mxu0 %v3301_v59  ;;  %5028 = vmatprep.mubr.f32.mxu1 %v7571_v63 }
 0x228   : > { %5444 = vmatprep.mubr.f32.mxu0 %v3303_v16 }
 0x22a   : > { %5029 = vmatmul.mubr.f32.gmra.mrb[46].mxu1 %v7575_v53 }
 0x22b   : > { %5445 = vmatmul.mubr.f32.gmra.mrb[46].mxu0 %v3305_v22 }
 0x271   : > { %v4857_v14 = vpop.f32.mrb[0].mxu1 }
 0x272   : > { %v1643_v44 = vpop.f32.mrb[1].mxu1 }
 0x275   : > { %v4860_v24 = vpop.f32.mrb[2].mxu1 }
 0x276   : > { %v1653_v34 = vpop.f32.mrb[3].mxu1 }
 0x279   : > { %v4863_v19 = vpop.f32.mrb[4].mxu1 }
 0x27a   : > { %v1662_v26 = vpop.f32.mrb[5].mxu1 }
 0x27d   : > { %v4866_v50 = vpop.f32.mrb[6].mxu1 }
 0x27e   : > { %v1671_v6 = vpop.f32.mrb[7].mxu1 }
 0x281   : > { %v4869_v27 = vpop.f32.mrb[8].mxu1 }
 0x282   : > { %v1681_v38 = vpop.f32.mrb[9].mxu1 }
 0x285   : > { %v4872_v55 = vpop.f32.mrb[10].mxu1 }
 0x286   : > { %v1690_v7 = vpop.f32.mrb[11].mxu1 }
 0x289   : > { %v7692_v63 = vpop.f32.mrb[12].mxu1 }
 0x28a   : > { %v7694_v11 = vpop.f32.mrb[13].mxu1 }
 0x28d   : > { %v7696_v58 = vpop.f32.mrb[14].mxu1 }
 0x28e   : > { %v1709_v53 = vpop.f32.mrb[15].mxu1 }
 0x291   : > { %v4881_v49 = vpop.f32.mrb[16].mxu1 }
 0x292   : > { %v7698_v45 = vpop.f32.mrb[17].mxu1 }
 0x295   : > { %v7700_v0 = vpop.f32.mrb[18].mxu1 }
 0x296   : > { %v7702_v60 = vpop.f32.mrb[19].mxu1 }
 0x299   : > { %v7704_v18 = vpop.f32.mrb[20].mxu1 }
 0x29a   : > { %v1737_v28 = vpop.f32.mrb[21].mxu1 }
 0x29d   : > { %v4890_v9 = vpop.f32.mrb[22].mxu1 }
 0x29e   : > { %v7706_v48 = vpop.f32.mrb[23].mxu1 }
 0x2a2   : > { %v5377_v52 = vpop.f32.mrb[0].mxu0 }
 0x2a3   : > { %v5751_v40 = vadd.f32 %v5377_v52, %v4857_v14  ;;  %v3375_v47 = vpop.f32.mrb[1].mxu0 }
 0x2a4   : > { %v5752_v8 = vadd.f32 %v3375_v47, %v1643_v44 }
 0x2a5   : > { %3631 = vst [vmem:[%s7709_s20 + $0x8] sm:$0xff] %v5751_v40  ;;  %v3700_v62 = vmul.f32 %v5751_v40, %v5751_v40 }
 0x2a6   : > { %3630 = vst [vmem:[%s7709_s20] sm:$0xff] %v5752_v8  ;;  %v3662_v4 = vadd.f32 %v5752_v8, %v5751_v40  ;;  %v3699_v20 = vmul.f32 %v5752_v8, %v5752_v8  ;;  %v5380_v15 = vpop.f32.mrb[2].mxu0 }
 0x2a7   : > { %v5753_v42 = vadd.f32 %v5380_v15, %v4860_v24  ;;  %v3385_v33 = vpop.f32.mrb[3].mxu0 }
 0x2a8   : > { %v3731_v35 = vadd.f32 %v3700_v62, %v3699_v20 }
 0x2a9   : > { %3632 = vst [vmem:[%s7709_s20 + $0x10] sm:$0xff] %v5753_v42  ;;  %v3663_v2 = vadd.f32 %v5753_v42, %v3662_v4  ;;  %v3701_v12 = vmul.f32 %v5753_v42, %v5753_v42 }
 0x2aa   : > { %v5383_v17 = vpop.f32.mrb[4].mxu0 }
 0x2ab   : > { %v3732_v43 = vadd.f32 %v3731_v35, %v3701_v12  ;;  %v3394_v30 = vpop.f32.mrb[5].mxu0 }
 0x2ac   : > { %v5754_v51 = vadd.f32 %v3394_v30, %v1662_v26 }
 0x2ae   : > { %3633 = vst [vmem:[%s7709_s20 + $0x18] sm:$0xff] %v5754_v51  ;;  %v3664_v57 = vadd.f32 %v5754_v51, %v3663_v2  ;;  %v3702_v46 = vmul.f32 %v5754_v51, %v5754_v51  ;;  %v5386_v32 = vpop.f32.mrb[6].mxu0 }
 0x2af   : > { %v5755_v13 = vadd.f32 %v5386_v32, %v4866_v50  ;;  %v3403_v1 = vpop.f32.mrb[7].mxu0 }
 0x2b0   : > { %v3733_v41 = vadd.f32 %v3732_v43, %v3702_v46  ;;  %v5756_v10 = vadd.f32 %v3403_v1, %v1671_v6 }
 0x2b1   : > { %3635 = vst [vmem:[%s7709_s20 + $0x28] sm:$0xff] %v5755_v13  ;;  %v3704_v5 = vmul.f32 %v5755_v13, %v5755_v13 }
 0x2b2   : > { %3634 = vst [vmem:[%s7709_s20 + $0x20] sm:$0xff] %v5756_v10  ;;  %v3665_v25 = vadd.f32 %v5756_v10, %v3664_v57  ;;  %v3703_v23 = vmul.f32 %v5756_v10, %v5756_v10  ;;  %v5389_v61 = vpop.f32.mrb[8].mxu0 }
 0x2b3   : > { %v5757_v54 = vadd.f32 %v5389_v61, %v4869_v27  ;;  %v3413_v56 = vpop.f32.mrb[9].mxu0 }
 0x2b4   : > { %v3734_v21 = vadd.f32 %v3733_v41, %v3703_v23  ;;  %v3666_v37 = vadd.f32 %v5755_v13, %v3665_v25 }
 0x2b5   : > { %3636 = vst [vmem:[%s7709_s20 + $0x30] sm:$0xff] %v5757_v54  ;;  %v3705_v3 = vmul.f32 %v5757_v54, %v5757_v54 }
 0x2b6   : > { %v3667_v36 = vadd.f32 %v5757_v54, %v3666_v37  ;;  %v3735_v29 = vadd.f32 %v3734_v21, %v3704_v5  ;;  %v5392_v59 = vpop.f32.mrb[10].mxu0 }
 0x2b7   : > { %v3422_v39 = vpop.f32.mrb[11].mxu0 }
 0x2b8   : > { %v3736_v16 = vadd.f32 %v3735_v29, %v3705_v3  ;;  %v5758_v31 = vadd.f32 %v3422_v39, %v1690_v7 }
 0x2ba   : > { %3637 = vst [vmem:[%s7709_s20 + $0x38] sm:$0xff] %v5758_v31  ;;  %v3668_v22 = vadd.f32 %v5758_v31, %v3667_v36  ;;  %v3706_v14 = vmul.f32 %v5758_v31, %v5758_v31  ;;  %v5395_v44 = vpop.f32.mrb[12].mxu0 }
 0x2bb   : > { %v5759_v24 = vadd.f32 %v5395_v44, %v7692_v63  ;;  %v3431_v34 = vpop.f32.mrb[13].mxu0 }
 0x2bc   : > { %v3737_v19 = vadd.f32 %v3736_v16, %v3706_v14  ;;  %v5760_v26 = vadd.f32 %v3431_v34, %v7694_v11 }
 0x2bd   : > { %3639 = vst [vmem:[%s7709_s20 + $0x48] sm:$0xff] %v5759_v24  ;;  %v3708_v7 = vmul.f32 %v5759_v24, %v5759_v24 }
 0x2be   : > { %3638 = vst [vmem:[%s7709_s20 + $0x40] sm:$0xff] %v5760_v26  ;;  %v3669_v50 = vadd.f32 %v5760_v26, %v3668_v22  ;;  %v3707_v6 = vmul.f32 %v5760_v26, %v5760_v26  ;;  %v5398_v27 = vpop.f32.mrb[14].mxu0 }
 0x2bf   : > { %v5761_v38 = vadd.f32 %v5398_v27, %v7696_v58  ;;  %v3441_v55 = vpop.f32.mrb[15].mxu0 }
 0x2c0   : > { %v3738_v53 = vadd.f32 %v3737_v19, %v3707_v6  ;;  %v3670_v49 = vadd.f32 %v5759_v24, %v3669_v50 }
 0x2c1   : > { %3640 = vst [vmem:[%s7709_s20 + $0x50] sm:$0xff] %v5761_v38  ;;  %v3709_v28 = vmul.f32 %v5761_v38, %v5761_v38 }
 0x2c2   : > { %v3671_v63 = vadd.f32 %v5761_v38, %v3670_v49  ;;  %v3739_v9 = vadd.f32 %v3738_v53, %v3708_v7  ;;  %v5401_v52 = vpop.f32.mrb[16].mxu0 }
 0x2c3   : > { %v3450_v11 = vpop.f32.mrb[17].mxu0 }
 0x2c4   : > { %v3740_v40 = vadd.f32 %v3739_v9, %v3709_v28  ;;  %v5762_v47 = vadd.f32 %v3450_v11, %v7698_v45 }
 0x2c6   : > { %3641 = vst [vmem:[%s7709_s20 + $0x58] sm:$0xff] %v5762_v47  ;;  %v3672_v8 = vadd.f32 %v5762_v47, %v3671_v63  ;;  %v3710_v62 = vmul.f32 %v5762_v47, %v5762_v47  ;;  %v5404_v58 = vpop.f32.mrb[18].mxu0 }
 0x2c7   : > { %v5763_v4 = vadd.f32 %v5404_v58, %v7700_v0  ;;  %v3459_v20 = vpop.f32.mrb[19].mxu0 }
 0x2c8   : > { %v3741_v15 = vadd.f32 %v3740_v40, %v3710_v62  ;;  %v5764_v42 = vadd.f32 %v3459_v20, %v7702_v60 }
 0x2c9   : > { %3643 = vst [vmem:[%s7709_s20 + $0x68] sm:$0xff] %v5763_v4  ;;  %v3712_v17 = vmul.f32 %v5763_v4, %v5763_v4 }
 0x2ca   : > { %3642 = vst [vmem:[%s7709_s20 + $0x60] sm:$0xff] %v5764_v42  ;;  %v3673_v33 = vadd.f32 %v5764_v42, %v3672_v8  ;;  %v3711_v35 = vmul.f32 %v5764_v42, %v5764_v42  ;;  %v5407_v2 = vpop.f32.mrb[20].mxu0 }
 0x2cb   : > { %v5765_v12 = vadd.f32 %v5407_v2, %v7704_v18  ;;  %v3469_v45 = vpop.f32.mrb[21].mxu0 }
 0x2cc   : > { %v3742_v43 = vadd.f32 %v3741_v15, %v3711_v35  ;;  %v3674_v30 = vadd.f32 %v5763_v4, %v3673_v33 }
 0x2cd   : > { %3644 = vst [vmem:[%s7709_s20 + $0x70] sm:$0xff] %v5765_v12  ;;  %v3713_v51 = vmul.f32 %v5765_v12, %v5765_v12 }
 0x2ce   : > { %v3675_v57 = vadd.f32 %v5765_v12, %v3674_v30  ;;  %v3743_v0 = vadd.f32 %v3742_v43, %v3712_v17  ;;  %v5410_v46 = vpop.f32.mrb[22].mxu0 }
 0x2cf   : > { %v3478_v60 = vpop.f32.mrb[23].mxu0 }
 0x2d0   : > { %v3744_v32 = vadd.f32 %v3743_v0, %v3713_v51  ;;  %v5766_v13 = vadd.f32 %v3478_v60, %v7706_v48 }
 0x2d1   : > { %v4997_v1 = vpop.f32.mrb[24].mxu1 }
 0x2d2   : > { %3645 = vst [vmem:[%s7709_s20 + $0x78] sm:$0xff] %v5766_v13  ;;  %v3676_v41 = vadd.f32 %v5766_v13, %v3675_v57  ;;  %v3714_v10 = vmul.f32 %v5766_v13, %v5766_v13  ;;  %v5413_v18 = vpop.f32.mrb[24].mxu0  ;;  %v2105_v25 = vpop.f32.mrb[25].mxu1 }
 0x2d3   : > { %v5767_v23 = vadd.f32 %v5413_v18, %v4997_v1  ;;  %v3487_v61 = vpop.f32.mrb[25].mxu0 }
 0x2d4   : > { %v3745_v54 = vadd.f32 %v3744_v32, %v3714_v10  ;;  %v5768_v56 = vadd.f32 %v3487_v61, %v2105_v25 }
 0x2d5   : > { %3647 = vst [vmem:[%s7709_s20 + $0x88] sm:$0xff] %v5767_v23  ;;  %v5000_v5 = vpop.f32.mrb[26].mxu1  ;;  %v3716_v59 = vmul.f32 %v5767_v23, %v5767_v23 }
 0x2d6   : > { %3646 = vst [vmem:[%s7709_s20 + $0x80] sm:$0xff] %v5768_v56  ;;  %v3677_v21 = vadd.f32 %v5768_v56, %v3676_v41  ;;  %v3715_v37 = vmul.f32 %v5768_v56, %v5768_v56  ;;  %v5416_v3 = vpop.f32.mrb[26].mxu0  ;;  %v2115_v36 = vpop.f32.mrb[27].mxu1 }
 0x2d7   : > { %v5769_v29 = vadd.f32 %v5416_v3, %v5000_v5  ;;  %v3497_v48 = vpop.f32.mrb[27].mxu0 }
 0x2d8   : > { %v3746_v39 = vadd.f32 %v3745_v54, %v3715_v37  ;;  %v3678_v16 = vadd.f32 %v5767_v23, %v3677_v21 }
 0x2d9   : > { %3648 = vst [vmem:[%s7709_s20 + $0x90] sm:$0xff] %v5769_v29  ;;  %v3717_v31 = vmul.f32 %v5769_v29, %v5769_v29  ;;  %v5003_v22 = vpop.f32.mrb[28].mxu1 }
 0x2da   : > { %v3679_v14 = vadd.f32 %v5769_v29, %v3678_v16  ;;  %v3747_v44 = vadd.f32 %v3746_v39, %v3716_v59  ;;  %v5419_v24 = vpop.f32.mrb[28].mxu0  ;;  %v2124_v34 = vpop.f32.mrb[29].mxu1 }
 0x2db   : > { %v3506_v19 = vpop.f32.mrb[29].mxu0 }
 0x2dc   : > { %v3748_v26 = vadd.f32 %v3747_v44, %v3717_v31  ;;  %v5770_v50 = vadd.f32 %v3506_v19, %v2124_v34 }
 0x2dd   : > { %v5006_v6 = vpop.f32.mrb[30].mxu1 }
 0x2de   : > { %3649 = vst [vmem:[%s7709_s20 + $0x98] sm:$0xff] %v5770_v50  ;;  %v3680_v27 = vadd.f32 %v5770_v50, %v3679_v14  ;;  %v3718_v38 = vmul.f32 %v5770_v50, %v5770_v50  ;;  %v5422_v55 = vpop.f32.mrb[30].mxu0  ;;  %v2133_v7 = vpop.f32.mrb[31].mxu1 }
 0x2df   : > { %v5771_v53 = vadd.f32 %v5422_v55, %v5006_v6  ;;  %v3515_v49 = vpop.f32.mrb[31].mxu0 }
 0x2e0   : > { %v3749_v28 = vadd.f32 %v3748_v26, %v3718_v38  ;;  %v5772_v63 = vadd.f32 %v3515_v49, %v2133_v7 }
 0x2e1   : > { %3651 = vst [vmem:[%s7709_s20 + $0xa8] sm:$0xff] %v5771_v53  ;;  %v5009_v9 = vpop.f32.mrb[32].mxu1  ;;  %v3720_v58 = vmul.f32 %v5771_v53, %v5771_v53 }
 0x2e2   : > { %3650 = vst [vmem:[%s7709_s20 + $0xa0] sm:$0xff] %v5772_v63  ;;  %v3681_v52 = vadd.f32 %v5772_v63, %v3680_v27  ;;  %v3719_v11 = vmul.f32 %v5772_v63, %v5772_v63  ;;  %v5425_v40 = vpop.f32.mrb[32].mxu0  ;;  %v2143_v47 = vpop.f32.mrb[33].mxu1 }
 0x2e3   : > { %v5773_v8 = vadd.f32 %v5425_v40, %v5009_v9  ;;  %v3525_v62 = vpop.f32.mrb[33].mxu0 }
 0x2e4   : > { %v3750_v4 = vadd.f32 %v3749_v28, %v3719_v11  ;;  %v3682_v20 = vadd.f32 %v5771_v53, %v3681_v52 }
 0x2e5   : > { %3652 = vst [vmem:[%s7709_s20 + $0xb0] sm:$0xff] %v5773_v8  ;;  %v3721_v15 = vmul.f32 %v5773_v8, %v5773_v8  ;;  %v5012_v42 = vpop.f32.mrb[34].mxu1 }
 0x2e6   : > { %v3683_v33 = vadd.f32 %v5773_v8, %v3682_v20  ;;  %v3751_v35 = vadd.f32 %v3750_v4, %v3720_v58  ;;  %v5428_v2 = vpop.f32.mrb[34].mxu0  ;;  %v2152_v12 = vpop.f32.mrb[35].mxu1 }
 0x2e7   : > { %v3534_v45 = vpop.f32.mrb[35].mxu0 }
 0x2e8   : > { %v3752_v17 = vadd.f32 %v3751_v35, %v3721_v15  ;;  %v5774_v43 = vadd.f32 %v3534_v45, %v2152_v12 }
 0x2e9   : > { %v5015_v30 = vpop.f32.mrb[36].mxu1 }
 0x2ea   : > { %3653 = vst [vmem:[%s7709_s20 + $0xb8] sm:$0xff] %v5774_v43  ;;  %v3684_v51 = vadd.f32 %v5774_v43, %v3683_v33  ;;  %v3722_v57 = vmul.f32 %v5774_v43, %v5774_v43  ;;  %v5431_v0 = vpop.f32.mrb[36].mxu0  ;;  %v2161_v46 = vpop.f32.mrb[37].mxu1 }
 0x2eb   : > { %v5775_v60 = vadd.f32 %v5431_v0, %v5015_v30  ;;  %v3543_v32 = vpop.f32.mrb[37].mxu0 }
 0x2ec   : > { %v3753_v13 = vadd.f32 %v3752_v17, %v3722_v57  ;;  %v5776_v1 = vadd.f32 %v3543_v32, %v2161_v46 }
 0x2ed   : > { %3655 = vst [vmem:[%s7709_s20 + $0xc8] sm:$0xff] %v5775_v60  ;;  %v5018_v41 = vpop.f32.mrb[38].mxu1  ;;  %v3724_v56 = vmul.f32 %v5775_v60, %v5775_v60 }
 0x2ee   : > { %3654 = vst [vmem:[%s7709_s20 + $0xc0] sm:$0xff] %v5776_v1  ;;  %v3685_v10 = vadd.f32 %v5776_v1, %v3684_v51  ;;  %v3723_v18 = vmul.f32 %v5776_v1, %v5776_v1  ;;  %v5434_v25 = vpop.f32.mrb[38].mxu0  ;;  %v2171_v23 = vpop.f32.mrb[39].mxu1 }
 0x2ef   : > { %v5777_v61 = vadd.f32 %v5434_v25, %v5018_v41  ;;  %v3553_v54 = vpop.f32.mrb[39].mxu0 }
 0x2f0   : > { %v3754_v5 = vadd.f32 %v3753_v13, %v3723_v18  ;;  %v3686_v21 = vadd.f32 %v5775_v60, %v3685_v10 }
 0x2f1   : > { %3656 = vst [vmem:[%s7709_s20 + $0xd0] sm:$0xff] %v5777_v61  ;;  %v3725_v37 = vmul.f32 %v5777_v61, %v5777_v61  ;;  %v5021_v3 = vpop.f32.mrb[40].mxu1 }
 0x2f2   : > { %v3687_v36 = vadd.f32 %v5777_v61, %v3686_v21  ;;  %v3755_v29 = vadd.f32 %v3754_v5, %v3724_v56  ;;  %v5437_v48 = vpop.f32.mrb[40].mxu0  ;;  %v2180_v59 = vpop.f32.mrb[41].mxu1 }
 0x2f3   : > { %v3562_v39 = vpop.f32.mrb[41].mxu0 }
 0x2f4   : > { %v3756_v16 = vadd.f32 %v3755_v29, %v3725_v37  ;;  %v5778_v31 = vadd.f32 %v3562_v39, %v2180_v59 }
 0x2f5   : > { %v5024_v22 = vpop.f32.mrb[42].mxu1 }
 0x2f6   : > { %3657 = vst [vmem:[%s7709_s20 + $0xd8] sm:$0xff] %v5778_v31  ;;  %v3688_v14 = vadd.f32 %v5778_v31, %v3687_v36  ;;  %v3726_v44 = vmul.f32 %v5778_v31, %v5778_v31  ;;  %v5440_v24 = vpop.f32.mrb[42].mxu0  ;;  %v2189_v34 = vpop.f32.mrb[43].mxu1 }
 0x2f7   : > { %v5779_v19 = vadd.f32 %v5440_v24, %v5024_v22  ;;  %v3571_v26 = vpop.f32.mrb[43].mxu0 }
 0x2f8   : > { %v3757_v50 = vadd.f32 %v3756_v16, %v3726_v44  ;;  %v5780_v6 = vadd.f32 %v3571_v26, %v2189_v34 }
 0x2f9   : > { %3659 = vst [vmem:[%s7709_s20 + $0xe8] sm:$0xff] %v5779_v19  ;;  %v5027_v27 = vpop.f32.mrb[44].mxu1  ;;  %v3728_v63 = vmul.f32 %v5779_v19, %v5779_v19 }
 0x2fa   : > { %3658 = vst [vmem:[%s7709_s20 + $0xe0] sm:$0xff] %v5780_v6  ;;  %v3689_v38 = vadd.f32 %v5780_v6, %v3688_v14  ;;  %v3727_v55 = vmul.f32 %v5780_v6, %v5780_v6  ;;  %v5443_v7 = vpop.f32.mrb[44].mxu0  ;;  %v2199_v53 = vpop.f32.mrb[45].mxu1 }
 0x2fb   : > { %v5781_v49 = vadd.f32 %v5443_v7, %v5027_v27  ;;  %v3581_v28 = vpop.f32.mrb[45].mxu0 }
 0x2fc   : > { %v3758_v9 = vadd.f32 %v3757_v50, %v3727_v55  ;;  %v3690_v52 = vadd.f32 %v5779_v19, %v3689_v38 }
 0x2fd   : > { %3660 = vst [vmem:[%s7709_s20 + $0xf0] sm:$0xff] %v5781_v49  ;;  %v3729_v11 = vmul.f32 %v5781_v49, %v5781_v49  ;;  %v5030_v40 = vpop.f32.mrb[46].mxu1 }
 0x2fe   : > { %v3691_v47 = vadd.f32 %v5781_v49, %v3690_v52  ;;  %v3759_v8 = vadd.f32 %v3758_v9, %v3728_v63  ;;  %v5446_v62 = vpop.f32.mrb[46].mxu0  ;;  %v2208_v58 = vpop.f32.mrb[47].mxu1 }
 0x2ff   : > { %v3590_v4 = vpop.f32.mrb[47].mxu0 }
 0x300   : > { %v3760_v20 = vadd.f32 %v3759_v8, %v3729_v11  ;;  %v5782_v15 = vadd.f32 %v3590_v4, %v2208_v58 }
 0x302   : > { %3661 = vst [vmem:[%s7709_s20 + $0xf8] sm:$0xff] %v5782_v15  ;;  %v3692_v42 = vadd.f32 %v5782_v15, %v3691_v47  ;;  %v3730_v33 = vmul.f32 %v5782_v15, %v5782_v15 }
 0x303   : > { %6308 = shalt.err (!%p6305_p7)
}
 0x304   : > { %s6309_s26 = scalar_lea.hbm %s7755_s4, 4096  ;;  %s6313_s10 = scalar_lea.hbm %s7835_s2, 8192 }
 0x305   : > { %p6310_p9 = scmp.ne.s32.totalorder %s7755_s4, %s6309_s26  ;;  %p6314_p5 = scmp.lt.u32.totalorder %s7755_s4, %s7835_s2 }
 0x306   : > { %p6315_p13 = scmp.lt.u32.totalorder %s6313_s10, %s6309_s26  ;;  %p6317_p4 = scmp.lt.u32.totalorder %s6309_s26, %s7755_s4 }
 0x307   : > { %p6311_p1 = pnand %p6310_p9, %p6521_p12 }
 0x308   : > { %p6316_p2 = por %p6315_p13, %p6314_p5 }
 0x309   : > { %p6312_p0 = pneg %p6311_p1 }
 0x30a   : > { %p6318_p6 = por %p6317_p4, %p6316_p2 }
 0x30c   : > { %p6319_p8 = pnand %p6318_p6, %p6312_p0 }
 0x30e   : > { %6322 = shalt.err (!%p6319_p8)
}
 0x30f   : > { %s6404_s20 = smov 128   ;;  %s6405_s8 = smov 8   ;;  %v3693_v35 = vrot.slane %v3692_v42, 4  ;;  %v3761_v2 = vadd.f32 %v3760_v20, %v3730_v33  ;;  %vm3768_vm2 = vcmask 1040384  }
 0x310   : > { %6128 = dma.vmem_to_hbm [thread:$0]  (%p6521_p12), %s7757_s9, 4096, %s7755_s4, %s3772_s5, %s6404_s20, %s6404_s20, %s6405_s8  }
 0x311   : > { %v3694_v12 = vadd.f32 %v3693_v35, %v3692_v42  ;;  %v3762_v45 = vrot.slane %v3761_v2, 4  ;;  %s3926_s29 = sshll.u32 %s6572_s6, 1  ;;  %s3931_s25 = sshll.u32 %s6448_s16, 5 }
 0x312   : > { %s214_s27 = scalar_lea.vmem [#allocation8], %s3926_s29  ;;  %s7789_s5 = scalar_lea.hbm %s7836_s3, %s3931_s25 }
 0x313   : > { %v3695_v17 = vrot.slane %v3694_v12, 2  ;;  %v3763_v43 = vadd.f32 %v3762_v45, %v3761_v2  ;;  %s3806_s22 = sshll.u32 %s214_s27, 4  ;;  %s3777_s23 = scalar_lea.sflag [#allocation9], %s6572_s6  ;;  %s7791_s22 = int_to_ptr.vmem [resolvable:$true] %s3806_s22 }
 0x314   : > { %s6323_s28 = scalar_lea.vmem %s7791_s22, 32  ;;  %s6406_s16 = smov [#allocation8]  }
 0x315   : > { %v3696_v30 = vadd.f32 %v3695_v17, %v3694_v12  ;;  %v3764_v51 = vrot.slane %v3763_v43, 2  ;;  %p6324_p10 = scmp.ne.s32.totalorder %s7791_s22, %s6323_s28  ;;  %s6327_s26 = sshll.u32 %s6406_s16, 4  ;;  %s6328_s26 = int_to_ptr.vmem [resolvable:$false] %s6327_s26 }
 0x316   : > { %s6329_s30 = scalar_lea.vmem %s6328_s26, 64  ;;  %p6330_p7 = scmp.lt.s32.totalorder %s7791_s22, %s6328_s26 }
 0x317   : > { %v3697_v57 = vrot.slane %v3696_v30, 1  ;;  %v3765_v0 = vadd.f32 %v3764_v51, %v3763_v43  ;;  %p6325_p11 = pnand %p6324_p10, %p6521_p12  ;;  %p6331_p9 = scmp.lt.s32.totalorder %s6329_s30, %s6323_s28 }
 0x319   : > { %v3766_v46 = vrot.slane %v3765_v0, 1  ;;  %v3698_v60 = vadd.f32 %v3697_v57, %v3696_v30  ;;  %p6326_p3 = pneg %p6325_p11  ;;  %p6332_p1 = por %p6331_p9, %p6330_p7 }
 0x31b   : > { %v3767_v32 = vadd.f32 %v3766_v46, %v3765_v0  ;;  %p6333_p0 = pnand %p6332_p1, %p6326_p3 }
 0x31d   : > { %v3769_v13 = vsel %vm3768_vm2, %v3698_v60, %v3767_v32 }
 0x31e   : > { %3770 = vst [vmem:[%s214_s27] sm:$0x3] %v3769_v13 }
 0x31f   : > { %6336 = shalt.err (!%p6333_p0)
}
 0x320   : > { %s6337_s6 = scalar_lea.hbm %s7789_s5, 32  ;;  %s6341_s11 = scalar_lea.hbm %s7836_s3, 64 }
 0x321   : > { %p6338_p5 = scmp.ne.s32.totalorder %s7789_s5, %s6337_s6  ;;  %p6342_p4 = scmp.lt.u32.totalorder %s7789_s5, %s7836_s3 }
 0x322   : > { %p6343_p6 = scmp.lt.u32.totalorder %s6341_s11, %s6337_s6  ;;  %p6345_p10 = scmp.lt.u32.totalorder %s6337_s6, %s7789_s5 }
 0x323   : > { %p6339_p13 = pnand %p6338_p5, %p6521_p12 }
 0x324   : > { %p6344_p8 = por %p6343_p6, %p6342_p4 }
 0x325   : > { %p6340_p2 = pneg %p6339_p13 }
 0x326   : > { %p6346_p11 = por %p6345_p10, %p6344_p8 }
 0x328   : > { %p6347_p3 = pnand %p6346_p11, %p6340_p2 }
 0x32a   : > { %6350 = shalt.err (!%p6347_p3)
}
 0x32b   : > { %6129 = dma.vmem_to_hbm [thread:$0]  (%p6521_p12), %s7791_s22, 32, %s7789_s5, %s3777_s23  }
 0x32c PF: > { %s3818_s8 = sand.u32 1, %s6385_s12   ;;  %p8220_p7 = scmp.ne.s32.totalorder %s7998_s19, 0 }
 0x32d   : > { %p8221_p9 = scmp.ge.s32.totalorder %s6397_s15, 2  ;;  %s3819_s29 = scalar_lea.sflag [#allocation4], %s3818_s8 }
 0x32f   : > { %p6141_p1 = pnand %p8221_p9, %p8220_p7 }
 0x331   : > { %6376 = dma.done.wait (!%p6141_p1), %s3819_s29, 4096  }
 0x332   : > { %6378 = vsyncadd (!%p6141_p1), %s3819_s29, 4294963200  ;;  %s3828_s25 = scalar_lea.sflag [#allocation9], %s3818_s8 }
 0x333   : > { %6380 = dma.done.wait (!%p6141_p1), %s3828_s25, 32  }
 0x334   : > { %6382 = vsyncadd (!%p6141_p1), %s3828_s25, 4294967264  ;;  %p21_p12 = scmp.ge.s32.totalorder %s6483_s24, 4   ;;  %s8222_s12 = smov %s6389_s13 }
 0x335   : > { %s8223_s13 = smov %s6393_s14  ;;  %s8224_s14 = smov %s6517_s17 }
 0x336   : > { %s8225_s15 = smov %s6483_s24  ;;  %23 = sbr.rel (!%p21_p12) target bundleno = 8 (0x8), region = 102 }
 0x33d   :  { %3833 = vsyncpa [#allocation3], 1 }
 0x33e   :  { %3835 = vsyncpa [#allocation3 + $0x1], 1 }
 0x33f   :  { %3836 = vsyncpa [#allocation6], 1 }
 0x340   :  { %3837 = vsyncpa [#allocation4], 1 }
 0x341   :  { %3839 = vsyncpa [#allocation4 + $0x1], 1 }
 0x342   :  { %3840 = vsyncpa [#allocation9], 1 }
 0x343   :  { %3842 = vsyncpa [#allocation9 + $0x1], 1 }

</bundles_post_ra>
